<compile_context>
chip_gen: v6e
topology: v6e:2x2x1
jax: 0.10.0
libtpu: 0.0.40
codegen_flags: <defaults>
</compile_context>

<pallas_src>
import jax
import jax.numpy as jnp
from jax.experimental import pallas as pl
from jax.experimental.pallas import tpu as pltpu

NEG_INF = -1e6      # MultiHeadAttention.NEG_INF
EPS_LN = 1e-5       # ml-agents LayerNorm epsilon
EPS_POOL = 1e-7     # ResidualSelfAttention.EPSILON

NUM_HEADS = 2
EMB = 16            # attention embedding size
HEAD = EMB // NUM_HEADS
HIDDEN = 256        # LSTM hidden size
N_ENT = 16          # rows of the (16,16) `concate` == mask batch size


# ------------------------------------------------------------- BlockSpec helpers
def _im1(i): return (0,)
def _im2(i): return (0, 0)
def _im3(i): return (0, 0, 0)
_IMAPS = {1: _im1, 2: _im2, 3: _im3}


def _full(arr):
    """Whole-array block, resident in VMEM for the single grid step."""
    return pl.BlockSpec(arr.shape, _IMAPS[arr.ndim])


_ARB = pltpu.CompilerParams(dimension_semantics=("arbitrary",))


# ------------------------------------------------- kernel 1: input / entity encode
def _encode_kernel(x_ref, w23_ref, b23_ref, entw_ref, entb_ref, o_ref):
    # fc_input2 / fc_input3 as ONE block-diagonal matmul on the zero-padded
    # stacked input (row 0 hits fc2 weights, row 1 hits fc3 weights).
    fc = jnp.dot(x_ref[...], w23_ref[...],
                 preferred_element_type=jnp.float32) + b23_ref[...]          # (2,128)
    # EntityEmbedding (self_size==0) -> LinearEncoder(128,1,128): Linear + Swish,
    # batched over both entities.  bf16 weights, f32 accumulate / elementwise.
    pre = jnp.dot(fc.astype(jnp.bfloat16), entw_ref[...],
                  preferred_element_type=jnp.float32) + entb_ref[...]        # (2,128)
    o_ref[...] = pre * jax.nn.sigmoid(pre)                                   # Swish


def encode_entities(x23, w23, b23, ent_w, ent_b):
    args = (x23, w23, b23, ent_w, ent_b)
    return pl.pallas_call(
        _encode_kernel,
        grid=(1,),
        in_specs=[_full(a) for a in args],
        out_specs=pl.BlockSpec((2, 128), _im2),
        out_shape=jax.ShapeDtypeStruct((2, 128), jnp.float32),
        compiler_params=_ARB,
    )(*args)


# -------------------------------------- kernel 2: ResidualSelfAttention(16, heads=2)
def _attention_kernel(c_ref, qw_ref, qb_ref, kw_ref, kb_ref,
                      vow_ref, vob_ref, outb_ref, o_ref):
    concate = c_ref[...]                      # (16,16); same matrix is the key mask
    mask = concate
    keep = 1.0 - mask

    # embedding_norm (LayerNorm, no affine)
    mean = jnp.mean(concate, axis=-1, keepdims=True)
    var = jnp.mean((concate - mean) ** 2, axis=-1, keepdims=True)
    inp = (concate - mean) * jax.lax.rsqrt(var + EPS_LN)

    # Multi-head attention, all 16 mask rows at once (no per-mask grid).
    # 1/sqrt(emb) is pre-folded into the q projection; fc_out is pre-folded into
    # the value projection, so each head directly produces its fc_out share.
    acc = None
    for h in range(NUM_HEADS):
        q_h = jnp.dot(inp, qw_ref[h], preferred_element_type=jnp.float32) + qb_ref[h]
        k_h = jnp.dot(inp, kw_ref[h], preferred_element_type=jnp.float32) + kb_ref[h]
        vo_h = jnp.dot(inp, vow_ref[h], preferred_element_type=jnp.float32) + vob_ref[h]
        scores = jax.lax.dot_general(q_h, k_h, (((1,), (1,)), ((), ())),
                                     preferred_element_type=jnp.float32)     # (q,k)
        qk = keep[:, None, :] * scores[None, :, :] + mask[:, None, :] * NEG_INF
        qk_max = jnp.max(qk, axis=-1, keepdims=True)                         # softmax(k)
        e = jnp.exp(qk - qk_max)
        att = e / jnp.sum(e, axis=-1, keepdims=True)                         # (m,q,k)
        vo_b = jnp.broadcast_to(vo_h, (N_ENT, EMB, EMB))                     # (m,k,d)
        contrib = jnp.einsum("mqk,mkd->mqd", att, vo_b,
                             preferred_element_type=jnp.float32)             # (m,q,d)
        acc = contrib if acc is None else acc + contrib

    # fc_out bias + residual add + residual_norm
    z = acc + outb_ref[...] + inp[None, :, :]
    zmean = jnp.mean(z, axis=-1, keepdims=True)
    zvar = jnp.mean((z - zmean) ** 2, axis=-1, keepdims=True)
    zn = (z - zmean) * jax.lax.rsqrt(zvar + EPS_LN)

    # masked mean pooling (torch ref: denominator sums the WHOLE mask -> scalar)
    numer = jnp.sum(zn * keep[:, :, None], axis=1)                           # (m,emb)
    denom = jnp.sum(keep, keepdims=True) + EPS_POOL                          # (1,1)
    o_ref[...] = numer / denom


def attention_pool(concate, qw, qb, kw, kb, vow, vob, out_b):
    args = (concate, qw, qb, kw, kb, vow, vob, out_b)
    return pl.pallas_call(
        _attention_kernel,
        grid=(1,),
        in_specs=[_full(a) for a in args],
        out_specs=pl.BlockSpec((N_ENT, EMB), _im2),
        out_shape=jax.ShapeDtypeStruct((N_ENT, EMB), jnp.float32),
        compiler_params=_ARB,
    )(*args)


# ---------------------------------------- kernel 3: dense LinearEncoder + LSTM step
def _dense_lstm_kernel(x_ref, dw_ref, db_ref, lw_ref, lb_ref, h_ref, c_ref):
    # LinearEncoder(256, 1, 256): Linear + Swish  (bf16 weights, f32 math)
    d = jnp.dot(x_ref[...].astype(jnp.bfloat16), dw_ref[...],
                preferred_element_type=jnp.float32) + db_ref[...]
    d = d * jax.nn.sigmoid(d)
    # LSTM(256,256), batch_first, single step, zero initial state.  The
    # forget-gate weight/bias columns were dropped (f * c0 == 0); the trimmed
    # gate order is [i | g | o].  h0 == 0 kills the recurrent matmul entirely.
    gates = jnp.dot(d.astype(jnp.bfloat16), lw_ref[...],
                    preferred_element_type=jnp.float32) + lb_ref[...]        # (1,768)
    i = jax.nn.sigmoid(gates[:, 0:HIDDEN])
    g = jnp.tanh(gates[:, HIDDEN:2 * HIDDEN])
    o = jax.nn.sigmoid(gates[:, 2 * HIDDEN:3 * HIDDEN])
    c = i * g
    h_ref[...] = o * jnp.tanh(c)
    c_ref[...] = c


def dense_lstm(x, dense_w, dense_b, lstm_w, lstm_b):
    args = (x, dense_w, dense_b, lstm_w, lstm_b)
    return pl.pallas_call(
        _dense_lstm_kernel,
        grid=(1,),
        in_specs=[_full(a) for a in args],
        out_specs=(pl.BlockSpec((1, HIDDEN), _im2),
                   pl.BlockSpec((1, HIDDEN), _im2)),
        out_shape=(jax.ShapeDtypeStruct((1, HIDDEN), jnp.float32),
                   jax.ShapeDtypeStruct((1, HIDDEN), jnp.float32)),
        compiler_params=_ARB,
    )(*args)


# --------------------------------------------------------------------- parameters
def _init_linear(key, fan_in, fan_out):
    w = jax.random.normal(key, (fan_in, fan_out), jnp.float32) / jnp.sqrt(float(fan_in))
    b = jnp.zeros((fan_out,), jnp.float32)
    return w, b


def build_params(key):
    """Raw torch-style parameters (weights stored as (in, out) = W^T)."""
    ks = jax.random.split(key, 12)
    p = {}
    # fc_input1 (174->128) is dead: EntityEmbedding.self_size == 0 so x_self never
    # reaches the rest of the graph; per the perf review it is not materialized.
    p["fc2_w"], p["fc2_b"] = _init_linear(ks[1], 15, 128)
    p["fc3_w"], p["fc3_b"] = _init_linear(ks[2], 22, 128)
    p["ent_w"], p["ent_b"] = _init_linear(ks[3], 128, 128)   # EntityEmbedding encoder
    p["q_w"], p["q_b"] = _init_linear(ks[4], EMB, EMB)
    p["k_w"], p["k_b"] = _init_linear(ks[5], EMB, EMB)
    p["v_w"], p["v_b"] = _init_linear(ks[6], EMB, EMB)
    p["out_w"], p["out_b"] = _init_linear(ks[7], EMB, EMB)
    p["dense_w"], p["dense_b"] = _init_linear(ks[8], 256, 256)
    p["lstm_wih"] = jax.random.normal(ks[9], (256, 4 * HIDDEN), jnp.float32) * 0.05
    # b_ih + b_hh (both zero-init), forget_bias=1.0 added to each forget chunk.
    p["lstm_bias"] = jnp.zeros((4 * HIDDEN,), jnp.float32).at[HIDDEN:2 * HIDDEN].add(2.0)
    return p


def prepare_params(p):
    """One-time fold / pack of raw params into the kernel-ready layout."""
    d = {}
    # fc2 | fc3 stacked so the zero-padded (2,37) input hits them block-diagonally.
    d["w23"] = jnp.concatenate([p["fc2_w"], p["fc3_w"]], axis=0)            # (37,128)
    d["b23"] = jnp.stack([p["fc2_b"], p["fc3_b"]], axis=0)                  # (2,128)
    d["ent_w"] = p["ent_w"].astype(jnp.bfloat16)                            # (128,128)
    d["ent_b"] = p["ent_b"].reshape(1, 128)

    # Head-major attention weights; 1/sqrt(emb) folded into q; fc_out folded into v.
    scale = float(EMB) ** 0.5
    qw_s, qb_s = p["q_w"] / scale, p["q_b"] / scale
    qw, qb, kw, kb, vow, vob = [], [], [], [], [], []
    for h in range(NUM_HEADS):
        lo, hi = h * HEAD, (h + 1) * HEAD
        qw.append(qw_s[:, lo:hi]);       qb.append(qb_s[lo:hi].reshape(1, HEAD))
        kw.append(p["k_w"][:, lo:hi]);   kb.append(p["k_b"][lo:hi].reshape(1, HEAD))
        vow.append(p["v_w"][:, lo:hi] @ p["out_w"][lo:hi, :])               # (16,16)
        vob.append(p["v_b"][lo:hi][None, :] @ p["out_w"][lo:hi, :])         # (1,16)
    d["qw"] = jnp.stack(qw); d["qb"] = jnp.stack(qb)                        # (2,16,8)/(2,1,8)
    d["kw"] = jnp.stack(kw); d["kb"] = jnp.stack(kb)
    d["vow"] = jnp.stack(vow); d["vob"] = jnp.stack(vob)                    # (2,16,16)/(2,1,16)
    d["out_b"] = p["out_b"].reshape(1, EMB)

    d["dense_w"] = p["dense_w"].astype(jnp.bfloat16)                        # (256,256)
    d["dense_b"] = p["dense_b"].reshape(1, HIDDEN)
    # Drop dead forget-gate columns (c0 == 0 => f*c0 == 0): keep [i | g | o].
    w, b = p["lstm_wih"], p["lstm_bias"]
    d["lstm_w"] = jnp.concatenate(
        [w[:, 0:HIDDEN], w[:, 2 * HIDDEN:4 * HIDDEN]], axis=1).astype(jnp.bfloat16)  # (256,768)
    d["lstm_b"] = jnp.concatenate(
        [b[0:HIDDEN], b[2 * HIDDEN:4 * HIDDEN]]).reshape(1, 3 * HIDDEN)
    return d


# ------------------------------------------------------------------- forward pass
@jax.jit
def forward(kp, input1, input2, input3):
    # fc_input1 / input1 never affects the output (EntityEmbedding.self_size == 0).
    del input1
    # Zero-padded stack so fc_input2 / fc_input3 run as one matmul in kernel 1.
    x23 = jnp.concatenate(
        [jnp.pad(input2, ((0, 0), (0, 22))),
         jnp.pad(input3, ((0, 0), (15, 0)))], axis=0)                       # (2,37)

    e = encode_entities(x23, kp["w23"], kp["b23"], kp["ent_w"], kp["ent_b"])  # (2,128)
    # torch.cat([e1, e2]).reshape(16, 16); this matrix is also the key mask.
    # Row-major relabel of the same bytes — done outside the kernel on purpose
    # (avoids Mosaic lane/sublane relayout inside the kernel).
    concate = e.reshape(N_ENT, EMB)

    pooled = attention_pool(concate, kp["qw"], kp["qb"], kp["kw"], kp["kb"],
                            kp["vow"], kp["vob"], kp["out_b"])              # (16,16)
    residual = pooled.reshape(1, N_ENT * EMB)                               # (1,256)

    h, c = dense_lstm(residual, kp["dense_w"], kp["dense_b"],
                      kp["lstm_w"], kp["lstm_b"])                           # (1,256) each
    out = h.reshape(1, 1, HIDDEN)
    h_n = h.reshape(1, 1, HIDDEN)
    c_n = c.reshape(1, 1, HIDDEN)
    # nn.LSTM returns (output, (h_n, c_n))
    return out, (h_n, c_n)


if __name__ == "__main__":
    key = jax.random.PRNGKey(0)
    k1, k2, k3, kparam = jax.random.split(key, 4)
    # batch must be 1 so that cat([e1, e2]).reshape(16, 16) is valid (2*128 = 256)
    input1 = jax.random.normal(k1, (1, 174), jnp.float32)
    input2 = jax.random.normal(k2, (1, 15), jnp.float32)
    input3 = jax.random.normal(k3, (1, 22), jnp.float32)

    raw_params = build_params(kparam)
    kparams = prepare_params(raw_params)

    out, (h_n, c_n) = forward(kparams, input1, input2, input3)
    jax.block_until_ready((out, h_n, c_n))

    assert out.shape == (1, 1, 256) and h_n.shape == (1, 1, 256) and c_n.shape == (1, 1, 256)
    print("KERNEL_OK")
</pallas_src>

<mosaic_0001>
module attributes {stable_mosaic.version = 11 : i64} {
  func.func @_encode_kernel(%arg0: i32, %arg1: memref<2x37xf32, #tpu.memory_space<vmem>>, %arg2: memref<37x128xf32, #tpu.memory_space<vmem>>, %arg3: memref<2x128xf32, #tpu.memory_space<vmem>>, %arg4: memref<128x128xbf16, #tpu.memory_space<vmem>>, %arg5: memref<1x128xf32, #tpu.memory_space<vmem>>, %arg6: memref<2x128xf32, #tpu.memory_space<vmem>>) attributes {dimension_semantics = [#tpu.dimension_semantics<arbitrary>], iteration_bounds = array<i64: 1>, scalar_prefetch = 0 : i64, scratch_operands = 0 : i64, tpu.core_type = #tpu.core_type<tc>, window_params = [{pipeline_mode = #tpu.pipeline_mode<synchronous>, transform_indices = @transform_0, window_bounds = array<i64: 2, 37>}, {pipeline_mode = #tpu.pipeline_mode<synchronous>, transform_indices = @transform_1, window_bounds = array<i64: 37, 128>}, {pipeline_mode = #tpu.pipeline_mode<synchronous>, transform_indices = @transform_2, window_bounds = array<i64: 2, 128>}, {pipeline_mode = #tpu.pipeline_mode<synchronous>, transform_indices = @transform_3, window_bounds = array<i64: 128, 128>}, {pipeline_mode = #tpu.pipeline_mode<synchronous>, transform_indices = @transform_4, window_bounds = array<i64: 1, 128>}, {pipeline_mode = #tpu.pipeline_mode<synchronous>, transform_indices = @transform_5, window_bounds = array<i64: 2, 128>}]} {
    %c0 = arith.constant 0 : index
    %c0_0 = arith.constant 0 : index
    %0 = vector.load %arg1[%c0, %c0_0] : memref<2x37xf32, #tpu.memory_space<vmem>>, vector<2x37xf32>
    %c0_1 = arith.constant 0 : index
    %c0_2 = arith.constant 0 : index
    %1 = vector.load %arg2[%c0_1, %c0_2] : memref<37x128xf32, #tpu.memory_space<vmem>>, vector<37x128xf32>
    %cst = arith.constant dense<0.000000e+00> : vector<2x128xf32>
    %2 = tpu.matmul %0, %1, %cst {dimension_numbers = #tpu.dot_dimension_numbers<[1], [0], [0], [1], [0, 0, 1, 1], [], []>} : vector<2x37xf32>, vector<37x128xf32>, vector<2x128xf32> -> vector<2x128xf32>
    %c0_3 = arith.constant 0 : index
    %c0_4 = arith.constant 0 : index
    %3 = vector.load %arg3[%c0_3, %c0_4] : memref<2x128xf32, #tpu.memory_space<vmem>>, vector<2x128xf32>
    %4 = arith.addf %2, %3 : vector<2x128xf32>
    %5 = arith.truncf %4 : vector<2x128xf32> to vector<2x128xbf16>
    %c0_5 = arith.constant 0 : index
    %c0_6 = arith.constant 0 : index
    %6 = vector.load %arg4[%c0_5, %c0_6] : memref<128x128xbf16, #tpu.memory_space<vmem>>, vector<128x128xbf16>
    %cst_7 = arith.constant dense<0.000000e+00> : vector<2x128xf32>
    %7 = tpu.matmul %5, %6, %cst_7 {dimension_numbers = #tpu.dot_dimension_numbers<[1], [0], [0], [1], [0, 0, 1, 1], [], []>} : vector<2x128xbf16>, vector<128x128xbf16>, vector<2x128xf32> -> vector<2x128xf32>
    %c0_8 = arith.constant 0 : index
    %c0_9 = arith.constant 0 : index
    %8 = vector.load %arg5[%c0_8, %c0_9] : memref<1x128xf32, #tpu.memory_space<vmem>>, vector<1x128xf32>
    %9 = vector.broadcast %8 : vector<1x128xf32> to vector<2x128xf32>
    %10 = arith.addf %7, %9 : vector<2x128xf32>
    %11 = arith.negf %10 : vector<2x128xf32>
    %12 = math.exp %11 : vector<2x128xf32>
    %cst_10 = arith.constant 1.000000e+00 : f32
    %13 = vector.broadcast %cst_10 : f32 to vector<2x128xf32>
    %14 = arith.addf %13, %12 : vector<2x128xf32>
    %15 = arith.divf %13, %14 : vector<2x128xf32>
    %16 = arith.mulf %10, %15 : vector<2x128xf32>
    %c0_11 = arith.constant 0 : index
    %c0_12 = arith.constant 0 : index
    %17 = vector.load %arg6[%c0_11, %c0_12] : memref<2x128xf32, #tpu.memory_space<vmem>>, vector<2x128xf32>
    tpu.vector_store %arg6[%c0_11, %c0_12], %16 {strides = array<i32>} : memref<2x128xf32, #tpu.memory_space<vmem>>, vector<2x128xf32>,
    return
  }
  func.func @transform_0(%arg0: i32) -> (i32, i32) {
    %c0_i32 = arith.constant 0 : i32
    %c0_i32_0 = arith.constant 0 : i32
    %c0_i32_1 = arith.constant 0 : i32
    return %c0_i32, %c0_i32_0 : i32, i32
  }
  func.func @transform_1(%arg0: i32) -> (i32, i32) {
    %c0_i32 = arith.constant 0 : i32
    %c0_i32_0 = arith.constant 0 : i32
    %c0_i32_1 = arith.constant 0 : i32
    return %c0_i32, %c0_i32_0 : i32, i32
  }
  func.func @transform_2(%arg0: i32) -> (i32, i32) {
    %c0_i32 = arith.constant 0 : i32
    %c0_i32_0 = arith.constant 0 : i32
    %c0_i32_1 = arith.constant 0 : i32
    return %c0_i32, %c0_i32_0 : i32, i32
  }
  func.func @transform_3(%arg0: i32) -> (i32, i32) {
    %c0_i32 = arith.constant 0 : i32
    %c0_i32_0 = arith.constant 0 : i32
    %c0_i32_1 = arith.constant 0 : i32
    return %c0_i32, %c0_i32_0 : i32, i32
  }
  func.func @transform_4(%arg0: i32) -> (i32, i32) {
    %c0_i32 = arith.constant 0 : i32
    %c0_i32_0 = arith.constant 0 : i32
    %c0_i32_1 = arith.constant 0 : i32
    return %c0_i32, %c0_i32_0 : i32, i32
  }
  func.func @transform_5(%arg0: i32) -> (i32, i32) {
    %c0_i32 = arith.constant 0 : i32
    %c0_i32_0 = arith.constant 0 : i32
    %c0_i32_1 = arith.constant 0 : i32
    return %c0_i32, %c0_i32_0 : i32, i32
  }
}

module attributes {stable_mosaic.version = 11 : i64} {
  func.func @_dense_lstm_kernel(%arg0: i32, %arg1: memref<1x256xf32, #tpu.memory_space<vmem>>, %arg2: memref<256x256xbf16, #tpu.memory_space<vmem>>, %arg3: memref<1x256xf32, #tpu.memory_space<vmem>>, %arg4: memref<256x768xbf16, #tpu.memory_space<vmem>>, %arg5: memref<1x768xf32, #tpu.memory_space<vmem>>, %arg6: memref<1x256xf32, #tpu.memory_space<vmem>>, %arg7: memref<1x256xf32, #tpu.memory_space<vmem>>) attributes {dimension_semantics = [#tpu.dimension_semantics<arbitrary>], iteration_bounds = array<i64: 1>, scalar_prefetch = 0 : i64, scratch_operands = 0 : i64, tpu.core_type = #tpu.core_type<tc>, window_params = [{pipeline_mode = #tpu.pipeline_mode<synchronous>, transform_indices = @transform_0, window_bounds = array<i64: 1, 256>}, {pipeline_mode = #tpu.pipeline_mode<synchronous>, transform_indices = @transform_1, window_bounds = array<i64: 256, 256>}, {pipeline_mode = #tpu.pipeline_mode<synchronous>, transform_indices = @transform_2, window_bounds = array<i64: 1, 256>}, {pipeline_mode = #tpu.pipeline_mode<synchronous>, transform_indices = @transform_3, window_bounds = array<i64: 256, 768>}, {pipeline_mode = #tpu.pipeline_mode<synchronous>, transform_indices = @transform_4, window_bounds = array<i64: 1, 768>}, {pipeline_mode = #tpu.pipeline_mode<synchronous>, transform_indices = @transform_5, window_bounds = array<i64: 1, 256>}, {pipeline_mode = #tpu.pipeline_mode<synchronous>, transform_indices = @transform_6, window_bounds = array<i64: 1, 256>}]} {
    %c0 = arith.constant 0 : index
    %c0_0 = arith.constant 0 : index
    %0 = vector.load %arg1[%c0, %c0_0] : memref<1x256xf32, #tpu.memory_space<vmem>>, vector<1x256xf32>
    %1 = arith.truncf %0 : vector<1x256xf32> to vector<1x256xbf16>
    %c0_1 = arith.constant 0 : index
    %c0_2 = arith.constant 0 : index
    %2 = vector.load %arg2[%c0_1, %c0_2] : memref<256x256xbf16, #tpu.memory_space<vmem>>, vector<256x256xbf16>
    %cst = arith.constant dense<0.000000e+00> : vector<1x256xf32>
    %3 = tpu.matmul %1, %2, %cst {dimension_numbers = #tpu.dot_dimension_numbers<[1], [0], [0], [1], [0, 0, 1, 1], [], []>} : vector<1x256xbf16>, vector<256x256xbf16>, vector<1x256xf32> -> vector<1x256xf32>
    %c0_3 = arith.constant 0 : index
    %c0_4 = arith.constant 0 : index
    %4 = vector.load %arg3[%c0_3, %c0_4] : memref<1x256xf32, #tpu.memory_space<vmem>>, vector<1x256xf32>
    %5 = arith.addf %3, %4 : vector<1x256xf32>
    %6 = arith.negf %5 : vector<1x256xf32>
    %7 = math.exp %6 : vector<1x256xf32>
    %cst_5 = arith.constant 1.000000e+00 : f32
    %8 = vector.broadcast %cst_5 : f32 to vector<1x256xf32>
    %9 = arith.addf %8, %7 : vector<1x256xf32>
    %10 = arith.divf %8, %9 : vector<1x256xf32>
    %11 = arith.mulf %5, %10 : vector<1x256xf32>
    %12 = arith.truncf %11 : vector<1x256xf32> to vector<1x256xbf16>
    %c0_6 = arith.constant 0 : index
    %c0_7 = arith.constant 0 : index
    %13 = vector.load %arg4[%c0_6, %c0_7] : memref<256x768xbf16, #tpu.memory_space<vmem>>, vector<256x768xbf16>
    %cst_8 = arith.constant dense<0.000000e+00> : vector<1x768xf32>
    %14 = tpu.matmul %12, %13, %cst_8 {dimension_numbers = #tpu.dot_dimension_numbers<[1], [0], [0], [1], [0, 0, 1, 1], [], []>} : vector<1x256xbf16>, vector<256x768xbf16>, vector<1x768xf32> -> vector<1x768xf32>
    %c0_9 = arith.constant 0 : index
    %c0_10 = arith.constant 0 : index
    %15 = vector.load %arg5[%c0_9, %c0_10] : memref<1x768xf32, #tpu.memory_space<vmem>>, vector<1x768xf32>
    %16 = arith.addf %14, %15 : vector<1x768xf32>
    %17 = vector.extract_strided_slice %16 {offsets = [0, 0], sizes = [1, 256], strides = [1, 1]} : vector<1x768xf32> to vector<1x256xf32>
    %18 = arith.negf %17 : vector<1x256xf32>
    %19 = math.exp %18 : vector<1x256xf32>
    %cst_11 = arith.constant 1.000000e+00 : f32
    %20 = vector.broadcast %cst_11 : f32 to vector<1x256xf32>
    %21 = arith.addf %20, %19 : vector<1x256xf32>
    %22 = arith.divf %20, %21 : vector<1x256xf32>
    %23 = vector.extract_strided_slice %16 {offsets = [0, 256], sizes = [1, 256], strides = [1, 1]} : vector<1x768xf32> to vector<1x256xf32>
    %24 = math.tanh %23 : vector<1x256xf32>
    %25 = vector.extract_strided_slice %16 {offsets = [0, 512], sizes = [1, 256], strides = [1, 1]} : vector<1x768xf32> to vector<1x256xf32>
    %26 = arith.negf %25 : vector<1x256xf32>
    %27 = math.exp %26 : vector<1x256xf32>
    %cst_12 = arith.constant 1.000000e+00 : f32
    %28 = vector.broadcast %cst_12 : f32 to vector<1x256xf32>
    %29 = arith.addf %28, %27 : vector<1x256xf32>
    %30 = arith.divf %28, %29 : vector<1x256xf32>
    %31 = arith.mulf %22, %24 : vector<1x256xf32>
    %32 = math.tanh %31 : vector<1x256xf32>
    %33 = arith.mulf %30, %32 : vector<1x256xf32>
    %c0_13 = arith.constant 0 : index
    %c0_14 = arith.constant 0 : index
    %34 = vector.load %arg6[%c0_13, %c0_14] : memref<1x256xf32, #tpu.memory_space<vmem>>, vector<1x256xf32>
    tpu.vector_store %arg6[%c0_13, %c0_14], %33 {strides = array<i32>} : memref<1x256xf32, #tpu.memory_space<vmem>>, vector<1x256xf32>,
    %c0_15 = arith.constant 0 : index
    %c0_16 = arith.constant 0 : index
    %35 = vector.load %arg7[%c0_15, %c0_16] : memref<1x256xf32, #tpu.memory_space<vmem>>, vector<1x256xf32>
    tpu.vector_store %arg7[%c0_15, %c0_16], %31 {strides = array<i32>} : memref<1x256xf32, #tpu.memory_space<vmem>>, vector<1x256xf32>,
    return
  }
  func.func @transform_0(%arg0: i32) -> (i32, i32) {
    %c0_i32 = arith.constant 0 : i32
    %c0_i32_0 = arith.constant 0 : i32
    %c0_i32_1 = arith.constant 0 : i32
    return %c0_i32, %c0_i32_0 : i32, i32
  }
  func.func @transform_1(%arg0: i32) -> (i32, i32) {
    %c0_i32 = arith.constant 0 : i32
    %c0_i32_0 = arith.constant 0 : i32
    %c0_i32_1 = arith.constant 0 : i32
    return %c0_i32, %c0_i32_0 : i32, i32
  }
  func.func @transform_2(%arg0: i32) -> (i32, i32) {
    %c0_i32 = arith.constant 0 : i32
    %c0_i32_0 = arith.constant 0 : i32
    %c0_i32_1 = arith.constant 0 : i32
    return %c0_i32, %c0_i32_0 : i32, i32
  }
  func.func @transform_3(%arg0: i32) -> (i32, i32) {
    %c0_i32 = arith.constant 0 : i32
    %c0_i32_0 = arith.constant 0 : i32
    %c0_i32_1 = arith.constant 0 : i32
    return %c0_i32, %c0_i32_0 : i32, i32
  }
  func.func @transform_4(%arg0: i32) -> (i32, i32) {
    %c0_i32 = arith.constant 0 : i32
    %c0_i32_0 = arith.constant 0 : i32
    %c0_i32_1 = arith.constant 0 : i32
    return %c0_i32, %c0_i32_0 : i32, i32
  }
  func.func @transform_5(%arg0: i32) -> (i32, i32) {
    %c0_i32 = arith.constant 0 : i32
    %c0_i32_0 = arith.constant 0 : i32
    %c0_i32_1 = arith.constant 0 : i32
    return %c0_i32, %c0_i32_0 : i32, i32
  }
  func.func @transform_6(%arg0: i32) -> (i32, i32) {
    %c0_i32 = arith.constant 0 : i32
    %c0_i32_0 = arith.constant 0 : i32
    %c0_i32_1 = arith.constant 0 : i32
    return %c0_i32, %c0_i32_0 : i32, i32
  }
}

module attributes {stable_mosaic.version = 11 : i64} {
  func.func @_attention_kernel(%arg0: i32, %arg1: memref<16x16xf32, #tpu.memory_space<vmem>>, %arg2: memref<2x16x8xf32, #tpu.memory_space<vmem>>, %arg3: memref<2x1x8xf32, #tpu.memory_space<vmem>>, %arg4: memref<2x16x8xf32, #tpu.memory_space<vmem>>, %arg5: memref<2x1x8xf32, #tpu.memory_space<vmem>>, %arg6: memref<2x16x16xf32, #tpu.memory_space<vmem>>, %arg7: memref<2x1x16xf32, #tpu.memory_space<vmem>>, %arg8: memref<1x16xf32, #tpu.memory_space<vmem>>, %arg9: memref<16x16xf32, #tpu.memory_space<vmem>>) attributes {dimension_semantics = [#tpu.dimension_semantics<arbitrary>], iteration_bounds = array<i64: 1>, scalar_prefetch = 0 : i64, scratch_operands = 0 : i64, tpu.core_type = #tpu.core_type<tc>, window_params = [{pipeline_mode = #tpu.pipeline_mode<synchronous>, transform_indices = @transform_0, window_bounds = array<i64: 16, 16>}, {pipeline_mode = #tpu.pipeline_mode<synchronous>, transform_indices = @transform_1, window_bounds = array<i64: 2, 16, 8>}, {pipeline_mode = #tpu.pipeline_mode<synchronous>, transform_indices = @transform_2, window_bounds = array<i64: 2, 1, 8>}, {pipeline_mode = #tpu.pipeline_mode<synchronous>, transform_indices = @transform_3, window_bounds = array<i64: 2, 16, 8>}, {pipeline_mode = #tpu.pipeline_mode<synchronous>, transform_indices = @transform_4, window_bounds = array<i64: 2, 1, 8>}, {pipeline_mode = #tpu.pipeline_mode<synchronous>, transform_indices = @transform_5, window_bounds = array<i64: 2, 16, 16>}, {pipeline_mode = #tpu.pipeline_mode<synchronous>, transform_indices = @transform_6, window_bounds = array<i64: 2, 1, 16>}, {pipeline_mode = #tpu.pipeline_mode<synchronous>, transform_indices = @transform_7, window_bounds = array<i64: 1, 16>}, {pipeline_mode = #tpu.pipeline_mode<synchronous>, transform_indices = @transform_8, window_bounds = array<i64: 16, 16>}]} {
    %c0 = arith.constant 0 : index
    %c0_0 = arith.constant 0 : index
    %0 = vector.load %arg1[%c0, %c0_0] : memref<16x16xf32, #tpu.memory_space<vmem>>, vector<16x16xf32>
    %cst = arith.constant 1.000000e+00 : f32
    %1 = vector.broadcast %cst : f32 to vector<16x16xf32>
    %2 = arith.subf %1, %0 : vector<16x16xf32>
    %cst_1 = arith.constant dense<0.000000e+00> : vector<16xf32>
    %3 = vector.multi_reduction <add>, %0, %cst_1 [1] : vector<16x16xf32> to vector<16xf32>
    %4 = vector.shape_cast %3 : vector<16xf32> to vector<16x1xf32>
    %cst_2 = arith.constant 1.600000e+01 : f32
    %5 = vector.broadcast %cst_2 : f32 to vector<16x1xf32>
    %6 = arith.divf %4, %5 : vector<16x1xf32>
    %7 = vector.broadcast %6 : vector<16x1xf32> to vector<16x16xf32>
    %8 = arith.subf %0, %7 : vector<16x16xf32>
    %9 = arith.mulf %8, %8 : vector<16x16xf32>
    %cst_3 = arith.constant dense<0.000000e+00> : vector<16xf32>
    %10 = vector.multi_reduction <add>, %9, %cst_3 [1] : vector<16x16xf32> to vector<16xf32>
    %11 = vector.shape_cast %10 : vector<16xf32> to vector<16x1xf32>
    %cst_4 = arith.constant 1.600000e+01 : f32
    %12 = vector.broadcast %cst_4 : f32 to vector<16x1xf32>
    %13 = arith.divf %11, %12 : vector<16x1xf32>
    %14 = vector.broadcast %6 : vector<16x1xf32> to vector<16x16xf32>
    %15 = arith.subf %0, %14 : vector<16x16xf32>
    %cst_5 = arith.constant 9.99999974E-6 : f32
    %16 = vector.broadcast %cst_5 : f32 to vector<16x1xf32>
    %17 = arith.addf %13, %16 : vector<16x1xf32>
    %18 = math.rsqrt %17 : vector<16x1xf32>
    %19 = vector.broadcast %18 : vector<16x1xf32> to vector<16x16xf32>
    %20 = arith.mulf %15, %19 : vector<16x16xf32>
    %c0_6 = arith.constant 0 : index
    %c0_7 = arith.constant 0 : index
    %c0_8 = arith.constant 0 : index
    %21 = vector.load %arg2[%c0_6, %c0_7, %c0_8] : memref<2x16x8xf32, #tpu.memory_space<vmem>>, vector<1x16x8xf32>
    %22 = vector.shape_cast %21 : vector<1x16x8xf32> to vector<16x8xf32>
    %cst_9 = arith.constant dense<0.000000e+00> : vector<16x8xf32>
    %23 = tpu.matmul %20, %22, %cst_9 {dimension_numbers = #tpu.dot_dimension_numbers<[1], [0], [0], [1], [0, 0, 1, 1], [], []>} : vector<16x16xf32>, vector<16x8xf32>, vector<16x8xf32> -> vector<16x8xf32>
    %c0_10 = arith.constant 0 : index
    %c0_11 = arith.constant 0 : index
    %c0_12 = arith.constant 0 : index
    %24 = vector.load %arg3[%c0_10, %c0_11, %c0_12] : memref<2x1x8xf32, #tpu.memory_space<vmem>>, vector<1x1x8xf32>
    %25 = vector.shape_cast %24 : vector<1x1x8xf32> to vector<1x8xf32>
    %26 = vector.broadcast %25 : vector<1x8xf32> to vector<16x8xf32>
    %27 = arith.addf %23, %26 : vector<16x8xf32>
    %c0_13 = arith.constant 0 : index
    %c0_14 = arith.constant 0 : index
    %c0_15 = arith.constant 0 : index
    %28 = vector.load %arg4[%c0_13, %c0_14, %c0_15] : memref<2x16x8xf32, #tpu.memory_space<vmem>>, vector<1x16x8xf32>
    %29 = vector.shape_cast %28 : vector<1x16x8xf32> to vector<16x8xf32>
    %cst_16 = arith.constant dense<0.000000e+00> : vector<16x8xf32>
    %30 = tpu.matmul %20, %29, %cst_16 {dimension_numbers = #tpu.dot_dimension_numbers<[1], [0], [0], [1], [0, 0, 1, 1], [], []>} : vector<16x16xf32>, vector<16x8xf32>, vector<16x8xf32> -> vector<16x8xf32>
    %c0_17 = arith.constant 0 : index
    %c0_18 = arith.constant 0 : index
    %c0_19 = arith.constant 0 : index
    %31 = vector.load %arg5[%c0_17, %c0_18, %c0_19] : memref<2x1x8xf32, #tpu.memory_space<vmem>>, vector<1x1x8xf32>
    %32 = vector.shape_cast %31 : vector<1x1x8xf32> to vector<1x8xf32>
    %33 = vector.broadcast %32 : vector<1x8xf32> to vector<16x8xf32>
    %34 = arith.addf %30, %33 : vector<16x8xf32>
    %c0_20 = arith.constant 0 : index
    %c0_21 = arith.constant 0 : index
    %c0_22 = arith.constant 0 : index
    %35 = vector.load %arg6[%c0_20, %c0_21, %c0_22] : memref<2x16x16xf32, #tpu.memory_space<vmem>>, vector<1x16x16xf32>
    %36 = vector.shape_cast %35 : vector<1x16x16xf32> to vector<16x16xf32>
    %cst_23 = arith.constant dense<0.000000e+00> : vector<16x16xf32>
    %37 = tpu.matmul %20, %36, %cst_23 {dimension_numbers = #tpu.dot_dimension_numbers<[1], [0], [0], [1], [0, 0, 1, 1], [], []>} : vector<16x16xf32>, vector<16x16xf32>, vector<16x16xf32> -> vector<16x16xf32>
    %c0_24 = arith.constant 0 : index
    %c0_25 = arith.constant 0 : index
    %c0_26 = arith.constant 0 : index
    %38 = vector.load %arg7[%c0_24, %c0_25, %c0_26] : memref<2x1x16xf32, #tpu.memory_space<vmem>>, vector<1x1x16xf32>
    %39 = vector.shape_cast %38 : vector<1x1x16xf32> to vector<1x16xf32>
    %40 = vector.broadcast %39 : vector<1x16xf32> to vector<16x16xf32>
    %41 = arith.addf %37, %40 : vector<16x16xf32>
    %cst_27 = arith.constant dense<0.000000e+00> : vector<16x16xf32>
    %42 = tpu.matmul %27, %34, %cst_27 {dimension_numbers = #tpu.dot_dimension_numbers<[1], [1], [0], [0], [0, 0, 1, 0], [], []>} : vector<16x8xf32>, vector<16x8xf32>, vector<16x16xf32> -> vector<16x16xf32>
    %43 = vector.shape_cast %2 : vector<16x16xf32> to vector<16x1x16xf32>
    %44 = vector.shape_cast %42 : vector<16x16xf32> to vector<1x16x16xf32>
    %45 = vector.broadcast %43 : vector<16x1x16xf32> to vector<16x16x16xf32>
    %46 = vector.broadcast %44 : vector<1x16x16xf32> to vector<16x16x16xf32>
    %47 = arith.mulf %45, %46 : vector<16x16x16xf32>
    %48 = vector.shape_cast %0 : vector<16x16xf32> to vector<16x1x16xf32>
    %cst_28 = arith.constant -1.000000e+06 : f32
    %49 = vector.broadcast %cst_28 : f32 to vector<16x1x16xf32>
    %50 = arith.mulf %48, %49 : vector<16x1x16xf32>
    %51 = vector.broadcast %50 : vector<16x1x16xf32> to vector<16x16x16xf32>
    %52 = arith.addf %47, %51 : vector<16x16x16xf32>
    %cst_29 = arith.constant dense<0xFF800000> : vector<16x16xf32>
    %53 = vector.multi_reduction <maximumf>, %52, %cst_29 [2] : vector<16x16x16xf32> to vector<16x16xf32>
    %54 = vector.shape_cast %53 : vector<16x16xf32> to vector<16x16x1xf32>
    %55 = vector.broadcast %54 : vector<16x16x1xf32> to vector<16x16x16xf32>
    %56 = arith.subf %52, %55 : vector<16x16x16xf32>
    %57 = math.exp %56 : vector<16x16x16xf32>
    %cst_30 = arith.constant dense<0.000000e+00> : vector<16x16xf32>
    %58 = vector.multi_reduction <add>, %57, %cst_30 [2] : vector<16x16x16xf32> to vector<16x16xf32>
    %59 = vector.shape_cast %58 : vector<16x16xf32> to vector<16x16x1xf32>
    %60 = vector.broadcast %59 : vector<16x16x1xf32> to vector<16x16x16xf32>
    %61 = arith.divf %57, %60 : vector<16x16x16xf32>
    %62 = vector.shape_cast %41 : vector<16x16xf32> to vector<1x16x16xf32>
    %63 = vector.broadcast %62 : vector<1x16x16xf32> to vector<16x16x16xf32>
    "tpu.trace_start"() <{level = 10 : i32, message = "mqk,mkd->mqd"}> : () -> ()
    %cst_31 = arith.constant dense<0.000000e+00> : vector<16x16x16xf32>
    %64 = tpu.matmul %61, %63, %cst_31 {dimension_numbers = #tpu.dot_dimension_numbers<[2], [1], [1], [2], [0, 0, 0, 1, 1, 2], [0], [0]>} : vector<16x16x16xf32>, vector<16x16x16xf32>, vector<16x16x16xf32> -> vector<16x16x16xf32>
    "tpu.trace_stop"() : () -> ()
    %c1 = arith.constant 1 : index
    %c0_32 = arith.constant 0 : index
    %c0_33 = arith.constant 0 : index
    %65 = vector.load %arg2[%c1, %c0_32, %c0_33] : memref<2x16x8xf32, #tpu.memory_space<vmem>>, vector<1x16x8xf32>
    %66 = vector.shape_cast %65 : vector<1x16x8xf32> to vector<16x8xf32>
    %cst_34 = arith.constant dense<0.000000e+00> : vector<16x8xf32>
    %67 = tpu.matmul %20, %66, %cst_34 {dimension_numbers = #tpu.dot_dimension_numbers<[1], [0], [0], [1], [0, 0, 1, 1], [], []>} : vector<16x16xf32>, vector<16x8xf32>, vector<16x8xf32> -> vector<16x8xf32>
    %c1_35 = arith.constant 1 : index
    %c0_36 = arith.constant 0 : index
    %c0_37 = arith.constant 0 : index
    %68 = vector.load %arg3[%c1_35, %c0_36, %c0_37] : memref<2x1x8xf32, #tpu.memory_space<vmem>>, vector<1x1x8xf32>
    %69 = vector.shape_cast %68 : vector<1x1x8xf32> to vector<1x8xf32>
    %70 = vector.broadcast %69 : vector<1x8xf32> to vector<16x8xf32>
    %71 = arith.addf %67, %70 : vector<16x8xf32>
    %c1_38 = arith.constant 1 : index
    %c0_39 = arith.constant 0 : index
    %c0_40 = arith.constant 0 : index
    %72 = vector.load %arg4[%c1_38, %c0_39, %c0_40] : memref<2x16x8xf32, #tpu.memory_space<vmem>>, vector<1x16x8xf32>
    %73 = vector.shape_cast %72 : vector<1x16x8xf32> to vector<16x8xf32>
    %cst_41 = arith.constant dense<0.000000e+00> : vector<16x8xf32>
    %74 = tpu.matmul %20, %73, %cst_41 {dimension_numbers = #tpu.dot_dimension_numbers<[1], [0], [0], [1], [0, 0, 1, 1], [], []>} : vector<16x16xf32>, vector<16x8xf32>, vector<16x8xf32> -> vector<16x8xf32>
    %c1_42 = arith.constant 1 : index
    %c0_43 = arith.constant 0 : index
    %c0_44 = arith.constant 0 : index
    %75 = vector.load %arg5[%c1_42, %c0_43, %c0_44] : memref<2x1x8xf32, #tpu.memory_space<vmem>>, vector<1x1x8xf32>
    %76 = vector.shape_cast %75 : vector<1x1x8xf32> to vector<1x8xf32>
    %77 = vector.broadcast %76 : vector<1x8xf32> to vector<16x8xf32>
    %78 = arith.addf %74, %77 : vector<16x8xf32>
    %c1_45 = arith.constant 1 : index
    %c0_46 = arith.constant 0 : index
    %c0_47 = arith.constant 0 : index
    %79 = vector.load %arg6[%c1_45, %c0_46, %c0_47] : memref<2x16x16xf32, #tpu.memory_space<vmem>>, vector<1x16x16xf32>
    %80 = vector.shape_cast %79 : vector<1x16x16xf32> to vector<16x16xf32>
    %cst_48 = arith.constant dense<0.000000e+00> : vector<16x16xf32>
    %81 = tpu.matmul %20, %80, %cst_48 {dimension_numbers = #tpu.dot_dimension_numbers<[1], [0], [0], [1], [0, 0, 1, 1], [], []>} : vector<16x16xf32>, vector<16x16xf32>, vector<16x16xf32> -> vector<16x16xf32>
    %c1_49 = arith.constant 1 : index
    %c0_50 = arith.constant 0 : index
    %c0_51 = arith.constant 0 : index
    %82 = vector.load %arg7[%c1_49, %c0_50, %c0_51] : memref<2x1x16xf32, #tpu.memory_space<vmem>>, vector<1x1x16xf32>
    %83 = vector.shape_cast %82 : vector<1x1x16xf32> to vector<1x16xf32>
    %84 = vector.broadcast %83 : vector<1x16xf32> to vector<16x16xf32>
    %85 = arith.addf %81, %84 : vector<16x16xf32>
    %cst_52 = arith.constant dense<0.000000e+00> : vector<16x16xf32>
    %86 = tpu.matmul %71, %78, %cst_52 {dimension_numbers = #tpu.dot_dimension_numbers<[1], [1], [0], [0], [0, 0, 1, 0], [], []>} : vector<16x8xf32>, vector<16x8xf32>, vector<16x16xf32> -> vector<16x16xf32>
    %87 = vector.shape_cast %2 : vector<16x16xf32> to vector<16x1x16xf32>
    %88 = vector.shape_cast %86 : vector<16x16xf32> to vector<1x16x16xf32>
    %89 = vector.broadcast %87 : vector<16x1x16xf32> to vector<16x16x16xf32>
    %90 = vector.broadcast %88 : vector<1x16x16xf32> to vector<16x16x16xf32>
    %91 = arith.mulf %89, %90 : vector<16x16x16xf32>
    %92 = vector.shape_cast %0 : vector<16x16xf32> to vector<16x1x16xf32>
    %cst_53 = arith.constant -1.000000e+06 : f32
    %93 = vector.broadcast %cst_53 : f32 to vector<16x1x16xf32>
    %94 = arith.mulf %92, %93 : vector<16x1x16xf32>
    %95 = vector.broadcast %94 : vector<16x1x16xf32> to vector<16x16x16xf32>
    %96 = arith.addf %91, %95 : vector<16x16x16xf32>
    %cst_54 = arith.constant dense<0xFF800000> : vector<16x16xf32>
    %97 = vector.multi_reduction <maximumf>, %96, %cst_54 [2] : vector<16x16x16xf32> to vector<16x16xf32>
    %98 = vector.shape_cast %97 : vector<16x16xf32> to vector<16x16x1xf32>
    %99 = vector.broadcast %98 : vector<16x16x1xf32> to vector<16x16x16xf32>
    %100 = arith.subf %96, %99 : vector<16x16x16xf32>
    %101 = math.exp %100 : vector<16x16x16xf32>
    %cst_55 = arith.constant dense<0.000000e+00> : vector<16x16xf32>
    %102 = vector.multi_reduction <add>, %101, %cst_55 [2] : vector<16x16x16xf32> to vector<16x16xf32>
    %103 = vector.shape_cast %102 : vector<16x16xf32> to vector<16x16x1xf32>
    %104 = vector.broadcast %103 : vector<16x16x1xf32> to vector<16x16x16xf32>
    %105 = arith.divf %101, %104 : vector<16x16x16xf32>
    %106 = vector.shape_cast %85 : vector<16x16xf32> to vector<1x16x16xf32>
    %107 = vector.broadcast %106 : vector<1x16x16xf32> to vector<16x16x16xf32>
    "tpu.trace_start"() <{level = 10 : i32, message = "mqk,mkd->mqd"}> : () -> ()
    %cst_56 = arith.constant dense<0.000000e+00> : vector<16x16x16xf32>
    %108 = tpu.matmul %105, %107, %cst_56 {dimension_numbers = #tpu.dot_dimension_numbers<[2], [1], [1], [2], [0, 0, 0, 1, 1, 2], [0], [0]>} : vector<16x16x16xf32>, vector<16x16x16xf32>, vector<16x16x16xf32> -> vector<16x16x16xf32>
    "tpu.trace_stop"() : () -> ()
    %109 = arith.addf %64, %108 : vector<16x16x16xf32>
    %c0_57 = arith.constant 0 : index
    %c0_58 = arith.constant 0 : index
    %110 = vector.load %arg8[%c0_57, %c0_58] : memref<1x16xf32, #tpu.memory_space<vmem>>, vector<1x16xf32>
    %111 = vector.shape_cast %110 : vector<1x16xf32> to vector<1x1x16xf32>
    %112 = vector.broadcast %111 : vector<1x1x16xf32> to vector<16x16x16xf32>
    %113 = arith.addf %109, %112 : vector<16x16x16xf32>
    %114 = vector.shape_cast %20 : vector<16x16xf32> to vector<1x16x16xf32>
    %115 = vector.broadcast %114 : vector<1x16x16xf32> to vector<16x16x16xf32>
    %116 = arith.addf %113, %115 : vector<16x16x16xf32>
    %cst_59 = arith.constant dense<0.000000e+00> : vector<16x16xf32>
    %117 = vector.multi_reduction <add>, %116, %cst_59 [2] : vector<16x16x16xf32> to vector<16x16xf32>
    %118 = vector.shape_cast %117 : vector<16x16xf32> to vector<16x16x1xf32>
    %cst_60 = arith.constant 1.600000e+01 : f32
    %119 = vector.broadcast %cst_60 : f32 to vector<16x16x1xf32>
    %120 = arith.divf %118, %119 : vector<16x16x1xf32>
    %121 = vector.broadcast %120 : vector<16x16x1xf32> to vector<16x16x16xf32>
    %122 = arith.subf %116, %121 : vector<16x16x16xf32>
    %123 = arith.mulf %122, %122 : vector<16x16x16xf32>
    %cst_61 = arith.constant dense<0.000000e+00> : vector<16x16xf32>
    %124 = vector.multi_reduction <add>, %123, %cst_61 [2] : vector<16x16x16xf32> to vector<16x16xf32>
    %125 = vector.shape_cast %124 : vector<16x16xf32> to vector<16x16x1xf32>
    %cst_62 = arith.constant 1.600000e+01 : f32
    %126 = vector.broadcast %cst_62 : f32 to vector<16x16x1xf32>
    %127 = arith.divf %125, %126 : vector<16x16x1xf32>
    %128 = vector.broadcast %120 : vector<16x16x1xf32> to vector<16x16x16xf32>
    %129 = arith.subf %116, %128 : vector<16x16x16xf32>
    %cst_63 = arith.constant 9.99999974E-6 : f32
    %130 = vector.broadcast %cst_63 : f32 to vector<16x16x1xf32>
    %131 = arith.addf %127, %130 : vector<16x16x1xf32>
    %132 = math.rsqrt %131 : vector<16x16x1xf32>
    %133 = vector.broadcast %132 : vector<16x16x1xf32> to vector<16x16x16xf32>
    %134 = arith.mulf %129, %133 : vector<16x16x16xf32>
    %135 = vector.shape_cast %2 : vector<16x16xf32> to vector<16x16x1xf32>
    %136 = vector.broadcast %135 : vector<16x16x1xf32> to vector<16x16x16xf32>
    %137 = arith.mulf %134, %136 : vector<16x16x16xf32>
    %cst_64 = arith.constant dense<0.000000e+00> : vector<16x16xf32>
    %138 = vector.multi_reduction <add>, %137, %cst_64 [1] : vector<16x16x16xf32> to vector<16x16xf32>
    %139 = vector.shape_cast %2 : vector<16x16xf32> to vector<1x16x16xf32>
    %cst_65 = arith.constant dense<0.000000e+00> : vector<1xf32>
    %140 = vector.multi_reduction <add>, %139, %cst_65 [1, 2] : vector<1x16x16xf32> to vector<1xf32>
    %141 = vector.shape_cast %140 : vector<1xf32> to vector<1x1x1xf32>
    %142 = vector.extract %141[0, 0, 0] : f32 from vector<1x1x1xf32>
    %143 = vector.broadcast %142 : f32 to vector<1x1xf32>
    %cst_66 = arith.constant 1.000000e-07 : f32
    %144 = vector.broadcast %cst_66 : f32 to vector<1x1xf32>
    %145 = arith.addf %143, %144 : vector<1x1xf32>
    %146 = vector.broadcast %145 : vector<1x1xf32> to vector<16x16xf32>
    %147 = arith.divf %138, %146 : vector<16x16xf32>
    %c0_67 = arith.constant 0 : index
    %c0_68 = arith.constant 0 : index
    %148 = vector.load %arg9[%c0_67, %c0_68] : memref<16x16xf32, #tpu.memory_space<vmem>>, vector<16x16xf32>
    tpu.vector_store %arg9[%c0_67, %c0_68], %147 {strides = array<i32>} : memref<16x16xf32, #tpu.memory_space<vmem>>, vector<16x16xf32>,
    return
  }
  func.func @transform_0(%arg0: i32) -> (i32, i32) {
    %c0_i32 = arith.constant 0 : i32
    %c0_i32_0 = arith.constant 0 : i32
    %c0_i32_1 = arith.constant 0 : i32
    return %c0_i32, %c0_i32_0 : i32, i32
  }
  func.func @transform_1(%arg0: i32) -> (i32, i32, i32) {
    %c0_i32 = arith.constant 0 : i32
    %c0_i32_0 = arith.constant 0 : i32
    %c0_i32_1 = arith.constant 0 : i32
    %c0_i32_2 = arith.constant 0 : i32
    return %c0_i32, %c0_i32_0, %c0_i32_1 : i32, i32, i32
  }
  func.func @transform_2(%arg0: i32) -> (i32, i32, i32) {
    %c0_i32 = arith.constant 0 : i32
    %c0_i32_0 = arith.constant 0 : i32
    %c0_i32_1 = arith.constant 0 : i32
    %c0_i32_2 = arith.constant 0 : i32
    return %c0_i32, %c0_i32_0, %c0_i32_1 : i32, i32, i32
  }
  func.func @transform_3(%arg0: i32) -> (i32, i32, i32) {
    %c0_i32 = arith.constant 0 : i32
    %c0_i32_0 = arith.constant 0 : i32
    %c0_i32_1 = arith.constant 0 : i32
    %c0_i32_2 = arith.constant 0 : i32
    return %c0_i32, %c0_i32_0, %c0_i32_1 : i32, i32, i32
  }
  func.func @transform_4(%arg0: i32) -> (i32, i32, i32) {
    %c0_i32 = arith.constant 0 : i32
    %c0_i32_0 = arith.constant 0 : i32
    %c0_i32_1 = arith.constant 0 : i32
    %c0_i32_2 = arith.constant 0 : i32
    return %c0_i32, %c0_i32_0, %c0_i32_1 : i32, i32, i32
  }
  func.func @transform_5(%arg0: i32) -> (i32, i32, i32) {
    %c0_i32 = arith.constant 0 : i32
    %c0_i32_0 = arith.constant 0 : i32
    %c0_i32_1 = arith.constant 0 : i32
    %c0_i32_2 = arith.constant 0 : i32
    return %c0_i32, %c0_i32_0, %c0_i32_1 : i32, i32, i32
  }
  func.func @transform_6(%arg0: i32) -> (i32, i32, i32) {
    %c0_i32 = arith.constant 0 : i32
    %c0_i32_0 = arith.constant 0 : i32
    %c0_i32_1 = arith.constant 0 : i32
    %c0_i32_2 = arith.constant 0 : i32
    return %c0_i32, %c0_i32_0, %c0_i32_1 : i32, i32, i32
  }
  func.func @transform_7(%arg0: i32) -> (i32, i32) {
    %c0_i32 = arith.constant 0 : i32
    %c0_i32_0 = arith.constant 0 : i32
    %c0_i32_1 = arith.constant 0 : i32
    return %c0_i32, %c0_i32_0 : i32, i32
  }
  func.func @transform_8(%arg0: i32) -> (i32, i32) {
    %c0_i32 = arith.constant 0 : i32
    %c0_i32_0 = arith.constant 0 : i32
    %c0_i32_1 = arith.constant 0 : i32
    return %c0_i32, %c0_i32_0 : i32, i32
  }
}

</mosaic_0001>

<bundles_post_ra>
// kernel: forward.3
= control target key start
LH: loop header
LB: loop body
LE: loop exit
PB: predicated region body
PF: predicated region fallthrough
CT: control target
= control target key end

     0   :  { %10 = vsyncpa [#allocation3], 0  ;;  %s510_s0 = inlined_call_operand.vmem [shape: f32[2,37], index: 0, kind: input, shape index: {}]   ;;  %s511_s1 = inlined_call_operand.hbm [shape: f32[37,128], index: 1, kind: input, shape index: {}]   ;;  %s512_s2 = inlined_call_operand.hbm [shape: f32[2,128], index: 2, kind: input, shape index: {}]   ;;  %s513_s3 = inlined_call_operand.hbm [shape: bf16[128,128], index: 3, kind: input, shape index: {}]   ;;  %s514_s4 = inlined_call_operand.hbm [shape: f32[1,128], index: 4, kind: input, shape index: {}]   ;;  %s515_s5 = inlined_call_operand.vmem [shape: f32[2,128], index: 5, kind: output, shape index: {}]  }
   0x1   :  { %11 = vsyncpa [#allocation5], 0 }
   0x2   :  { %12 = vsyncpa [#allocation8], 0  ;;  %s452_s18 = smov [#allocation4]   ;;  %s453_s20 = smov [#allocation2]  }
   0x3   :  { %s33_s19 = sshll.u32 %s452_s18, 4  ;;  %s20_s21 = sshll.u32 %s453_s20, 4  ;;  %s34_s19 = int_to_ptr.vmem [resolvable:$true] %s33_s19  ;;  %s21_s21 = int_to_ptr.vmem [resolvable:$true] %s20_s21 }
   0x4   :  { %s374_s22 = scalar_lea.vmem %s34_s19, 32  ;;  %p379_p1 = scmp.lt.s32.totalorder %s34_s19, %s34_s19 }
   0x5   :  { %p375_p0 = scmp.ne.s32.totalorder %s34_s19, %s374_s22  ;;  %p380_p2 = scmp.lt.s32.totalorder %s374_s22, %s374_s22 }
   0x7   :  { %p381_p3 = por %p380_p2, %p379_p1 }
   0x9   :  { %p382_p4 = pnand %p381_p3, %p375_p0 }
   0xb   :  { %385 = shalt.err (!%p382_p4)
}
   0xc   :  { %36 = dma.hbm_to_vmem [thread:$0]  %s512_s2, 32, %s34_s19, [#allocation5]  }
   0xd   :  { %s394_s25 = scalar_lea.vmem %s21_s21, 640  ;;  %p399_p6 = scmp.lt.s32.totalorder %s21_s21, %s21_s21 }
   0xe   :  { %p395_p5 = scmp.ne.s32.totalorder %s21_s21, %s394_s25  ;;  %p400_p7 = scmp.lt.s32.totalorder %s394_s25, %s394_s25 }
  0x10   :  { %p401_p8 = por %p400_p7, %p399_p6 }
  0x12   :  { %p402_p9 = pnand %p401_p8, %p395_p5 }
  0x14   :  { %405 = shalt.err (!%p402_p9)
}
  0x15   :  { %s454_s26 = smov 128   ;;  %s455_s27 = smov 8  }
  0x16   :  { %26 = dma.hbm_to_vmem [thread:$0]  %s511_s1, 640, %s21_s21, [#allocation3], %s454_s26, %s454_s26, %s455_s27  }
  0x17   :  { %s456_s30 = smov [#allocation6]  }
  0x18   :  { %s42_s6 = sshll.u32 %s456_s30, 4  ;;  %s43_s6 = int_to_ptr.vmem [resolvable:$true] %s42_s6 }
  0x19   :  { %s414_s7 = scalar_lea.vmem %s43_s6, 1024  ;;  %p419_p11 = scmp.lt.s32.totalorder %s43_s6, %s43_s6 }
  0x1a   :  { %p415_p10 = scmp.ne.s32.totalorder %s43_s6, %s414_s7  ;;  %p420_p12 = scmp.lt.s32.totalorder %s414_s7, %s414_s7 }
  0x1c   :  { %p421_p13 = por %p420_p12, %p419_p11 }
  0x1e   :  { %p422_p0 = pnand %p421_p13, %p415_p10 }
  0x20   :  { %425 = shalt.err (!%p422_p0)
}
  0x21   :  { %s457_s2 = smov 64   ;;  %s458_s8 = smov 4  }
  0x22   :  { %48 = dma.hbm_to_vmem [thread:$0]  %s513_s3, 1024, %s43_s6, [#allocation5], %s457_s2, %s457_s2, %s458_s8  }
  0x23   :  { %s459_s11 = smov [#allocation7]  }
  0x24   :  { %s55_s12 = sshll.u32 %s459_s11, 4  ;;  %s56_s12 = int_to_ptr.vmem [resolvable:$true] %s55_s12 }
  0x25   :  { %s434_s1 = scalar_lea.vmem %s56_s12, 16  ;;  %s438_s13 = scalar_lea.vmem %s56_s12, 32 }
  0x26   :  { %p435_p1 = scmp.ne.s32.totalorder %s56_s12, %s434_s1  ;;  %p439_p2 = scmp.lt.s32.totalorder %s56_s12, %s56_s12 }
  0x27   :  { %p440_p3 = scmp.lt.s32.totalorder %s438_s13, %s434_s1 }
  0x29   :  { %p441_p4 = por %p440_p3, %p439_p2 }
  0x2b   :  { %p442_p5 = pnand %p441_p4, %p435_p1 }
  0x2d   :  { %445 = shalt.err (!%p442_p5)
}
  0x2e   :  { %58 = dma.hbm_to_vmem [thread:$0]  %s514_s4, 16, %s56_s12, [#allocation8]  }
  0x2f   :  { %446 = dma.done.wait [#allocation3], 640  }
  0x30   :  { %447 = vsyncadd [#allocation3], 4294966656 }
  0x31   :  { %448 = dma.done.wait [#allocation5], 1056  }
  0x32   :  { %449 = vsyncadd [#allocation5], 4294966240 }
  0x33   :  { %450 = dma.done.wait [#allocation8], 16  }
  0x34   :  { %451 = vsyncadd [#allocation8], 4294967280  ;;  %v460_v0 = vmov 0.0   ;;  %vm461_vm0 = vmmov 0   ;;  %vm83_vm1 = vcmask 1044480   ;;  %v76_v2 = vld [vmem:[#allocation2 + $0x18] sm:$0xff] }
  0x35   :  { %311 = vmatprep.subr.mxu0 %v460_v0  ;;  %321 = vmatprep.mubr.msk.f32.mxu0 %vm461_vm0, %v460_v0  ;;  %v77_v1 = vld [vmem:[#allocation2 + $0x20] sm:$0x1f]  ;;  %v75_v3 = vld [vmem:[#allocation2 + $0x10] sm:$0xff]  ;;  %v74_v5 = vld [vmem:[#allocation2 + $0x8] sm:$0xff]  ;;  %vm79_vm2 = vcmask 302080  }
  0x36   :  { %324 = vmatprep.subr.bf16.mxu1 %v460_v0  ;;  %340 = vmatprep.mubr.msk.bf16.mxu1 %vm461_vm0, %v460_v0  ;;  %v354_v4 = vld [vmem:[#allocation6 + $0x38] sm:$0xff]   ;;  %v355_v6 = vld [vmem:[#allocation6 + $0x30] sm:$0xff]   ;;  %v356_v9 = vld [vmem:[#allocation6 + $0x28] sm:$0xff]  }
  0x37   :  { %312 = vmatpush3.msk.msra.mxu0 %vm83_vm1, %v77_v1  ;;  %325 = vmatpush3.bf16.msra.mxu1 %v354_v4  ;;  %v73_v7 = vld [vmem:[#allocation2] sm:$0xff]  ;;  %v357_v10 = vld [vmem:[#allocation6 + $0x20] sm:$0xff]   ;;  %v360_v13 = vld [vmem:[#allocation6 + $0x8] sm:$0xff]  }
  0x38   :  { %313 = vmatprep.subr.mxu0 %v460_v0  ;;  %326 = vmatprep.subr.bf16.mxu1 %v460_v0  ;;  %v72_v8 = vld [vmem:[%s510_s0] sm:$0x3]  ;;  %v358_v11 = vld [vmem:[#allocation6 + $0x18] sm:$0xff]   ;;  %v361_v14 = vld [vmem:[#allocation6] sm:$0xff]  }
  0x39   :  { %314 = vmatpush3.msra.mxu0 %v76_v2  ;;  %v359_v12 = vld [vmem:[#allocation6 + $0x10] sm:$0xff]   ;;  %v78_v15 = vld [vmem:[#allocation4] sm:$0x3]  ;;  %v286_v20 = vld [vmem:[#allocation7] ss:$0 sm:$0xff] }
  0x3a   :  { %315 = vmatprep.subr.mxu0 %v460_v0 }
  0x3b   :  { %316 = vmatpush3.msra.mxu0 %v75_v3  ;;  %327 = vmatpush3.bf16.msra.mxu1 %v355_v6 }
  0x3c   :  { %317 = vmatprep.subr.mxu0 %v460_v0  ;;  %328 = vmatprep.subr.bf16.mxu1 %v460_v0 }
  0x3d   :  { %318 = vmatpush3.msra.mxu0 %v74_v5 }
  0x3e   :  { %319 = vmatprep.subr.mxu0 %v460_v0 }
  0x3f   :  { %320 = vmatpush3.msra.mxu0 %v73_v7  ;;  %329 = vmatpush3.bf16.msra.mxu1 %v356_v9 }
  0x40   :  { %322 = vmatmul.mubr.msk.f32.vlgmr.msra.gmra.mxu0 %vm79_vm2, %v72_v8  ;;  %330 = vmatprep.subr.bf16.mxu1 %v460_v0 }
  0x43   :  { %331 = vmatpush3.bf16.msra.mxu1 %v357_v10 }
  0x44   :  { %332 = vmatprep.subr.bf16.mxu1 %v460_v0 }
  0x47   :  { %333 = vmatpush3.bf16.msra.mxu1 %v358_v11 }
  0x48   :  { %334 = vmatprep.subr.bf16.mxu1 %v460_v0 }
  0x4b   :  { %335 = vmatpush3.bf16.msra.mxu1 %v359_v12 }
  0x4c   :  { %336 = vmatprep.subr.bf16.mxu1 %v460_v0 }
  0x4f   :  { %337 = vmatpush3.bf16.msra.mxu1 %v360_v13 }
  0x50   :  { %338 = vmatprep.subr.bf16.mxu1 %v460_v0 }
  0x53   :  { %339 = vmatpush3.bf16.msra.mxu1 %v361_v14 }
 0x100   :  { %v153_v16 = vpop.f32.mrf.mxu0 }
 0x101   :  { %v154_v17 = vadd.f32 %v153_v16, %v78_v15 }
 0x102   :  { %v323_v18 = vpop.f32.mrf.mxu0 }
 0x103   :  { %v157_v19 = vpack.c.bf16 %v154_v17, %v154_v17 }
 0x105   :  { %341 = vmatmul.mubr.bf16.vlgmr.msra.gmra.mxu1 %v157_v19 }
 0x1c5   :  { %v263_v21 = vpop.f32.mrf.mxu1 }
 0x1c6   :  { %v264_v22 = vadd.f32 %v286_v20, %v263_v21 }
 0x1c7   :  { %v342_v23 = vpop.f32.mrf.mxu1 }
 0x1c8   :  { %v295_v24 = vmul.f32 -1.442695, %v264_v22 }
 0x1c9   :  { %v266_v25 = vpop.f32.mrf.mxu1 }
 0x1ca   :  { %362 = vpow2.f32 %v295_v24 }
 0x1cb   :  { %v343_v26 = vpop.f32.mrf.mxu1 }
 0x1d7   :  { %v363_v27 = vpop.eup %362 }
 0x1d8   :  { %v272_v28 = vadd.f32 1.0, %v363_v27 }
 0x1da   :  { %364 = vrcp.f32 %v272_v28 }
 0x1e7   :  { %v365_v29 = vpop.eup %364 }
 0x1e8   :  { %v275_v30 = vmul.f32 %v365_v29, %v264_v22 }
 0x1ea   :  { %276 = vst [vmem:[%s515_s5] sm:$0x3] %v275_v30 }
 0x1eb   :  { %281 = vsyncpa [#allocation3], 1 }
 0x1ec   :  { %282 = vsyncpa [#allocation5], 1 }
 0x1ed   :  { %283 = vsyncpa [#allocation8], 1 }

// kernel: forward.5
= control target key start
LH: loop header
LB: loop body
LE: loop exit
PB: predicated region body
PF: predicated region fallthrough
CT: control target
= control target key end

     0   :  { %12 = vsyncpa [#allocation3], 0  ;;  %s1735_s0 = inlined_call_operand.vmem [shape: f32[1,256], index: 0, kind: input, shape index: {}]   ;;  %s1736_s1 = inlined_call_operand.vmem [shape: bf16[256,256], index: 1, kind: input, shape index: {}]   ;;  %s1737_s2 = inlined_call_operand.vmem [shape: f32[1,256], index: 2, kind: input, shape index: {}]   ;;  %s1738_s3 = inlined_call_operand.hbm [shape: bf16[256,768], index: 3, kind: input, shape index: {}]   ;;  %s1739_s4 = inlined_call_operand.vmem [shape: f32[1,768], index: 4, kind: input, shape index: {}]   ;;  %s1740_s5 = inlined_call_operand.vmem [shape: f32[1,256], index: 5, kind: output, shape index: {0}]   ;;  %s1741_s6 = inlined_call_operand.hbm [shape: f32[1,256], index: 6, kind: output, shape index: {1}]  }
   0x1   :  { %13 = vsyncpa [#allocation4], 0  ;;  %s1543_s21 = smov [#allocation2]  }
   0x2   :  { %s25_s22 = sshll.u32 %s1543_s21, 4  ;;  %s26_s22 = int_to_ptr.vmem [resolvable:$true] %s25_s22 }
   0x3   :  { %s1507_s23 = scalar_lea.vmem %s26_s22, 12288  ;;  %p1512_p1 = scmp.lt.s32.totalorder %s26_s22, %s26_s22 }
   0x4   :  { %p1508_p0 = scmp.ne.s32.totalorder %s26_s22, %s1507_s23  ;;  %p1513_p2 = scmp.lt.s32.totalorder %s1507_s23, %s1507_s23 }
   0x6   :  { %p1514_p3 = por %p1513_p2, %p1512_p1 }
   0x8   :  { %p1515_p4 = pnand %p1514_p3, %p1508_p0 }
   0xa   :  { %1518 = shalt.err (!%p1515_p4)
}
   0xb   :  { %s1544_s24 = smov 384   ;;  %s1545_s25 = smov 24  }
   0xc   :  { %31 = dma.hbm_to_vmem [thread:$0]  %s1738_s3, 12288, %s26_s22, [#allocation3], %s1544_s24, %s1544_s24, %s1545_s25  }
   0xd   :  { %1539 = dma.done.wait [#allocation3], 12288  }
   0xe   :  { %1540 = vsyncadd [#allocation3], 4294955008  ;;  %v1275_v0 = vld [vmem:[%s1736_s1 + $0x74] ss:$8 sps:$4 sm:$0xff]   ;;  %v1277_v1 = vld [vmem:[%s1736_s1 + $0x70] ss:$8 sps:$4 sm:$0xff]   ;;  %v39_v7 = vlaneseq }
   0xf   :  { %255 = vmatprep.subr.bf16.mxu0 %v1275_v0  ;;  %v1278_v2 = vld [vmem:[%s1736_s1 + $0x64] ss:$8 sps:$4 sm:$0xff]   ;;  %v1280_v3 = vld [vmem:[%s1736_s1 + $0x60] ss:$8 sps:$4 sm:$0xff]   ;;  %v1281_v4 = vld [vmem:[%s1736_s1 + $0x54] ss:$8 sps:$4 sm:$0xff]  }
  0x10   :  { %256 = vmatpush1.bf16.msra.mxu0 %v1277_v1  ;;  %v1283_v5 = vld [vmem:[%s1736_s1 + $0x50] ss:$8 sps:$4 sm:$0xff]   ;;  %v1284_v6 = vld [vmem:[%s1736_s1 + $0x44] ss:$8 sps:$4 sm:$0xff]   ;;  %v1286_v8 = vld [vmem:[%s1736_s1 + $0x40] ss:$8 sps:$4 sm:$0xff]  }
  0x11   :  { %257 = vmatprep.subr.bf16.mxu0 %v1278_v2  ;;  %v1287_v9 = vld [vmem:[%s1736_s1 + $0x34] ss:$8 sps:$4 sm:$0xff]   ;;  %v1614_v10 = vshrl.u32 %v39_v7, 7  ;;  %v1289_v11 = vld [vmem:[%s1736_s1 + $0x30] ss:$8 sps:$4 sm:$0xff]   ;;  %vm1719_vm0 = vcmp.lt.s32.totalorder %v39_v7, 256 }
  0x12   :  { %v1290_v12 = vld [vmem:[%s1736_s1 + $0x24] ss:$8 sps:$4 sm:$0xff]   ;;  %v1292_v14 = vld [vmem:[%s1736_s1 + $0x20] ss:$8 sps:$4 sm:$0xff]   ;;  %v1293_v15 = vld [vmem:[%s1736_s1 + $0x14] ss:$8 sps:$4 sm:$0xff]  }
  0x13   :  { %v1623_v13 = vsub.s32 1, %v1614_v10  ;;  %v1634_v16 = vld [vmem:[%s1735_s0] sm:$0x3]  ;;  %v1323_v18 = vld [vmem:[#allocation2 + $0x154] ss:$24 sps:$4 sm:$0xff]   ;;  %v1693_v49 = vsub.s32 0, %v1614_v10 }
  0x14   :  { %258 = vmatpush1.bf16.msra.mxu0 %v1280_v3  ;;  %v1325_v19 = vld [vmem:[#allocation2 + $0x150] ss:$24 sps:$4 sm:$0xff]   ;;  %v1296_v21 = vld [vmem:[%s1736_s1 + $0x4] ss:$8 sps:$4 sm:$0xff]   ;;  %920 = vmatprep.subr.bf16.mxu1 %v1323_v18  ;;  %v1331_v24 = vld [vmem:[#allocation2 + $0x120] ss:$24 sps:$4 sm:$0xff]  }
  0x15   :  { %259 = vmatprep.subr.bf16.mxu0 %v1281_v4  ;;  %v46_v17 = vrot.slane %v1634_v16, %v1623_v13  ;;  %v1295_v20 = vld [vmem:[%s1736_s1 + $0x10] ss:$8 sps:$4 sm:$0xff]   ;;  %921 = vmatpush1.bf16.msra.mxu1 %v1325_v19  ;;  %v1329_v23 = vld [vmem:[#allocation2 + $0x124] ss:$24 sps:$4 sm:$0xff]   ;;  %v1298_v25 = vld [vmem:[%s1736_s1] ss:$8 sps:$4 sm:$0xff]   ;;  %v42_v51 = vrot.slane %v1634_v16, %v1693_v49 }
  0x16   :  { %922 = vmatprep.subr.bf16.mxu1 %v1329_v23  ;;  %v1335_v26 = vld [vmem:[#allocation2 + $0xf4] ss:$24 sps:$4 sm:$0xff]   ;;  %v1337_v28 = vld [vmem:[#allocation2 + $0xf0] ss:$24 sps:$4 sm:$0xff]   ;;  %v1341_v29 = vld [vmem:[#allocation2 + $0xc4] ss:$24 sps:$4 sm:$0xff]  }
  0x17   :  { %v50_v22 = vpack.c.bf16 %v46_v17, %v46_v17  ;;  %v1299_v27 = vld [vmem:[%s1736_s1 + $0xf4] ss:$8 sps:$4 sm:$0xff]   ;;  %v1301_v30 = vld [vmem:[%s1736_s1 + $0xf0] ss:$8 sps:$4 sm:$0xff]   ;;  %v1302_v31 = vld [vmem:[%s1736_s1 + $0xe4] ss:$8 sps:$4 sm:$0xff]   ;;  %v49_v53 = vpack.c.bf16 %v42_v51, %v42_v51 }
  0x18   :  { %260 = vmatpush1.bf16.msra.mxu0 %v1283_v5  ;;  %v1343_v32 = vld [vmem:[#allocation2 + $0xc0] ss:$24 sps:$4 sm:$0xff]   ;;  %v1347_v33 = vld [vmem:[#allocation2 + $0x94] ss:$24 sps:$4 sm:$0xff]   ;;  %v1349_v37 = vld [vmem:[#allocation2 + $0x90] ss:$24 sps:$4 sm:$0xff]  }
  0x19   :  { %261 = vmatprep.subr.bf16.mxu0 %v1284_v6  ;;  %287 = vmatprep.mubr.bf16.mxu0 %v50_v22  ;;  %v1304_v34 = vld [vmem:[%s1736_s1 + $0xe0] ss:$8 sps:$4 sm:$0xff]   ;;  %v1305_v35 = vld [vmem:[%s1736_s1 + $0xd4] ss:$8 sps:$4 sm:$0xff]   ;;  %v1307_v36 = vld [vmem:[%s1736_s1 + $0xd0] ss:$8 sps:$4 sm:$0xff]  }
  0x1a   :  { %923 = vmatpush1.bf16.msra.mxu1 %v1331_v24  ;;  %v1353_v38 = vld [vmem:[#allocation2 + $0x64] ss:$24 sps:$4 sm:$0xff]   ;;  %v1355_v40 = vld [vmem:[#allocation2 + $0x60] ss:$24 sps:$4 sm:$0xff]   ;;  %v1359_v1 = vld [vmem:[#allocation2 + $0x34] ss:$24 sps:$4 sm:$0xff]  }
  0x1b   :  { %924 = vmatprep.subr.bf16.mxu1 %v1335_v26  ;;  %v1308_v39 = vld [vmem:[%s1736_s1 + $0xc4] ss:$8 sps:$4 sm:$0xff]   ;;  %v1310_v41 = vld [vmem:[%s1736_s1 + $0xc0] ss:$8 sps:$4 sm:$0xff]   ;;  %v1311_v42 = vld [vmem:[%s1736_s1 + $0xb4] ss:$8 sps:$4 sm:$0xff]  }
  0x1c   :  { %262 = vmatpush1.bf16.msra.mxu0 %v1286_v8  ;;  %v1313_v43 = vld [vmem:[%s1736_s1 + $0xb0] ss:$8 sps:$4 sm:$0xff]   ;;  %v1314_v44 = vld [vmem:[%s1736_s1 + $0xa4] ss:$8 sps:$4 sm:$0xff]   ;;  %v1316_v45 = vld [vmem:[%s1736_s1 + $0xa0] ss:$8 sps:$4 sm:$0xff]  }
  0x1d   :  { %263 = vmatprep.subr.bf16.mxu0 %v1287_v9  ;;  %v1317_v46 = vld [vmem:[%s1736_s1 + $0x94] ss:$8 sps:$4 sm:$0xff]   ;;  %v1319_v47 = vld [vmem:[%s1736_s1 + $0x90] ss:$8 sps:$4 sm:$0xff]   ;;  %v1320_v48 = vld [vmem:[%s1736_s1 + $0x84] ss:$8 sps:$4 sm:$0xff]  }
  0x1e   :  { %925 = vmatpush1.bf16.msra.mxu1 %v1337_v28  ;;  %v1322_v50 = vld [vmem:[%s1736_s1 + $0x80] ss:$8 sps:$4 sm:$0xff]   ;;  %v1328_v52 = vld [vmem:[#allocation2 + $0x15c] ss:$24 sps:$4 sm:$0xff]   ;;  %v1326_v54 = vld [vmem:[#allocation2 + $0x158] ss:$24 sps:$4 sm:$0xff]  }
  0x1f   :  { %926 = vmatprep.subr.bf16.mxu1 %v1341_v29  ;;  %v1334_v55 = vld [vmem:[#allocation2 + $0x12c] ss:$24 sps:$4 sm:$0xff]   ;;  %v1332_v56 = vld [vmem:[#allocation2 + $0x128] ss:$24 sps:$4 sm:$0xff]   ;;  %v1340_v57 = vld [vmem:[#allocation2 + $0xfc] ss:$24 sps:$4 sm:$0xff]  }
  0x20   :  { %264 = vmatpush1.bf16.msra.mxu0 %v1289_v11  ;;  %v1338_v58 = vld [vmem:[#allocation2 + $0xf8] ss:$24 sps:$4 sm:$0xff]   ;;  %v1346_v59 = vld [vmem:[#allocation2 + $0xcc] ss:$24 sps:$4 sm:$0xff]   ;;  %v1344_v60 = vld [vmem:[#allocation2 + $0xc8] ss:$24 sps:$4 sm:$0xff]  }
  0x21   :  { %265 = vmatprep.subr.bf16.mxu0 %v1290_v12  ;;  %v1352_v61 = vld [vmem:[#allocation2 + $0x9c] ss:$24 sps:$4 sm:$0xff]   ;;  %v1350_v62 = vld [vmem:[#allocation2 + $0x98] ss:$24 sps:$4 sm:$0xff]   ;;  %v1358_v63 = vld [vmem:[#allocation2 + $0x6c] ss:$24 sps:$4 sm:$0xff]  }
  0x22   :  { %927 = vmatpush1.bf16.msra.mxu1 %v1343_v32  ;;  %v1356_v0 = vld [vmem:[#allocation2 + $0x68] ss:$24 sps:$4 sm:$0xff]   ;;  %v1364_v3 = vld [vmem:[#allocation2 + $0x3c] ss:$24 sps:$4 sm:$0xff]   ;;  %v1362_v4 = vld [vmem:[#allocation2 + $0x38] ss:$24 sps:$4 sm:$0xff]  }
  0x23   :  { %928 = vmatprep.subr.bf16.mxu1 %v1347_v33  ;;  %v1361_v2 = vld [vmem:[#allocation2 + $0x30] ss:$24 sps:$4 sm:$0xff]   ;;  %v1365_v5 = vld [vmem:[#allocation2 + $0x4] ss:$24 sps:$4 sm:$0xff]   ;;  %v1367_v6 = vld [vmem:[#allocation2] ss:$24 sps:$4 sm:$0xff]  }
  0x24   :  { %266 = vmatpush1.bf16.msra.mxu0 %v1292_v14  ;;  %v1370_v8 = vld [vmem:[#allocation2 + $0xc] ss:$24 sps:$4 sm:$0xff]   ;;  %v1368_v9 = vld [vmem:[#allocation2 + $0x8] ss:$24 sps:$4 sm:$0xff]   ;;  %v1376_v14 = vld [vmem:[#allocation2 + $0x2dc] ss:$24 sps:$4 sm:$0xff]  }
  0x25   :  { %267 = vmatprep.subr.bf16.mxu0 %v1293_v15  ;;  %v1371_v11 = vld [vmem:[#allocation2 + $0x2d4] ss:$24 sps:$4 sm:$0xff]   ;;  %v1373_v12 = vld [vmem:[#allocation2 + $0x2d0] ss:$24 sps:$4 sm:$0xff]   ;;  %v1377_v16 = vld [vmem:[#allocation2 + $0x2a4] ss:$24 sps:$4 sm:$0xff]  }
  0x26   :  { %929 = vmatpush1.bf16.msra.mxu1 %v1349_v37  ;;  %v1374_v15 = vld [vmem:[#allocation2 + $0x2d8] ss:$24 sps:$4 sm:$0xff]   ;;  %v1382_v18 = vld [vmem:[#allocation2 + $0x2ac] ss:$24 sps:$4 sm:$0xff]   ;;  %v1380_v19 = vld [vmem:[#allocation2 + $0x2a8] ss:$24 sps:$4 sm:$0xff]  }
  0x27   :  { %930 = vmatprep.subr.bf16.mxu1 %v1353_v38  ;;  %v1379_v17 = vld [vmem:[#allocation2 + $0x2a0] ss:$24 sps:$4 sm:$0xff]   ;;  %v1388_v22 = vld [vmem:[#allocation2 + $0x27c] ss:$24 sps:$4 sm:$0xff]   ;;  %v1394_v26 = vld [vmem:[#allocation2 + $0x24c] ss:$24 sps:$4 sm:$0xff]  }
  0x28   :  { %268 = vmatpush1.bf16.msra.mxu0 %v1295_v20  ;;  %v1383_v20 = vld [vmem:[#allocation2 + $0x274] ss:$24 sps:$4 sm:$0xff]   ;;  %v1386_v23 = vld [vmem:[#allocation2 + $0x278] ss:$24 sps:$4 sm:$0xff]   ;;  %v1389_v24 = vld [vmem:[#allocation2 + $0x244] ss:$24 sps:$4 sm:$0xff]  }
  0x29   :  { %269 = vmatprep.subr.bf16.mxu0 %v1296_v21  ;;  %v1385_v21 = vld [vmem:[#allocation2 + $0x270] ss:$24 sps:$4 sm:$0xff]   ;;  %v1395_v28 = vld [vmem:[#allocation2 + $0x214] ss:$24 sps:$4 sm:$0xff]   ;;  %v1401_v32 = vld [vmem:[#allocation2 + $0x1e4] ss:$24 sps:$4 sm:$0xff]  }
  0x2a   :  { %931 = vmatpush1.bf16.msra.mxu1 %v1355_v40  ;;  %v1397_v29 = vld [vmem:[#allocation2 + $0x210] ss:$24 sps:$4 sm:$0xff]   ;;  %v1403_v33 = vld [vmem:[#allocation2 + $0x1e0] ss:$24 sps:$4 sm:$0xff]   ;;  %v1412_v38 = vld [vmem:[#allocation2 + $0x1bc] ss:$24 sps:$4 sm:$0xff]  }
  0x2b   :  { %932 = vmatprep.subr.bf16.mxu1 %v1359_v1  ;;  %v1409_v37 = vld [vmem:[#allocation2 + $0x1b0] ss:$24 sps:$4 sm:$0xff]   ;;  %v1413_v40 = vld [vmem:[#allocation2 + $0x184] ss:$24 sps:$4 sm:$0xff]  }
  0x2c   :  { %270 = vmatpush1.bf16.msra.mxu0 %v1298_v25  ;;  %v1391_v25 = vld [vmem:[#allocation2 + $0x240] ss:$24 sps:$4 sm:$0xff]  }
  0x2d   :  { %271 = vmatprep.subr.bf16.mxu0 %v1299_v27  ;;  %v1392_v27 = vld [vmem:[#allocation2 + $0x248] ss:$24 sps:$4 sm:$0xff]  }
  0x2e   :  { %933 = vmatpush1.bf16.msra.mxu1 %v1361_v2  ;;  %v1419_v2 = vld [vmem:[#allocation2 + $0x160] ss:$24 sps:$4 sm:$0xff]  }
  0x2f   :  { %934 = vmatprep.subr.bf16.mxu1 %v1365_v5  ;;  %v1422_v5 = vld [vmem:[#allocation2 + $0x130] ss:$24 sps:$4 sm:$0xff]  }
  0x30   :  { %272 = vmatpush2.bf16.msra.mxu0 %v1301_v30  ;;  %v1400_v30 = vld [vmem:[#allocation2 + $0x21c] ss:$24 sps:$4 sm:$0xff]  }
  0x31   :  { %273 = vmatprep.subr.bf16.mxu0 %v1302_v31  ;;  %v1398_v31 = vld [vmem:[#allocation2 + $0x218] ss:$24 sps:$4 sm:$0xff]  }
  0x32   :  { %935 = vmatpush1.bf16.msra.mxu1 %v1367_v6  ;;  %v1427_v6 = vld [vmem:[#allocation2 + $0x104] ss:$24 sps:$4 sm:$0xff]  }
  0x33   :  { %936 = vmatprep.subr.bf16.mxu1 %v1371_v11  ;;  %v1428_v11 = vld [vmem:[#allocation2 + $0xd0] ss:$24 sps:$4 sm:$0xff]  }
  0x34   :  { %274 = vmatpush2.bf16.msra.mxu0 %v1304_v34  ;;  %v1406_v34 = vld [vmem:[#allocation2 + $0x1ec] ss:$24 sps:$4 sm:$0xff]  }
  0x35   :  { %275 = vmatprep.subr.bf16.mxu0 %v1305_v35  ;;  %v1404_v35 = vld [vmem:[#allocation2 + $0x1e8] ss:$24 sps:$4 sm:$0xff]  }
  0x36   :  { %937 = vmatpush2.bf16.msra.mxu1 %v1373_v12  ;;  %v1433_v12 = vld [vmem:[#allocation2 + $0xa4] ss:$24 sps:$4 sm:$0xff]  }
  0x37   :  { %938 = vmatprep.subr.bf16.mxu1 %v1377_v16  ;;  %v1434_v16 = vld [vmem:[#allocation2 + $0x70] ss:$24 sps:$4 sm:$0xff]  }
  0x38   :  { %276 = vmatpush2.bf16.msra.mxu0 %v1307_v36  ;;  %v1407_v36 = vld [vmem:[#allocation2 + $0x1b4] ss:$24 sps:$4 sm:$0xff]  }
  0x39   :  { %277 = vmatprep.subr.bf16.mxu0 %v1308_v39  ;;  %v1410_v39 = vld [vmem:[#allocation2 + $0x1b8] ss:$24 sps:$4 sm:$0xff]  }
  0x3a   :  { %939 = vmatpush2.bf16.msra.mxu1 %v1379_v17  ;;  %v1439_v17 = vld [vmem:[#allocation2 + $0x44] ss:$24 sps:$4 sm:$0xff]  }
  0x3b   :  { %940 = vmatprep.subr.bf16.mxu1 %v1383_v20  ;;  %v1440_v20 = vld [vmem:[#allocation2 + $0x10] ss:$24 sps:$4 sm:$0xff]  }
  0x3c   :  { %278 = vmatpush2.bf16.msra.mxu0 %v1310_v41  ;;  %v1415_v41 = vld [vmem:[#allocation2 + $0x180] ss:$24 sps:$4 sm:$0xff]  }
  0x3d   :  { %279 = vmatprep.subr.bf16.mxu0 %v1311_v42  ;;  %v1418_v42 = vld [vmem:[#allocation2 + $0x18c] ss:$24 sps:$4 sm:$0xff]  }
  0x3e   :  { %941 = vmatpush2.bf16.msra.mxu1 %v1385_v21  ;;  %v1445_v21 = vld [vmem:[#allocation2 + $0x2e4] ss:$24 sps:$4 sm:$0xff]  }
  0x3f   :  { %942 = vmatprep.subr.bf16.mxu1 %v1389_v24  ;;  %v1446_v24 = vld [vmem:[#allocation2 + $0x2b0] ss:$24 sps:$4 sm:$0xff]  }
  0x40   :  { %280 = vmatpush2.bf16.msra.mxu0 %v1313_v43  ;;  %v1416_v43 = vld [vmem:[#allocation2 + $0x188] ss:$24 sps:$4 sm:$0xff]  }
  0x41   :  { %281 = vmatprep.subr.bf16.mxu0 %v1314_v44  ;;  %v1421_v44 = vld [vmem:[#allocation2 + $0x164] ss:$24 sps:$4 sm:$0xff]  }
  0x42   :  { %943 = vmatpush2.bf16.msra.mxu1 %v1391_v25  ;;  %v1451_v25 = vld [vmem:[#allocation2 + $0x284] ss:$24 sps:$4 sm:$0xff]  }
  0x43   :  { %944 = vmatprep.subr.bf16.mxu1 %v1395_v28  ;;  %v1452_v28 = vld [vmem:[#allocation2 + $0x250] ss:$24 sps:$4 sm:$0xff]  }
  0x44   :  { %282 = vmatpush2.bf16.msra.mxu0 %v1316_v45  ;;  %v83_v45 = vld [vmem:[%s1737_s2] sm:$0x3] }
  0x45   :  { %283 = vmatprep.subr.bf16.mxu0 %v1317_v46  ;;  %v248_v46 = vrot.slane %v83_v45, %v1693_v49 }
  0x46   :  { %945 = vmatpush2.bf16.msra.mxu1 %v1397_v29  ;;  %v1457_v29 = vld [vmem:[#allocation2 + $0x224] ss:$24 sps:$4 sm:$0xff]  }
  0x47   :  { %946 = vmatprep.subr.bf16.mxu1 %v1401_v32  ;;  %v1458_v32 = vld [vmem:[#allocation2 + $0x1f0] ss:$24 sps:$4 sm:$0xff]  }
  0x48   :  { %284 = vmatpush2.bf16.msra.mxu0 %v1319_v47  ;;  %v252_v47 = vrot.slane %v83_v45, %v1623_v13 }
  0x49   :  { %285 = vmatprep.subr.bf16.mxu0 %v1320_v48 }
  0x4a   :  { %947 = vmatpush2.bf16.msra.mxu1 %v1403_v33  ;;  %v1463_v33 = vld [vmem:[#allocation2 + $0x1c4] ss:$24 sps:$4 sm:$0xff]  }
  0x4b   :  { %948 = vmatprep.subr.bf16.mxu1 %v1407_v36  ;;  %v1464_v36 = vld [vmem:[#allocation2 + $0x190] ss:$24 sps:$4 sm:$0xff]  }
  0x4c   :  { %286 = vmatpush2.bf16.msra.mxu0 %v1322_v50 }
  0x4d   :  { %961 = vmatprep.subr.bf16.mxu0 %v1328_v52 }
  0x4e   :  { %949 = vmatpush2.bf16.msra.mxu1 %v1409_v37  ;;  %v408_v37 = vld [vmem:[%s1739_s4] sm:$0x3f]  ;;  %s1547_s4 = smov [#allocation5]  }
  0x4f   :  { %288 = vmatmul.mubr.bf16.vlgmr.msra.gmra.mxu0 %v49_v53  ;;  %950 = vmatprep.subr.bf16.mxu1 %v1413_v40  ;;  %s1125_s19 = sshll.u32 %s1547_s4, 4  ;;  %s1126_s19 = int_to_ptr.vmem [resolvable:$true] %s1125_s19 }
  0x50   :  { %962 = vmatpush1.bf16.msra.mxu0 %v1326_v54  ;;  %s1519_s20 = scalar_lea.vmem %s1126_s19, 32  ;;  %p1524_p6 = scmp.lt.s32.totalorder %s1126_s19, %s1126_s19 }
  0x51   :  { %963 = vmatprep.subr.bf16.mxu0 %v1334_v55  ;;  %p1520_p5 = scmp.ne.s32.totalorder %s1126_s19, %s1519_s20  ;;  %p1525_p7 = scmp.lt.s32.totalorder %s1519_s20, %s1519_s20 }
  0x52   :  { %951 = vmatpush2.bf16.msra.mxu1 %v1415_v41 }
  0x53   :  { %1002 = vmatprep.subr.bf16.mxu1 %v1421_v44  ;;  %p1526_p8 = por %p1525_p7, %p1524_p6 }
  0x54   :  { %964 = vmatpush1.bf16.msra.mxu0 %v1332_v56 }
  0x55   :  { %965 = vmatprep.subr.bf16.mxu0 %v1340_v57  ;;  %p1527_p9 = pnand %p1526_p8, %p1520_p5 }
  0x58   :  { %966 = vmatpush1.bf16.msra.mxu0 %v1338_v58 }
  0x59   :  { %967 = vmatprep.subr.bf16.mxu0 %v1346_v59 }
  0x5c   :  { %968 = vmatpush1.bf16.msra.mxu0 %v1344_v60 }
  0x5d   :  { %969 = vmatprep.subr.bf16.mxu0 %v1352_v61 }
  0x60   :  { %970 = vmatpush1.bf16.msra.mxu0 %v1350_v62 }
  0x61   :  { %971 = vmatprep.subr.bf16.mxu0 %v1358_v63 }
  0x64   :  { %972 = vmatpush1.bf16.msra.mxu0 %v1356_v0 }
  0x65   :  { %973 = vmatprep.subr.bf16.mxu0 %v1364_v3 }
  0x68   :  { %974 = vmatpush1.bf16.msra.mxu0 %v1362_v4  ;;  %v1424_v4 = vld [vmem:[#allocation2 + $0x134] ss:$24 sps:$4 sm:$0xff]  }
  0x69   :  { %975 = vmatprep.subr.bf16.mxu0 %v1370_v8  ;;  %v1425_v8 = vld [vmem:[#allocation2 + $0x100] ss:$24 sps:$4 sm:$0xff]  }
  0x6c   :  { %976 = vmatpush1.bf16.msra.mxu0 %v1368_v9  ;;  %v1430_v9 = vld [vmem:[#allocation2 + $0xd4] ss:$24 sps:$4 sm:$0xff]  }
  0x6d   :  { %977 = vmatprep.subr.bf16.mxu0 %v1376_v14  ;;  %v1431_v14 = vld [vmem:[#allocation2 + $0xa0] ss:$24 sps:$4 sm:$0xff]  }
  0x70   :  { %978 = vmatpush2.bf16.msra.mxu0 %v1374_v15  ;;  %v1436_v15 = vld [vmem:[#allocation2 + $0x74] ss:$24 sps:$4 sm:$0xff]  }
  0x71   :  { %979 = vmatprep.subr.bf16.mxu0 %v1382_v18  ;;  %v1437_v18 = vld [vmem:[#allocation2 + $0x40] ss:$24 sps:$4 sm:$0xff]  }
  0x74   :  { %980 = vmatpush2.bf16.msra.mxu0 %v1380_v19  ;;  %v1442_v19 = vld [vmem:[#allocation2 + $0x14] ss:$24 sps:$4 sm:$0xff]  }
  0x75   :  { %981 = vmatprep.subr.bf16.mxu0 %v1388_v22  ;;  %v1443_v22 = vld [vmem:[#allocation2 + $0x2e0] ss:$24 sps:$4 sm:$0xff]  }
  0x78   :  { %982 = vmatpush2.bf16.msra.mxu0 %v1386_v23  ;;  %v1448_v23 = vld [vmem:[#allocation2 + $0x2b4] ss:$24 sps:$4 sm:$0xff]  }
  0x79   :  { %983 = vmatprep.subr.bf16.mxu0 %v1394_v26  ;;  %v1449_v26 = vld [vmem:[#allocation2 + $0x280] ss:$24 sps:$4 sm:$0xff]  }
  0x7c   :  { %984 = vmatpush2.bf16.msra.mxu0 %v1392_v27  ;;  %v1454_v27 = vld [vmem:[#allocation2 + $0x254] ss:$24 sps:$4 sm:$0xff]  }
  0x7d   :  { %985 = vmatprep.subr.bf16.mxu0 %v1400_v30  ;;  %v1455_v30 = vld [vmem:[#allocation2 + $0x220] ss:$24 sps:$4 sm:$0xff]  }
  0x80   :  { %986 = vmatpush2.bf16.msra.mxu0 %v1398_v31  ;;  %v1460_v31 = vld [vmem:[#allocation2 + $0x1f4] ss:$24 sps:$4 sm:$0xff]  }
  0x81   :  { %987 = vmatprep.subr.bf16.mxu0 %v1406_v34  ;;  %v1461_v34 = vld [vmem:[#allocation2 + $0x1c0] ss:$24 sps:$4 sm:$0xff]  }
  0x84   :  { %988 = vmatpush2.bf16.msra.mxu0 %v1404_v35  ;;  %v1466_v35 = vld [vmem:[#allocation2 + $0x194] ss:$24 sps:$4 sm:$0xff]  }
  0x85   :  { %989 = vmatprep.subr.bf16.mxu0 %v1412_v38  ;;  %v893_v38 = vrot.slane %v408_v37, %v1693_v49  ;;  %v904_v49 = vsub.s32 3, %v1614_v10 }
  0x88   :  { %990 = vmatpush2.bf16.msra.mxu0 %v1410_v39  ;;  %v897_v39 = vrot.slane %v408_v37, %v1623_v13  ;;  %v905_v13 = vrot.slane %v408_v37, %v904_v49 }
  0x89   :  { %991 = vmatprep.subr.bf16.mxu0 %v1418_v42 }
  0x8c   :  { %992 = vmatpush2.bf16.msra.mxu0 %v1416_v43 }
 0x10f   :  { %v289_v48 = vpop.f32.mrf.mxu0 }
 0x110   :  { %v290_v50 = vadd.f32 %v289_v48, %v248_v46 }
 0x111   :  { %v291_v51 = vpop.f32.mrf.mxu0 }
 0x112   :  { %v1168_v52 = vmul.f32 -1.442695, %v290_v50  ;;  %v292_v53 = vadd.f32 %v291_v51, %v252_v47 }
 0x113   :  { %v293_v54 = vpop.f32.mrf.mxu0 }
 0x114   :  { %1467 = vpow2.f32 %v1168_v52  ;;  %v1169_v55 = vmul.f32 -1.442695, %v292_v53 }
 0x115   :  { %v294_v56 = vpop.f32.mrf.mxu0 }
 0x116   :  { %1469 = vpow2.f32 %v1169_v55 }
 0x121   :  { %v1468_v57 = vpop.eup %1467 }
 0x122   :  { %v302_v58 = vadd.f32 1.0, %v1468_v57 }
 0x123   :  { %v1470_v59 = vpop.eup %1469 }
 0x124   :  { %1471 = vrcp.f32 %v302_v58  ;;  %v303_v60 = vadd.f32 1.0, %v1470_v59 }
 0x126   :  { %1473 = vrcp.f32 %v303_v60 }
 0x131   :  { %v1472_v61 = vpop.eup %1471 }
 0x132   :  { %v308_v63 = vmul.f32 %v1472_v61, %v290_v50  ;;  %v1546_v61 = vmov 1966171168  }
 0x133   :  { %v1474_v62 = vpop.eup %1473 }
 0x134   :  { %v309_v0 = vmul.f32 %v1474_v62, %v292_v53  ;;  %v1705_v3 = vpack.c.bf16 %v308_v63, %v308_v63  ;;  %v900_v53 = vsub.s32 2, %v1614_v10  ;;  %v1079_v62 = vunpack.c.l.s4 %v1546_v61 }
 0x136   :  { %v311_v1 = vpack.c.bf16 %v309_v0, %v309_v0  ;;  %v901_v54 = vrot.slane %v408_v37, %v900_v53  ;;  %v1080_v0 = vunpack.c.0.s8 %v1079_v62 }
 0x138   :  { %952 = vmatprep.mubr.bf16.mxu1 %v311_v1  ;;  %993 = vmatprep.mubr.bf16.mxu0 %v311_v1 }
 0x139   :  { %953 = vmatmul.mubr.bf16.vlgmr.msra.gmra.mxu1 %v1705_v3  ;;  %994 = vmatmul.mubr.bf16.vlgmr.msra.gmra.mxu0 %v1705_v3 }
 0x13a   :  { %1003 = vmatpush1.bf16.msra.mxu1 %v1419_v2  ;;  %1034 = vmatprep.mubr.bf16.mxu1 %v311_v1 }
 0x13b   :  { %1004 = vmatprep.subr.bf16.mxu1 %v1424_v4 }
 0x13e   :  { %1005 = vmatpush1.bf16.msra.mxu1 %v1422_v5 }
 0x13f   :  { %1006 = vmatprep.subr.bf16.mxu1 %v1427_v6  ;;  %v1083_v6 = vsub.s32 %v1080_v0, %v1614_v10 }
 0x142   :  { %1007 = vmatpush1.bf16.msra.mxu1 %v1425_v8 }
 0x143   :  { %1008 = vmatprep.subr.bf16.mxu1 %v1430_v9 }
 0x146   :  { %1009 = vmatpush1.bf16.msra.mxu1 %v1428_v11 }
 0x147   :  { %1010 = vmatprep.subr.bf16.mxu1 %v1433_v12 }
 0x14a   :  { %1011 = vmatpush1.bf16.msra.mxu1 %v1431_v14 }
 0x14b   :  { %1012 = vmatprep.subr.bf16.mxu1 %v1436_v15 }
 0x14e   :  { %1013 = vmatpush1.bf16.msra.mxu1 %v1434_v16 }
 0x14f   :  { %1014 = vmatprep.subr.bf16.mxu1 %v1439_v17 }
 0x152   :  { %1015 = vmatpush1.bf16.msra.mxu1 %v1437_v18 }
 0x153   :  { %1016 = vmatprep.subr.bf16.mxu1 %v1442_v19 }
 0x156   :  { %1017 = vmatpush1.bf16.msra.mxu1 %v1440_v20 }
 0x157   :  { %1018 = vmatprep.subr.bf16.mxu1 %v1445_v21 }
 0x15a   :  { %1019 = vmatpush2.bf16.msra.mxu1 %v1443_v22 }
 0x15b   :  { %1020 = vmatprep.subr.bf16.mxu1 %v1448_v23 }
 0x15e   :  { %1021 = vmatpush2.bf16.msra.mxu1 %v1446_v24 }
 0x15f   :  { %1022 = vmatprep.subr.bf16.mxu1 %v1451_v25 }
 0x162   :  { %1023 = vmatpush2.bf16.msra.mxu1 %v1449_v26 }
 0x163   :  { %1024 = vmatprep.subr.bf16.mxu1 %v1454_v27 }
 0x166   :  { %1025 = vmatpush2.bf16.msra.mxu1 %v1452_v28 }
 0x167   :  { %1026 = vmatprep.subr.bf16.mxu1 %v1457_v29 }
 0x16a   :  { %1027 = vmatpush2.bf16.msra.mxu1 %v1455_v30 }
 0x16b   :  { %1028 = vmatprep.subr.bf16.mxu1 %v1460_v31 }
 0x16e   :  { %1029 = vmatpush2.bf16.msra.mxu1 %v1458_v32 }
 0x16f   :  { %1030 = vmatprep.subr.bf16.mxu1 %v1463_v33 }
 0x172   :  { %1031 = vmatpush2.bf16.msra.mxu1 %v1461_v34 }
 0x173   :  { %1032 = vmatprep.subr.bf16.mxu1 %v1466_v35 }
 0x176   :  { %1033 = vmatpush2.bf16.msra.mxu1 %v1464_v36 }
 0x179   :  { %1035 = vmatmul.mubr.bf16.vlgmr.msra.gmra.mxu1 %v1705_v3 }
 0x1f9   :  { %v954_v40 = vpop.f32.mrf.mxu1  ;;  %v995_v41 = vpop.f32.mrf.mxu0 }
 0x1fa   :  { %v955_v42 = vadd.f32 %v954_v40, %v893_v38  ;;  %v996_v55 = vadd.f32 %v995_v41, %v901_v54 }
 0x1fb   :  { %v956_v43 = vpop.f32.mrf.mxu1  ;;  %v997_v44 = vpop.f32.mrf.mxu0 }
 0x1fc   :  { %v1266_v45 = vmul.f32 -1.442695, %v955_v42  ;;  %v957_v46 = vadd.f32 %v956_v43, %v897_v39  ;;  %v998_v57 = vadd.f32 %v997_v44, %v905_v13 }
 0x1fd   :  { %v958_v47 = vpop.f32.mrf.mxu1  ;;  %v999_v48 = vpop.f32.mrf.mxu0 }
 0x1fe   :  { %1475 = vpow2.f32 %v1266_v45  ;;  %v1267_v50 = vmul.f32 -1.442695, %v957_v46 }
 0x1ff   :  { %v959_v51 = vpop.f32.mrf.mxu1  ;;  %v1000_v52 = vpop.f32.mrf.mxu0 }
 0x200   :  { %1477 = vpow2.f32 %v1267_v50 }
 0x201   :  { %1479 = vtanh.f32 %v996_v55 }
 0x20b   :  { %v1476_v56 = vpop.eup %1475 }
 0x20c   :  { %v1049_v58 = vadd.f32 1.0, %v1476_v56 }
 0x20d   :  { %v1478_v59 = vpop.eup %1477 }
 0x20e   :  { %1481 = vrcp.f32 %v1049_v58  ;;  %v1050_v60 = vadd.f32 1.0, %v1478_v59  ;;  %v1480_v63 = vpop.eup %1479 }
 0x20f   :  { %1483 = vtanh.f32 %v998_v57 }
 0x210   :  { %1485 = vrcp.f32 %v1050_v60 }
 0x21b   :  { %v1482_v1 = vpop.eup %1481 }
 0x21c   :  { %v1484_v2 = vpop.eup %1483  ;;  %v1069_v4 = vmul.f32 %v1482_v1, %v1480_v63 }
 0x21d   :  { %v1486_v3 = vpop.eup %1485 }
 0x21e   :  { %v1070_v5 = vmul.f32 %v1486_v3, %v1484_v2 }
 0x220   :  { %v1100_v8 = vcombine.low %v1069_v4, %v1070_v5 }
 0x222   :  { %v1107_v9 = vrot.slane %v1100_v8, %v1083_v6 }
 0x224   :  { %v1114_v12 = vrot.slane %v1107_v9, %v1083_v6 }
 0x226   :  { %1116 = vst.msk [vmem:[#allocation5] sm:$0x3] %vm1719_vm0, %v1114_v12 }
 0x227   :  { %1530 = shalt.err (!%p1527_p9)
}
 0x228   :  { %1128 = dma.vmem_to_hbm [thread:$0]  %s1126_s19, 32, %s1741_s6, [#allocation4]   ;;  %v908_v7 = vsub.s32 4, %v1614_v10  ;;  %v912_v14 = vsub.s32 5, %v1614_v10 }
 0x22a   :  { %v909_v15 = vrot.slane %v408_v37, %v908_v7  ;;  %v913_v16 = vrot.slane %v408_v37, %v912_v14 }
 0x239   :  { %v1036_v17 = vpop.f32.mrf.mxu1 }
 0x23a   :  { %v1037_v18 = vadd.f32 %v1036_v17, %v909_v15 }
 0x23b   :  { %v1038_v19 = vpop.f32.mrf.mxu1 }
 0x23c   :  { %v1268_v20 = vmul.f32 -1.442695, %v1037_v18  ;;  %v1039_v21 = vadd.f32 %v1038_v19, %v913_v16 }
 0x23d   :  { %v1040_v22 = vpop.f32.mrf.mxu1 }
 0x23e   :  { %1487 = vpow2.f32 %v1268_v20  ;;  %v1269_v23 = vmul.f32 -1.442695, %v1039_v21 }
 0x23f   :  { %v1041_v24 = vpop.f32.mrf.mxu1 }
 0x240   :  { %1489 = vpow2.f32 %v1269_v23 }
 0x241   :  { %1491 = vtanh.f32 %v1069_v4 }
 0x24b   :  { %v1488_v25 = vpop.eup %1487 }
 0x24c   :  { %v1063_v26 = vadd.f32 1.0, %v1488_v25 }
 0x24d   :  { %v1490_v27 = vpop.eup %1489 }
 0x24e   :  { %1493 = vrcp.f32 %v1063_v26  ;;  %v1064_v28 = vadd.f32 1.0, %v1490_v27  ;;  %v1492_v10 = vpop.eup %1491 }
 0x24f   :  { %1495 = vtanh.f32 %v1070_v5 }
 0x250   :  { %1497 = vrcp.f32 %v1064_v28 }
 0x25b   :  { %v1494_v29 = vpop.eup %1493 }
 0x25c   :  { %v1496_v30 = vpop.eup %1495  ;;  %v1073_v32 = vmul.f32 %v1494_v29, %v1492_v10 }
 0x25d   :  { %v1498_v31 = vpop.eup %1497 }
 0x25e   :  { %v1074_v33 = vmul.f32 %v1498_v31, %v1496_v30 }
 0x260   :  { %v1077_v34 = vcombine.low %v1073_v32, %v1074_v33 }
 0x262   :  { %v1084_v35 = vrot.slane %v1077_v34, %v1083_v6 }
 0x264   :  { %v1091_v36 = vrot.slane %v1084_v35, %v1083_v6 }
 0x266   :  { %1097 = vst.msk [vmem:[%s1740_s5] sm:$0x3] %vm1719_vm0, %v1091_v36 }
 0x267   :  { %1541 = dma.done.wait [#allocation4], 32  }
 0x268   :  { %1542 = vsyncadd [#allocation4], 4294967264 }
 0x269   :  { %1134 = vsyncpa [#allocation3], 1 }
 0x26a   :  { %1135 = vsyncpa [#allocation4], 1 }

// kernel: forward.4
= control target key start
LH: loop header
LB: loop body
LE: loop exit
PB: predicated region body
PF: predicated region fallthrough
CT: control target
= control target key end

     0   :  { %vm33_vm0 = vcmask 130048   ;;  %vm319_vm1 = vcmask 64512   ;;  %v6370_v58 = vmov 1966171168   ;;  %v413_v60 = vlaneseq  ;;  %s8581_s0 = inlined_call_operand.vmem [shape: f32[16,16], index: 0, kind: input, shape index: {}]   ;;  %s8582_s1 = inlined_call_operand.vmem [shape: f32[2,16,8], index: 1, kind: input, shape index: {}]   ;;  %s8583_s3 = inlined_call_operand.vmem [shape: f32[2,16,8], index: 3, kind: input, shape index: {}]   ;;  %s8584_s5 = inlined_call_operand.vmem [shape: f32[2,16,16], index: 5, kind: input, shape index: {}]   ;;  %s8585_s4 = inlined_call_operand.vmem [shape: f32[2,1,8], index: 4, kind: input, shape index: {}]   ;;  %s8586_s2 = inlined_call_operand.vmem [shape: f32[2,1,8], index: 2, kind: input, shape index: {}]   ;;  %s8587_s6 = inlined_call_operand.vmem [shape: f32[2,1,16], index: 6, kind: input, shape index: {}]   ;;  %s8588_s7 = inlined_call_operand.vmem [shape: f32[1,16], index: 7, kind: input, shape index: {}]   ;;  %s8589_s8 = inlined_call_operand.vmem [shape: f32[16,16], index: 8, kind: output, shape index: {}]  }
   0x1   :  { %v6419_v0 = vld [vmem:[%s8581_s0] sm:$0xff]  ;;  %v6424_v1 = vld [vmem:[%s8581_s0 + $0x8] sm:$0xff]  ;;  %v5513_v30 = vld [vmem:[%s8582_s1 + $0x18] sm:$0xff]  ;;  %v411_v59 = vunpack.c.l.s4 %v6370_v58  ;;  %vm5470_vm2 = vcmask 1041409   ;;  %vm5472_vm3 = vcmask 1042434   ;;  %vm5474_vm4 = vcmask 1043459  }
   0x2   :  { %v34_v2 = vsel %vm33_vm0, %v6419_v0, 0.0  ;;  %v37_v3 = vsel %vm33_vm0, %v6424_v1, 0.0  ;;  %v62_v14 = vld [vmem:[%s8582_s1 + $0x8] sm:$0xff]  ;;  %v61_v16 = vld [vmem:[%s8582_s1] sm:$0xff]  ;;  %v5512_v31 = vld [vmem:[%s8582_s1 + $0x10] sm:$0xff]  ;;  %v6526_v62 = vshrl.u32 %v413_v60, 7 }
   0x3   :  { %35 = vadd.xlane.f32.xlu0 %v34_v2  ;;  %v152_v15 = vld [vmem:[%s8583_s3 + $0x8] sm:$0xff]  ;;  %5759 = vmatprep.subr.mxu0 %v62_v14  ;;  %v151_v17 = vld [vmem:[%s8583_s3] sm:$0xff]  ;;  %v5519_v32 = vld [vmem:[%s8583_s3 + $0x18] sm:$0xff]  ;;  %v412_v61 = vunpack.c.0.s8 %v411_v59  ;;  %v6532_v2 = vsub.f32 1.0, %v6419_v0  ;;  %vm5476_vm5 = vcmask 1044484   ;;  %vm5478_vm6 = vcmask 1045509  }
   0x4   :  { %5766 = vmatprep.subr.mxu1 %v152_v15  ;;  %5760 = vmatpush3.msra.mxu0 %v62_v14  ;;  %v236_v18 = vld [vmem:[%s8584_s5 + $0x8] sm:$0xff]  ;;  %v235_v29 = vld [vmem:[%s8584_s5] sm:$0xff]  ;;  %v5518_v33 = vld [vmem:[%s8583_s3 + $0x10] sm:$0xff]  ;;  %8665 = vst [vmem:[#allocation6_spill] sm:$0xff] %v6526_v62  ;;  %vm5480_vm7 = vcmask 1046534   ;;  %vm5482_vm8 = vcmask 1047559  }
   0x5   :  { %5767 = vmatpush3.msra.mxu1 %v152_v15  ;;  %5761 = vmatprep.subr.mxu0 %v61_v16  ;;  %v5502_v34 = vld [vmem:[%s8585_s4] ss:$0 sm:$0xff]  ;;  %v5525_v45 = vld [vmem:[%s8584_s5 + $0x18] sm:$0xff]  ;;  %v5515_v48 = vld [vmem:[%s8586_s2 + $0x1] ss:$0 sm:$0xff]  ;;  %v6529_v63 = vsub.s32 %v412_v61, %v6526_v62  ;;  %8666 = vst [vmem:[#allocation7_spill] sm:$0xff] %v6532_v2 }
   0x6   :  { %5768 = vmatprep.subr.mxu1 %v151_v17  ;;  %5762 = vmatpush3.msra.mxu0 %v61_v16  ;;  %v5499_v38 = vld [vmem:[%s8586_s2] ss:$0 sm:$0xff]  ;;  %v5521_v50 = vld [vmem:[%s8585_s4 + $0x1] ss:$0 sm:$0xff]  ;;  %v5524_v51 = vld [vmem:[%s8584_s5 + $0x10] sm:$0xff] }
   0x7   :  { %38 = vadd.xlane.f32.xlu0 %v37_v3  ;;  %5769 = vmatpush3.msra.mxu1 %v151_v17  ;;  %v628_v3 = vrot.slane %v6419_v0, %v6529_v63  ;;  %v670_v17 = vcombine.high %v6424_v1, %v6424_v1  ;;  %v5527_v61 = vld [vmem:[%s8587_s6 + $0x1] ss:$0 sm:$0xff] }
   0x8   :  { %5773 = vmatprep.subr.mxu0 %v236_v18 }
  0x8c   :  { %v36_v4 = vpop.xlane.xlu0 %35 }
  0x8d   :  { %v41_v5 = vmul.f32 0.0625, %v36_v4  ;;  %v416_v4 = vrot.slane %v6532_v2, %v6529_v63 }
  0x8f   :  { %v43_v6 = vsub.f32 %v6419_v0, %v41_v5  ;;  %v409_v5 = vcombine.high %v6532_v2, %v6532_v2 }
  0x90   :  { %v39_v7 = vpop.xlane.xlu0 %38 }
  0x91   :  { %v42_v8 = vmul.f32 0.0625, %v39_v7  ;;  %v45_v9 = vmul.f32 %v43_v6, %v43_v6  ;;  %v636_v7 = vcombine.high %v628_v3, %v628_v3 }
  0x93   :  { %v44_v10 = vsub.f32 %v6424_v1, %v42_v8  ;;  %v47_v11 = vsel %vm33_vm0, %v45_v9, 0.0  ;;  %v424_v8 = vcombine.high %v416_v4, %v416_v4  ;;  %v423_v9 = vrot.slane %v409_v5, %v6529_v63 }
  0x94   :  { %48 = vadd.xlane.f32.xlu1 %v47_v11  ;;  %v644_v11 = vrot.slane %v628_v3, %v6529_v63 }
  0x95   :  { %v46_v12 = vmul.f32 %v44_v10, %v44_v10  ;;  %v446_v14 = vrot.slane %v424_v8, %v6529_v63  ;;  %v425_v15 = vcombine.high %v423_v9, %v423_v9 }
  0x97   :  { %v50_v13 = vsel %vm33_vm0, %v46_v12, 0.0  ;;  %v658_v12 = vrot.slane %v636_v7, %v6529_v63 }
  0x98   :  { %51 = vadd.xlane.f32.xlu1 %v50_v13  ;;  %v432_v13 = vrot.slane %v416_v4, %v6529_v63 }
 0x11d   :  { %v49_v19 = vpop.xlane.xlu1 %48 }
 0x11e   :  { %v53_v20 = vmul.f32 0.0625, %v49_v19  ;;  %v668_v19 = vcombine.high %v658_v12, %v658_v12 }
 0x120   :  { %v55_v21 = vadd.f32 1e-05, %v53_v20 }
 0x121   :  { %v52_v22 = vpop.xlane.xlu1 %51 }
 0x122   :  { %6044 = vrsqrt.f32 %v55_v21  ;;  %v54_v23 = vmul.f32 0.0625, %v52_v22  ;;  %v6556_v21 = vsub.s32 0, %v6526_v62  ;;  %v6559_v22 = vsub.f32 1.0, %v6424_v1 }
 0x124   :  { %v56_v24 = vadd.f32 1e-05, %v54_v23  ;;  %8667 = vst [vmem:[#allocation8_spill] sm:$0xff] %v6556_v21  ;;  %8668 = vst [vmem:[#allocation9_spill] sm:$0xff] %v6559_v22  ;;  %v454_v23 = vcombine.high %v432_v13, %v432_v13 }
 0x126   :  { %6046 = vrsqrt.f32 %v56_v24  ;;  %v735_v24 = vmul.f32 -1000000.0, %v644_v11 }
 0x12f   :  { %v6045_v25 = vpop.eup %6044 }
 0x130   :  { %v6449_v26 = vmul.f32 %v6045_v25, %v43_v6  ;;  %v621_v6 = vcombine.high %v6419_v0, %v6419_v0  ;;  %v666_v0 = vcombine.high %v644_v11, %v644_v11  ;;  %v456_v25 = vcombine.high %v446_v14, %v446_v14 }
 0x132   :  { %8661 = vst [vmem:[#allocation2_spill] sm:$0xff] %v6449_v26  ;;  %5763 = vmatprep.mubr.msk.f32.mxu0 %vm33_vm0, %v6449_v26  ;;  %5770 = vmatprep.mubr.msk.f32.mxu1 %vm33_vm0, %v6449_v26 }
 0x133   :  { %v6047_v27 = vpop.eup %6046 }
 0x134   :  { %v6455_v28 = vmul.f32 %v6047_v27, %v44_v10  ;;  %v635_v10 = vrot.slane %v621_v6, %v6529_v63  ;;  %v439_v27 = vrot.slane %v423_v9, %v6529_v63  ;;  %v458_v6 = vcombine.high %v6559_v22, %v6559_v22 }
 0x136   :  { %8662 = vst [vmem:[#allocation3_spill] sm:$0xff] %v6455_v28  ;;  %5764 = vmatmul.mubr.msk.f32.vlgmr.msra.gmra.mxu0 %vm33_vm0, %v6455_v28  ;;  %5771 = vmatmul.mubr.msk.f32.vlgmr.msra.gmra.mxu1 %vm33_vm0, %v6455_v28  ;;  %v637_v16 = vcombine.high %v635_v10, %v635_v10  ;;  %v651_v20 = vrot.slane %v635_v10, %v6529_v63 }
 0x137   :  { %5774 = vmatpush3.msra.mxu0 %v236_v18  ;;  %5777 = vmatprep.mubr.msk.f32.mxu0 %vm33_vm0, %v6449_v26  ;;  %v6552_v18 = vrot.slane %v6424_v1, %v6529_v63 }
 0x138   :  { %5775 = vmatprep.subr.mxu0 %v235_v29  ;;  %v739_v1 = vmul.f32 -1000000.0, %v651_v20 }
 0x139   :  { %5776 = vmatpush3.msra.mxu0 %v235_v29  ;;  %v453_v29 = vrot.slane %v425_v15, %v6529_v63  ;;  %v693_v10 = vrot.slane %v6552_v18, %v6529_v63 }
 0x13a   :  { %5778 = vmatmul.mubr.msk.f32.vlgmr.msra.gmra.mxu0 %vm33_vm0, %v6455_v28  ;;  %5787 = vmatprep.subr.mxu0 %v5513_v30 }
 0x13b   :  { %5788 = vmatpush3.msra.mxu0 %v5513_v30  ;;  %5791 = vmatprep.mubr.msk.f32.mxu0 %vm33_vm0, %v6449_v26  ;;  %v6564_v30 = vrot.slane %v670_v17, %v6529_v63 }
 0x13c   :  { %5789 = vmatprep.subr.mxu0 %v5512_v31 }
 0x13d   :  { %5790 = vmatpush3.msra.mxu0 %v5512_v31  ;;  %v736_v31 = vmul.f32 -1000000.0, %v658_v12 }
 0x13e   :  { %5792 = vmatmul.mubr.msk.f32.vlgmr.msra.gmra.mxu0 %vm33_vm0, %v6455_v28  ;;  %5794 = vmatprep.subr.mxu0 %v5519_v32 }
 0x13f   :  { %5795 = vmatpush3.msra.mxu0 %v5519_v32  ;;  %5798 = vmatprep.mubr.msk.f32.mxu0 %vm33_vm0, %v6449_v26  ;;  %v737_v32 = vmul.f32 -1000000.0, %v666_v0 }
 0x140   :  { %5796 = vmatprep.subr.mxu0 %v5518_v33 }
 0x141   :  { %5797 = vmatpush3.msra.mxu0 %v5518_v33  ;;  %v665_v33 = vrot.slane %v637_v16, %v6529_v63 }
 0x142   :  { %5799 = vmatmul.mubr.msk.f32.vlgmr.msra.gmra.mxu0 %vm33_vm0, %v6455_v28 }
 0x1f6   :  { %v5765_v35 = vpop.f32.mrf.mxu0  ;;  %v5772_v36 = vpop.f32.mrf.mxu1 }
 0x1f7   :  { %v232_v37 = vadd.f32 %v5772_v36, %v5502_v34  ;;  %v148_v47 = vadd.f32 %v5765_v35, %v5499_v38  ;;  %v738_v35 = vmul.f32 -1000000.0, %v668_v19  ;;  %v667_v36 = vcombine.high %v651_v20, %v651_v20 }
 0x1f8   :  { %v142_v39 = vpop.f32.mrf.mxu0  ;;  %v226_v40 = vpop.f32.mrf.mxu1 }
 0x1f9   :  { %v143_v41 = vadd.f32 %v5499_v38, %v142_v39  ;;  %v227_v42 = vadd.f32 %v5502_v34, %v226_v40  ;;  %5780 = vmatprep.subr.msk.mxu1 %vm319_vm1, %v232_v37  ;;  %v685_v34 = vcombine.high %v6552_v18, %v6552_v18  ;;  %v6573_v38 = vrot.slane %v446_v14, %v6556_v21 }
 0x1fa   :  { %v6495_v43 = vpop.f32.mrf.mxu0  ;;  %5781 = vmatpush3.xpose.msk.msra.mxu1 %vm319_vm1, %v232_v37  ;;  %v6570_v37 = vrot.slane %v432_v13, %v6556_v21  ;;  %v6576_v39 = vrot.slane %v454_v23, %v6556_v21  ;;  %v465_v40 = vrot.slane %v6559_v22, %v6529_v63 }
 0x1fb   :  { %8663 = vst [vmem:[#allocation4_spill] sm:$0xff] %v6495_v43  ;;  %5782 = vmatprep.subr.msk.mxu1 %vm319_vm1, %v227_v42  ;;  %5784 = vmatprep.mubr.msk.f32.mxu1 %vm319_vm1, %v143_v41  ;;  %v6581_v41 = vrot.slane %v735_v24, %v6556_v21  ;;  %v707_v24 = vrot.slane %v685_v34, %v6529_v63 }
 0x1fc   :  { %v6500_v44 = vpop.f32.mrf.mxu0  ;;  %v6609_v58 = vrot.slane %v465_v40, %v6529_v63  ;;  %v473_v59 = vcombine.high %v465_v40, %v465_v40  ;;  %v715_v40 = vcombine.high %v693_v10, %v693_v10 }
 0x1fd   :  { %8664 = vst [vmem:[#allocation5_spill] sm:$0xff] %v6500_v44 }
 0x1fe   :  { %5783 = vmatpush3.xpose.msk.msra.mxu1 %vm319_vm1, %v227_v42  ;;  %v5793_v46 = vpop.f32.mrf.mxu0  ;;  %v6584_v42 = vrot.slane %v456_v25, %v6556_v21  ;;  %v6643_v15 = vrot.slane %v6609_v58, %v6556_v21  ;;  %v495_v18 = vrot.slane %v473_v59, %v6529_v63  ;;  %v472_v25 = vrot.slane %v458_v6, %v6529_v63 }
 0x1ff   :  { %5801 = vmatprep.subr.mxu1 %v5525_v45  ;;  %v1314_v57 = vadd.f32 %v5793_v46, %v5515_v48  ;;  %v457_v46 = vcombine.high %v453_v29, %v453_v29  ;;  %v700_v59 = vrot.slane %v6564_v30, %v6529_v63 }
 0x200   :  { %v1308_v49 = vpop.f32.mrf.mxu0 }
 0x201   :  { %v1309_v52 = vadd.f32 %v5515_v48, %v1308_v49  ;;  %5785 = vmatmul.mubr.msk.f32.vlgmr.msra.gmra.mxu1 %vm319_vm1, %v148_v47  ;;  %v6587_v47 = vrot.slane %v736_v31, %v6556_v21  ;;  %v6590_v48 = vrot.slane %v737_v32, %v6556_v21  ;;  %v6593_v49 = vrot.slane %v439_v27, %v6556_v21 }
 0x202   :  { %v5800_v53 = vpop.f32.mrf.mxu0  ;;  %5802 = vmatpush3.msra.mxu1 %v5525_v45  ;;  %5805 = vmatprep.mubr.msk.f32.mxu1 %vm33_vm0, %v6449_v26  ;;  %v455_v45 = vcombine.high %v439_v27, %v439_v27  ;;  %v6622_v5 = vrot.slane %v457_v46, %v6556_v21  ;;  %v686_v32 = vcombine.high %v6564_v30, %v6564_v30 }
 0x203   :  { %v1400_v54 = vadd.f32 %v5800_v53, %v5521_v50  ;;  %5803 = vmatprep.subr.mxu1 %v5524_v51  ;;  %5812 = vmatprep.mubr.msk.f32.mxu0 %vm319_vm1, %v1309_v52  ;;  %v6598_v52 = vrot.slane %v738_v35, %v6556_v21  ;;  %v6601_v53 = vrot.slane %v739_v1, %v6556_v21  ;;  %v743_v1 = vmul.f32 -1000000.0, %v693_v10 }
 0x204   :  { %v1394_v55 = vpop.f32.mrf.mxu0  ;;  %5804 = vmatpush3.msra.mxu1 %v5524_v51  ;;  %v6619_v4 = vrot.slane %v455_v45, %v6556_v21  ;;  %v503_v35 = vcombine.high %v6609_v58, %v6609_v58  ;;  %v505_v45 = vcombine.high %v495_v18, %v495_v18  ;;  %v717_v58 = vcombine.high %v707_v24, %v707_v24 }
 0x205   :  { %v1395_v56 = vadd.f32 %v5521_v50, %v1394_v55  ;;  %5806 = vmatmul.mubr.msk.f32.vlgmr.msra.gmra.mxu1 %vm33_vm0, %v6455_v28  ;;  %5808 = vmatprep.subr.msk.mxu0 %vm319_vm1, %v1400_v54  ;;  %v669_v50 = vcombine.high %v665_v33, %v665_v33  ;;  %v741_v55 = vmul.f32 -1000000.0, %v667_v36  ;;  %v6682_v36 = vrot.slane %v495_v18, %v6556_v21 }
 0x206   :  { %5809 = vmatpush3.xpose.msk.msra.mxu0 %vm319_vm1, %v1400_v54  ;;  %v740_v54 = vmul.f32 -1000000.0, %v665_v33  ;;  %v6708_v30 = vrot.slane %v743_v1, %v6556_v21  ;;  %v6711_v10 = vrot.slane %v503_v35, %v6556_v21 }
 0x207   :  { %5810 = vmatprep.subr.msk.mxu0 %vm319_vm1, %v1395_v56  ;;  %v742_v9 = vmul.f32 -1000000.0, %v669_v50  ;;  %v6639_v14 = vrot.slane %v741_v55, %v6556_v21  ;;  %v474_v55 = vcombine.high %v472_v25, %v472_v25 }
 0x208   :  { %v6636_v13 = vrot.slane %v740_v54, %v6556_v21 }
 0x209   :  { %v6667_v31 = vrot.slane %v742_v9, %v6556_v21  ;;  %v488_v9 = vrot.slane %v472_v25, %v6529_v63  ;;  %v746_v25 = vmul.f32 -1000000.0, %v717_v58 }
 0x20a   :  { %5811 = vmatpush3.xpose.msk.msra.mxu0 %vm319_vm1, %v1395_v56 }
 0x20d   :  { %5813 = vmatmul.mubr.msk.f32.vlgmr.msra.gmra.mxu0 %vm319_vm1, %v1314_v57  ;;  %v6606_v57 = vrot.slane %v453_v29, %v6556_v21 }
 0x2c1   :  { %v6595_v51 = vpop.f32.mrf.mxu1 }
 0x2c2   :  { %v588_v56 = vmul.f32 %v6595_v51, %v6570_v37  ;;  %v590_v3 = vmul.f32 %v6595_v51, %v6573_v38  ;;  %v592_v23 = vmul.f32 %v6595_v51, %v6576_v39  ;;  %v594_v54 = vmul.f32 %v6595_v51, %v6584_v42 }
 0x2c3   :  { %v6611_v60 = vpop.f32.mrf.mxu1 }
 0x2c4   :  { %v6627_v7 = vadd.f32 %v6581_v41, %v588_v56  ;;  %v587_v8 = vmul.f32 %v6570_v37, %v6611_v60  ;;  %v589_v12 = vmul.f32 %v6573_v38, %v6611_v60  ;;  %v6654_v20 = vadd.f32 %v6587_v47, %v590_v3 }
 0x2c5   :  { %v5807_v11 = vpop.f32.mrf.mxu1  ;;  %v591_v34 = vmul.f32 %v6576_v39, %v6611_v60  ;;  %v6689_v50 = vadd.f32 %v6590_v48, %v592_v23  ;;  %v744_v56 = vmul.f32 -1000000.0, %v707_v24  ;;  %v6719_v18 = vadd.f32 %v6598_v52, %v594_v54 }
 0x2c6   :  { %v6645_v16 = vadd.f32 %v5807_v11, %v5527_v61  ;;  %v882_v17 = vsel %vm33_vm0, %v6627_v7, -inf  ;;  %v6650_v0 = vadd.f32 %v6581_v41, %v587_v8  ;;  %v6674_v33 = vadd.f32 %v6587_v47, %v589_v12 }
 0x2c7   :  { %v1480_v19 = vpop.f32.mrf.mxu1  ;;  %883 = vmax.xlane.f32.xlu1 %v882_v17  ;;  %v888_v46 = vsel %vm33_vm0, %v6654_v20, -inf  ;;  %v6702_v6 = vadd.f32 %v6590_v48, %v591_v34  ;;  %v593_v8 = vmul.f32 %v6584_v42, %v6611_v60  ;;  %v745_v11 = vmul.f32 -1000000.0, %v715_v40 }
 0x2c8   :  { %8669 = vst [vmem:[#allocation10_spill] sm:$0xff] %v6645_v16  ;;  %v6660_v27 = vadd.f32 %v5527_v61, %v1480_v19  ;;  %5815 = vmatprep.subr.mxu1 %v6645_v16  ;;  %5829 = vmatprep.subr.mxu0 %v6645_v16  ;;  %v879_v29 = vsel %vm33_vm0, %v6650_v0, -inf  ;;  %v714_v61 = vrot.slane %v686_v32, %v6529_v63  ;;  %v885_v3 = vsel %vm33_vm0, %v6674_v33, -inf }
 0x2c9   :  { %5816 = vmatpush3.msra.mxu1 %v6645_v16  ;;  %5830 = vmatpush3.msra.mxu0 %v6645_v16  ;;  %v6714_v12 = vrot.slane %v505_v45, %v6556_v21  ;;  %v894_v17 = vsel %vm33_vm0, %v6689_v50, -inf  ;;  %v596_v19 = vmul.f32 %v6595_v51, %v6593_v49  ;;  %v502_v23 = vrot.slane %v474_v55, %v6529_v63 }
 0x2ca   :  { %8670 = vst [vmem:[#allocation11_spill] sm:$0xff] %v6660_v27  ;;  %880 = vmax.xlane.f32.xlu0 %v879_v29  ;;  %5817 = vmatprep.subr.mxu1 %v6660_v27  ;;  %v6725_v24 = vrot.slane %v744_v56, %v6556_v21  ;;  %v716_v29 = vcombine.high %v700_v59, %v700_v59  ;;  %v891_v34 = vsel %vm33_vm0, %v6702_v6, -inf  ;;  %v747_v54 = vmul.f32 -1000000.0, %v700_v59 }
 0x2cb   :  { %5831 = vmatprep.subr.mxu0 %v6660_v27  ;;  %5818 = vmatpush3.msra.mxu1 %v6660_v27  ;;  %v718_v32 = vcombine.high %v714_v61, %v714_v61  ;;  %v6730_v35 = vadd.f32 %v6598_v52, %v593_v8  ;;  %v595_v1 = vmul.f32 %v6593_v49, %v6611_v60  ;;  %v900_v56 = vsel %vm33_vm0, %v6719_v18, -inf }
 0x2cc   :  { %5832 = vmatpush3.msra.mxu0 %v6660_v27  ;;  %889 = vmax.xlane.f32.xlu1 %v888_v46  ;;  %v598_v40 = vmul.f32 %v6595_v51, %v6606_v57  ;;  %v600_v45 = vmul.f32 %v6595_v51, %v6619_v4  ;;  %v6741_v46 = vrot.slane %v745_v11, %v6556_v21  ;;  %v749_v26 = vmul.f32 -1000000.0, %v716_v29 }
 0x2cd   :  { %5822 = vmatprep.subr.mxu1 %v6645_v16  ;;  %5843 = vmatprep.subr.mxu0 %v6645_v16  ;;  %v6736_v63 = vpop.f32.mrf.mxu0  ;;  %v504_v55 = vcombine.high %v488_v9, %v488_v9  ;;  %v6746_v58 = vadd.f32 %v6601_v53, %v596_v19  ;;  %v506_v8 = vcombine.high %v502_v23, %v502_v23  ;;  %v750_v11 = vmul.f32 -1000000.0, %v718_v32 }
 0x2ce   :  { %886 = vmax.xlane.f32.xlu0 %v885_v3  ;;  %v748_v3 = vmul.f32 -1000000.0, %v714_v61  ;;  %v897_v59 = vsel %vm33_vm0, %v6730_v35, -inf  ;;  %v6757_v28 = vadd.f32 %v6601_v53, %v595_v1  ;;  %v6760_v19 = vadd.f32 %v6636_v13, %v598_v40 }
 0x2cf   :  { %v597_v61 = vmul.f32 %v6606_v57, %v6611_v60  ;;  %v6772_v29 = vrot.slane %v747_v54, %v6556_v21  ;;  %v6775_v32 = vrot.slane %v502_v23, %v6556_v21  ;;  %v906_v1 = vsel %vm33_vm0, %v6746_v58, -inf }
 0x2d0   :  { %895 = vmax.xlane.f32.xlu1 %v894_v17  ;;  %v6749_v17 = vrot.slane %v746_v25, %v6556_v21  ;;  %8671 = vst [vmem:[#allocation12_spill] sm:$0xff] %v6757_v28  ;;  %8672 = vst [vmem:[#allocation13_spill] sm:$0xff] %v6760_v19  ;;  %v602_v25 = vmul.f32 %v6595_v51, %v6622_v5  ;;  %v6780_v40 = vrot.slane %v748_v3, %v6556_v21 }
 0x2d1   :  { %v599_v54 = vmul.f32 %v6619_v4, %v6611_v60  ;;  %v6791_v44 = vrot.slane %v749_v26, %v6556_v21  ;;  %v6794_v23 = vrot.slane %v750_v11, %v6556_v21  ;;  %v1577_v3 = vmul.f32 %v6736_v63, %v6570_v37 }
 0x2d2   :  { %892 = vmax.xlane.f32.xlu0 %v891_v34  ;;  %v6752_v34 = vrot.slane %v488_v9, %v6556_v21  ;;  %v6767_v9 = vadd.f32 %v6639_v14, %v600_v45  ;;  %v6786_v45 = vrot.slane %v506_v8, %v6556_v21  ;;  %v912_v8 = vsel %vm33_vm0, %v6760_v19, -inf }
 0x2d3   :  { %v6810_v11 = vadd.f32 %v6667_v31, %v602_v25  ;;  %v6813_v27 = vadd.f32 %v1577_v3, %v6581_v41  ;;  %v1579_v16 = vmul.f32 %v6736_v63, %v6573_v38  ;;  %v6827_v25 = vadd.f32 %v6639_v14, %v599_v54 }
 0x2d4   :  { %901 = vmax.xlane.f32.xlu1 %v900_v56  ;;  %v6764_v56 = vpop.f32.mrf.mxu0  ;;  %8673 = vst [vmem:[#allocation14_spill] sm:$0xff] %v6767_v9  ;;  %v918_v26 = vsel %vm33_vm0, %v6767_v9, -inf  ;;  %v604_v3 = vmul.f32 %v6595_v51, %v6643_v15  ;;  %v1583_v54 = vmul.f32 %v6736_v63, %v6584_v42 }
 0x2d5   :  { %v1576_v43 = vmul.f32 %v6764_v56, %v6570_v37  ;;  %8675 = vst [vmem:[#allocation16_spill] sm:$0xff] %v6810_v11  ;;  %v1578_v37 = vmul.f32 %v6764_v56, %v6573_v38  ;;  %8676 = vst [vmem:[#allocation17_spill] sm:$0xff] %v6827_v25  ;;  %v1584_v2 = vmul.f32 %v6764_v56, %v6593_v49 }
 0x2d6   :  { %898 = vmax.xlane.f32.xlu0 %v897_v59  ;;  %v6783_v59 = vrot.slane %v504_v55, %v6556_v21  ;;  %v903_v55 = vsel %vm33_vm0, %v6757_v28, -inf  ;;  %v6832_v21 = vadd.f32 %v1579_v16, %v6587_v47  ;;  %v603_v16 = vmul.f32 %v6643_v15, %v6611_v60 }
 0x2d7   :  { %v6820_v62 = vadd.f32 %v1576_v43, %v6581_v41  ;;  %v1580_v43 = vmul.f32 %v6764_v56, %v6576_v39  ;;  %v6839_v38 = vadd.f32 %v1578_v37, %v6587_v47  ;;  %v1585_v47 = vmul.f32 %v6736_v63, %v6593_v49 }
 0x2d8   :  { %907 = vmax.xlane.f32.xlu1 %v906_v1  ;;  %v6803_v1 = vadd.f32 %v6636_v13, %v597_v61  ;;  %v601_v61 = vmul.f32 %v6622_v5, %v6611_v60  ;;  %v924_v37 = vsel %vm33_vm0, %v6810_v11, -inf  ;;  %v6879_v11 = vadd.f32 %v1584_v2, %v6601_v53 }
 0x2d9   :  { %v6849_v22 = vadd.f32 %v1580_v43, %v6590_v48  ;;  %v6872_v43 = vadd.f32 %v1585_v47, %v6601_v53  ;;  %v1586_v49 = vmul.f32 %v6764_v56, %v6606_v57  ;;  %v1588_v2 = vmul.f32 %v6764_v56, %v6619_v4 }
 0x2da   :  { %8674 = vst [vmem:[#allocation15_spill] sm:$0xff] %v6803_v1  ;;  %904 = vmax.xlane.f32.xlu0 %v903_v55  ;;  %v1581_v55 = vmul.f32 %v6736_v63, %v6576_v39  ;;  %v909_v41 = vsel %vm33_vm0, %v6803_v1, -inf  ;;  %v1582_v39 = vmul.f32 %v6764_v56, %v6584_v42  ;;  %v605_v53 = vmul.f32 %v6682_v36, %v6611_v60 }
 0x2dc   :  { %913 = vmax.xlane.f32.xlu1 %v912_v8  ;;  %v6842_v8 = vadd.f32 %v1581_v55, %v6590_v48  ;;  %v6858_v55 = vadd.f32 %v6667_v31, %v601_v61  ;;  %v6866_v48 = vadd.f32 %v6708_v30, %v604_v3  ;;  %v6869_v42 = vadd.f32 %v1582_v39, %v6598_v52 }
 0x2dd   :  { %v1587_v61 = vmul.f32 %v6736_v63, %v6606_v57  ;;  %v606_v3 = vmul.f32 %v6595_v51, %v6682_v36  ;;  %v6898_v57 = vadd.f32 %v1586_v49, %v6636_v13 }
 0x2de   :  { %910 = vmax.xlane.f32.xlu0 %v909_v41  ;;  %8677 = vst [vmem:[#allocation18_spill] sm:$0xff] %v6858_v55  ;;  %v6861_v41 = vadd.f32 %v1583_v54, %v6598_v52  ;;  %8678 = vst [vmem:[#allocation19_spill] sm:$0xff] %v6866_v48  ;;  %v915_v54 = vsel %vm33_vm0, %v6827_v25, -inf  ;;  %v6886_v52 = vadd.f32 %v6708_v30, %v603_v16  ;;  %v921_v49 = vsel %vm33_vm0, %v6858_v55, -inf }
 0x2df   :  { %v6891_v39 = vadd.f32 %v1587_v61, %v6636_v13  ;;  %v1591_v16 = vmul.f32 %v6736_v63, %v6622_v5  ;;  %v608_v61 = vmul.f32 %v6595_v51, %v6711_v10  ;;  %v1593_v13 = vmul.f32 %v6736_v63, %v6643_v15 }
 0x2e0   :  { %919 = vmax.xlane.f32.xlu1 %v918_v26  ;;  %v1589_v26 = vmul.f32 %v6736_v63, %v6619_v4  ;;  %8679 = vst [vmem:[#allocation20_spill] sm:$0xff] %v6886_v52  ;;  %v1590_v4 = vmul.f32 %v6764_v56, %v6622_v5  ;;  %v1592_v25 = vmul.f32 %v6764_v56, %v6643_v15 }
 0x2e1   :  { %v1595_v55 = vmul.f32 %v6736_v63, %v6682_v36  ;;  %v1594_v15 = vmul.f32 %v6764_v56, %v6682_v36 }
 0x2e2   :  { %916 = vmax.xlane.f32.xlu0 %v915_v54  ;;  %v6901_v47 = vadd.f32 %v1589_v26, %v6639_v14  ;;  %v6908_v54 = vadd.f32 %v1588_v2, %v6639_v14  ;;  %v930_v26 = vsel %vm33_vm0, %v6866_v48, -inf  ;;  %v6924_v14 = vadd.f32 %v6725_v24, %v606_v3 }
 0x2e3   :  { %v6927_v5 = vadd.f32 %v1590_v4, %v6667_v31  ;;  %v6930_v2 = vadd.f32 %v1593_v13, %v6708_v30  ;;  %v6937_v48 = vadd.f32 %v1592_v25, %v6708_v30  ;;  %v1597_v3 = vmul.f32 %v6736_v63, %v6711_v10 }
 0x2e4   :  { %925 = vmax.xlane.f32.xlu1 %v924_v37  ;;  %v6919_v37 = vadd.f32 %v1591_v16, %v6667_v31  ;;  %8680 = vst [vmem:[#allocation21_spill] sm:$0xff] %v6924_v14  ;;  %v607_v16 = vmul.f32 %v6711_v10, %v6611_v60  ;;  %v927_v31 = vsel %vm33_vm0, %v6886_v52, -inf  ;;  %v6946_v4 = vadd.f32 %v6725_v24, %v605_v53 }
 0x2e5   :  { %v6949_v13 = vadd.f32 %v1595_v55, %v6725_v24  ;;  %v1596_v30 = vmul.f32 %v6764_v56, %v6711_v10  ;;  %v6954_v25 = vadd.f32 %v6741_v46, %v608_v61  ;;  %v6957_v36 = vadd.f32 %v1594_v15, %v6725_v24 }
 0x2e6   :  { %922 = vmax.xlane.f32.xlu0 %v921_v49  ;;  %8681 = vst [vmem:[#allocation22_spill] sm:$0xff] %v6946_v4  ;;  %v6960_v49 = vadd.f32 %v1597_v3, %v6741_v46  ;;  %v610_v55 = vmul.f32 %v6595_v51, %v6714_v12  ;;  %v1598_v10 = vmul.f32 %v6764_v56, %v6714_v12  ;;  %v936_v61 = vsel %vm33_vm0, %v6924_v14, -inf }
 0x2e7   :  { %8682 = vst [vmem:[#allocation23_spill] sm:$0xff] %v6954_v25  ;;  %v6967_v53 = vadd.f32 %v1596_v30, %v6741_v46  ;;  %v1601_v24 = vmul.f32 %v6736_v63, %v6752_v34  ;;  %v6976_v15 = vadd.f32 %v6741_v46, %v607_v16  ;;  %v609_v30 = vmul.f32 %v6714_v12, %v6611_v60 }
 0x2e8   :  { %931 = vmax.xlane.f32.xlu1 %v930_v26  ;;  %v1599_v26 = vmul.f32 %v6736_v63, %v6714_v12  ;;  %v6986_v52 = vadd.f32 %v1598_v10, %v6749_v17  ;;  %v1603_v46 = vmul.f32 %v6736_v63, %v6775_v32  ;;  %v933_v16 = vsel %vm33_vm0, %v6946_v4, -inf }
 0x2e9   :  { %v6989_v9 = vadd.f32 %v1601_v24, %v6772_v29  ;;  %v1605_v12 = vmul.f32 %v6736_v63, %v6783_v59  ;;  %v942_v10 = vsel %vm33_vm0, %v6954_v25, -inf  ;;  %v612_v24 = vmul.f32 %v6595_v51, %v6752_v34 }
 0x2ea   :  { %928 = vmax.xlane.f32.xlu0 %v927_v31  ;;  %v6979_v3 = vadd.f32 %v1599_v26, %v6749_v17  ;;  %v1600_v31 = vmul.f32 %v6764_v56, %v6752_v34  ;;  %v7007_v14 = vadd.f32 %v1603_v46, %v6780_v40  ;;  %v7012_v4 = vadd.f32 %v6749_v17, %v610_v55 }
 0x2eb   :  { %v1607_v25 = vmul.f32 %v6736_v63, %v6786_v45  ;;  %v1606_v46 = vmul.f32 %v6764_v56, %v6786_v45  ;;  %v939_v55 = vsel %vm33_vm0, %v6976_v15, -inf  ;;  %v7030_v28 = vadd.f32 %v6749_v17, %v609_v30 }
 0x2ec   :  { %937 = vmax.xlane.f32.xlu1 %v936_v61  ;;  %v6996_v26 = vadd.f32 %v1600_v31, %v6772_v29  ;;  %v1602_v61 = vmul.f32 %v6764_v56, %v6775_v32  ;;  %v1604_v31 = vmul.f32 %v6764_v56, %v6783_v59  ;;  %v7043_v56 = vadd.f32 %v6772_v29, %v612_v24 }
 0x2ed   :  { %v7038_v63 = vadd.f32 %v1606_v46, %v6794_v23  ;;  %v614_v17 = vmul.f32 %v6595_v51, %v6775_v32  ;;  %v613_v30 = vmul.f32 %v6775_v32, %v6611_v60  ;;  %v616_v46 = vmul.f32 %v6595_v51, %v6783_v59 }
 0x2ee   :  { %934 = vmax.xlane.f32.xlu0 %v933_v16  ;;  %v7015_v1 = vadd.f32 %v1602_v61, %v6780_v40  ;;  %v7018_v16 = vadd.f32 %v1605_v12, %v6791_v44  ;;  %v7023_v19 = vadd.f32 %v1604_v31, %v6791_v44  ;;  %v611_v61 = vmul.f32 %v6752_v34, %v6611_v60 }
 0x2ef   :  { %v7035_v12 = vadd.f32 %v1607_v25, %v6794_v23  ;;  %v945_v34 = vsel %vm33_vm0, %v7030_v28, -inf  ;;  %v954_v31 = vsel %vm33_vm0, %v7043_v56, -inf  ;;  %v7057_v24 = vadd.f32 %v6780_v40, %v614_v17 }
 0x2f0   :  { %943 = vmax.xlane.f32.xlu1 %v942_v10  ;;  %v948_v10 = vsel %vm33_vm0, %v7012_v4, -inf  ;;  %v7050_v25 = vadd.f32 %v6772_v29, %v611_v61  ;;  %v7064_v29 = vadd.f32 %v6780_v40, %v613_v30  ;;  %v615_v32 = vmul.f32 %v6783_v59, %v6611_v60 }
 0x2f1   :  { %v960_v61 = vsel %vm33_vm0, %v7057_v24, -inf  ;;  %v618_v17 = vmul.f32 %v6595_v51, %v6786_v45  ;;  %v617_v59 = vmul.f32 %v6786_v45, %v6611_v60  ;;  %v1643_v45 = vsel %vm33_vm0, %v6813_v27, -inf }
 0x2f2   :  { %940 = vmax.xlane.f32.xlu0 %v939_v55  ;;  %v951_v55 = vsel %vm33_vm0, %v7050_v25, -inf  ;;  %8683 = vst [vmem:[#allocation24_spill] sm:$0xff] %v7064_v29  ;;  %v7078_v40 = vadd.f32 %v6791_v44, %v615_v32  ;;  %v1646_v32 = vsel %vm33_vm0, %v6839_v38, -inf }
 0x2f4   :  { %949 = vmax.xlane.f32.xlu1 %v948_v10  ;;  %v7071_v10 = vadd.f32 %v6791_v44, %v616_v46  ;;  %8685 = vst [vmem:[#allocation26_spill] sm:$0xff] %v7078_v40  ;;  %v963_v51 = vsel %vm33_vm0, %v7078_v40, -inf  ;;  %v7090_v46 = vadd.f32 %v6794_v23, %v617_v59  ;;  %v1658_v59 = vsel %vm33_vm0, %v6869_v42, -inf }
 0x2f6   :  { %946 = vmax.xlane.f32.xlu0 %v945_v34  ;;  %8684 = vst [vmem:[#allocation25_spill] sm:$0xff] %v7071_v10  ;;  %v957_v34 = vsel %vm33_vm0, %v7064_v29, -inf  ;;  %v966_v30 = vsel %vm33_vm0, %v7071_v10, -inf  ;;  %8687 = vst [vmem:[#allocation28_spill] sm:$0xff] %v7090_v46  ;;  %v969_v60 = vsel %vm33_vm0, %v7090_v46, -inf }
 0x2f8   :  { %955 = vmax.xlane.f32.xlu1 %v954_v31  ;;  %v7085_v31 = vadd.f32 %v6794_v23, %v618_v17  ;;  %v1649_v23 = vsel %vm33_vm0, %v6832_v21, -inf  ;;  %v1652_v17 = vsel %vm33_vm0, %v6849_v22, -inf }
 0x2fa   :  { %952 = vmax.xlane.f32.xlu0 %v951_v55  ;;  %8686 = vst [vmem:[#allocation27_spill] sm:$0xff] %v7085_v31  ;;  %v972_v44 = vsel %vm33_vm0, %v7085_v31, -inf  ;;  %v1640_v55 = vsel %vm33_vm0, %v6820_v62, -inf }
 0x2fc   :  { %961 = vmax.xlane.f32.xlu1 %v960_v61  ;;  %v1655_v61 = vsel %vm33_vm0, %v6842_v8, -inf }
 0x2fe   :  { %958 = vmax.xlane.f32.xlu0 %v957_v34  ;;  %v1661_v34 = vsel %vm33_vm0, %v6861_v41, -inf }
 0x300   :  { %967 = vmax.xlane.f32.xlu1 %v966_v30  ;;  %v1667_v30 = vsel %vm33_vm0, %v6872_v43, -inf }
 0x302   :  { %964 = vmax.xlane.f32.xlu0 %v963_v51  ;;  %v1664_v51 = vsel %vm33_vm0, %v6879_v11, -inf }
 0x304   :  { %973 = vmax.xlane.f32.xlu1 %v972_v44  ;;  %v1673_v44 = vsel %vm33_vm0, %v6891_v39, -inf }
 0x306   :  { %970 = vmax.xlane.f32.xlu0 %v969_v60  ;;  %v1670_v60 = vsel %vm33_vm0, %v6898_v57, -inf }
 0x308   :  { %1644 = vmax.xlane.f32.xlu1 %v1643_v45  ;;  %v1679_v45 = vsel %vm33_vm0, %v6901_v47, -inf }
 0x30a   :  { %1641 = vmax.xlane.f32.xlu0 %v1640_v55  ;;  %v1676_v55 = vsel %vm33_vm0, %v6908_v54, -inf }
 0x30c   :  { %1650 = vmax.xlane.f32.xlu1 %v1649_v23  ;;  %v1685_v23 = vsel %vm33_vm0, %v6919_v37, -inf }
 0x30e   :  { %1647 = vmax.xlane.f32.xlu0 %v1646_v32  ;;  %v1682_v32 = vsel %vm33_vm0, %v6927_v5, -inf }
 0x310   :  { %1656 = vmax.xlane.f32.xlu1 %v1655_v61  ;;  %v1691_v61 = vsel %vm33_vm0, %v6930_v2, -inf }
 0x312   :  { %1653 = vmax.xlane.f32.xlu0 %v1652_v17  ;;  %v1688_v17 = vsel %vm33_vm0, %v6937_v48, -inf }
 0x314   :  { %1662 = vmax.xlane.f32.xlu1 %v1661_v34  ;;  %v1697_v34 = vsel %vm33_vm0, %v6949_v13, -inf }
 0x316   :  { %1659 = vmax.xlane.f32.xlu0 %v1658_v59  ;;  %v1694_v59 = vsel %vm33_vm0, %v6957_v36, -inf }
 0x318   :  { %1668 = vmax.xlane.f32.xlu1 %v1667_v30  ;;  %v1703_v30 = vsel %vm33_vm0, %v6960_v49, -inf }
 0x31a   :  { %1665 = vmax.xlane.f32.xlu0 %v1664_v51  ;;  %v1700_v51 = vsel %vm33_vm0, %v6967_v53, -inf }
 0x31c   :  { %1674 = vmax.xlane.f32.xlu1 %v1673_v44  ;;  %v1709_v44 = vsel %vm33_vm0, %v6979_v3, -inf }
 0x31e   :  { %1671 = vmax.xlane.f32.xlu0 %v1670_v60  ;;  %v1706_v60 = vsel %vm33_vm0, %v6986_v52, -inf }
 0x320   :  { %1680 = vmax.xlane.f32.xlu1 %v1679_v45  ;;  %v1715_v45 = vsel %vm33_vm0, %v6989_v9, -inf }
 0x322   :  { %1677 = vmax.xlane.f32.xlu0 %v1676_v55  ;;  %v1712_v55 = vsel %vm33_vm0, %v6996_v26, -inf }
 0x324   :  { %1686 = vmax.xlane.f32.xlu1 %v1685_v23  ;;  %v1721_v23 = vsel %vm33_vm0, %v7007_v14, -inf }
 0x326   :  { %1683 = vmax.xlane.f32.xlu0 %v1682_v32  ;;  %v1718_v32 = vsel %vm33_vm0, %v7015_v1, -inf }
 0x328   :  { %1692 = vmax.xlane.f32.xlu1 %v1691_v61  ;;  %v1727_v61 = vsel %vm33_vm0, %v7018_v16, -inf }
 0x32a   :  { %1689 = vmax.xlane.f32.xlu0 %v1688_v17  ;;  %v1724_v17 = vsel %vm33_vm0, %v7023_v19, -inf }
 0x32c   :  { %1698 = vmax.xlane.f32.xlu1 %v1697_v34  ;;  %v1733_v34 = vsel %vm33_vm0, %v7035_v12, -inf }
 0x32e   :  { %1695 = vmax.xlane.f32.xlu0 %v1694_v59  ;;  %v1730_v59 = vsel %vm33_vm0, %v7038_v63, -inf }
 0x330   :  { %1704 = vmax.xlane.f32.xlu1 %v1703_v30 }
 0x332   :  { %1701 = vmax.xlane.f32.xlu0 %v1700_v51 }
 0x334   :  { %1710 = vmax.xlane.f32.xlu1 %v1709_v44 }
 0x336   :  { %1707 = vmax.xlane.f32.xlu0 %v1706_v60 }
 0x338   :  { %1716 = vmax.xlane.f32.xlu1 %v1715_v45 }
 0x33a   :  { %1713 = vmax.xlane.f32.xlu0 %v1712_v55 }
 0x33c   :  { %1722 = vmax.xlane.f32.xlu1 %v1721_v23 }
 0x33e   :  { %1719 = vmax.xlane.f32.xlu0 %v1718_v32 }
 0x340   :  { %1728 = vmax.xlane.f32.xlu1 %v1727_v61 }
 0x342   :  { %1725 = vmax.xlane.f32.xlu0 %v1724_v17 }
 0x344   :  { %1734 = vmax.xlane.f32.xlu1 %v1733_v34 }
 0x346   :  { %1731 = vmax.xlane.f32.xlu0 %v1730_v59 }
 0x350   :  { %v884_v30 = vpop.xlane.xlu1 %883 }
 0x351   :  { %v976_v51 = vsub.f32 %v6627_v7, %v884_v30 }
 0x353   :  { %v1009_v44 = vmul.f32 1.442695, %v976_v51  ;;  %v881_v60 = vpop.xlane.xlu0 %880 }
 0x354   :  { %v975_v45 = vsub.f32 %v6650_v0, %v881_v60 }
 0x355   :  { %6048 = vpow2.f32 %v1009_v44  ;;  %v890_v55 = vpop.xlane.xlu1 %889 }
 0x356   :  { %v1007_v23 = vmul.f32 1.442695, %v975_v45  ;;  %v978_v32 = vsub.f32 %v6654_v20, %v890_v55 }
 0x357   :  { %v887_v61 = vpop.xlane.xlu0 %886 }
 0x358   :  { %6050 = vpow2.f32 %v1007_v23  ;;  %v1013_v17 = vmul.f32 1.442695, %v978_v32  ;;  %v977_v34 = vsub.f32 %v6674_v33, %v887_v61  ;;  %v8689_v61 = vld [vmem:[#allocation12_spill] sm:$0xff] }
 0x359   :  { %v896_v46 = vpop.xlane.xlu1 %895 }
 0x35a   :  { %6052 = vpow2.f32 %v1013_v17  ;;  %v1011_v59 = vmul.f32 1.442695, %v977_v34  ;;  %v980_v31 = vsub.f32 %v6689_v50, %v896_v46 }
 0x35b   :  { %v893_v7 = vpop.xlane.xlu0 %892 }
 0x35c   :  { %6054 = vpow2.f32 %v1011_v59  ;;  %v1017_v30 = vmul.f32 1.442695, %v980_v31  ;;  %v979_v0 = vsub.f32 %v6702_v6, %v893_v7  ;;  %v8691_v59 = vld [vmem:[#allocation13_spill] sm:$0xff] }
 0x35d   :  { %v902_v51 = vpop.xlane.xlu1 %901 }
 0x35e   :  { %6056 = vpow2.f32 %v1017_v30  ;;  %v1015_v44 = vmul.f32 1.442695, %v979_v0  ;;  %v982_v20 = vsub.f32 %v6719_v18, %v902_v51 }
 0x35f   :  { %v899_v60 = vpop.xlane.xlu0 %898 }
 0x360   :  { %6058 = vpow2.f32 %v1015_v44  ;;  %v1021_v45 = vmul.f32 1.442695, %v982_v20  ;;  %v981_v33 = vsub.f32 %v6730_v35, %v899_v60  ;;  %v8693_v44 = vld [vmem:[#allocation15_spill] sm:$0xff] }
 0x361   :  { %v908_v55 = vpop.xlane.xlu1 %907 }
 0x362   :  { %v7168_v23 = vpop.eup %6048  ;;  %6060 = vpow2.f32 %v1021_v45  ;;  %v1019_v50 = vmul.f32 1.442695, %v981_v33  ;;  %v984_v46 = vsub.f32 %v6746_v58, %v908_v55 }
 0x363   :  { %8688 = vst [vmem:[#allocation29_spill] sm:$0xff] %v7168_v23  ;;  %v905_v31 = vpop.xlane.xlu0 %904  ;;  %v1074_v6 = vsel %vm33_vm0, %v7168_v23, 0.0 }
 0x364   :  { %6062 = vpow2.f32 %v1019_v50  ;;  %v1025_v32 = vmul.f32 1.442695, %v984_v46  ;;  %v983_v18 = vsub.f32 %v8689_v61, %v905_v31  ;;  %1075 = vadd.xlane.f32.xlu1 %v1074_v6  ;;  %v8695_v50 = vld [vmem:[#allocation14_spill] sm:$0xff] }
 0x365   :  { %v7174_v17 = vpop.eup %6050  ;;  %v914_v34 = vpop.xlane.xlu1 %913 }
 0x366   :  { %8690 = vst [vmem:[#allocation12_spill] sm:$0xff] %v7174_v17  ;;  %6064 = vpow2.f32 %v1025_v32  ;;  %v1023_v35 = vmul.f32 1.442695, %v983_v18  ;;  %v986_v7 = vsub.f32 %v8691_v59, %v914_v34  ;;  %v1071_v30 = vsel %vm33_vm0, %v7174_v17, 0.0  ;;  %v8697_v18 = vld [vmem:[#allocation17_spill] sm:$0xff] }
 0x367   :  { %v7179_v58 = vpop.eup %6052  ;;  %v911_v0 = vpop.xlane.xlu0 %910  ;;  %1072 = vadd.xlane.f32.xlu0 %v1071_v30 }
 0x368   :  { %8692 = vst [vmem:[#allocation13_spill] sm:$0xff] %v7179_v58  ;;  %6066 = vpow2.f32 %v1023_v35  ;;  %v1029_v51 = vmul.f32 1.442695, %v986_v7  ;;  %v985_v20 = vsub.f32 %v8693_v44, %v911_v0  ;;  %v1080_v60 = vsel %vm33_vm0, %v7179_v58, 0.0  ;;  %v8699_v0 = vld [vmem:[#allocation16_spill] sm:$0xff] }
 0x369   :  { %v7184_v45 = vpop.eup %6054  ;;  %v920_v33 = vpop.xlane.xlu1 %919  ;;  %1081 = vadd.xlane.f32.xlu1 %v1080_v60 }
 0x36a   :  { %8694 = vst [vmem:[#allocation15_spill] sm:$0xff] %v7184_v45  ;;  %6068 = vpow2.f32 %v1029_v51  ;;  %v1027_v55 = vmul.f32 1.442695, %v985_v20  ;;  %v988_v46 = vsub.f32 %v8695_v50, %v920_v33  ;;  %v1077_v31 = vsel %vm33_vm0, %v7184_v45, 0.0 }
 0x36b   :  { %v7189_v6 = vpop.eup %6056  ;;  %v917_v32 = vpop.xlane.xlu0 %916  ;;  %1078 = vadd.xlane.f32.xlu0 %v1077_v31 }
 0x36c   :  { %8696 = vst [vmem:[#allocation14_spill] sm:$0xff] %v7189_v6  ;;  %6070 = vpow2.f32 %v1027_v55  ;;  %v1033_v61 = vmul.f32 1.442695, %v988_v46  ;;  %v987_v34 = vsub.f32 %v8697_v18, %v917_v32  ;;  %v1086_v35 = vsel %vm33_vm0, %v7189_v6, 0.0  ;;  %v8701_v55 = vld [vmem:[#allocation18_spill] sm:$0xff] }
 0x36d   :  { %v7194_v59 = vpop.eup %6058  ;;  %1087 = vadd.xlane.f32.xlu1 %v1086_v35  ;;  %v926_v7 = vpop.xlane.xlu1 %925 }
 0x36e   :  { %8698 = vst [vmem:[#allocation17_spill] sm:$0xff] %v7194_v59  ;;  %6072 = vpow2.f32 %v1033_v61  ;;  %v1031_v30 = vmul.f32 1.442695, %v987_v34  ;;  %v990_v51 = vsub.f32 %v8699_v0, %v926_v7  ;;  %v1083_v44 = vsel %vm33_vm0, %v7194_v59, 0.0 }
 0x36f   :  { %v7199_v20 = vpop.eup %6060  ;;  %1084 = vadd.xlane.f32.xlu0 %v1083_v44  ;;  %v923_v60 = vpop.xlane.xlu0 %922 }
 0x370   :  { %8700 = vst [vmem:[#allocation16_spill] sm:$0xff] %v7199_v20  ;;  %6074 = vpow2.f32 %v1031_v30  ;;  %v1037_v33 = vmul.f32 1.442695, %v990_v51  ;;  %v989_v50 = vsub.f32 %v8701_v55, %v923_v60  ;;  %v1092_v46 = vsel %vm33_vm0, %v7199_v20, 0.0 }
 0x371   :  { %v7204_v31 = vpop.eup %6062  ;;  %1093 = vadd.xlane.f32.xlu1 %v1092_v46  ;;  %v7206_v32 = vpop.xlane.xlu1 %931 }
 0x372   :  { %8702 = vst [vmem:[#allocation18_spill] sm:$0xff] %v7204_v31  ;;  %6076 = vpow2.f32 %v1037_v33  ;;  %v1035_v61 = vmul.f32 1.442695, %v989_v50  ;;  %v1089_v18 = vsel %vm33_vm0, %v7204_v31, 0.0 }
 0x373   :  { %v7210_v34 = vpop.eup %6064  ;;  %1090 = vadd.xlane.f32.xlu0 %v1089_v18  ;;  %v7212_v35 = vpop.xlane.xlu0 %928 }
 0x374   :  { %8703 = vst [vmem:[#allocation30_spill] sm:$0xff] %v7210_v34  ;;  %6078 = vpow2.f32 %v1035_v61  ;;  %v1098_v7 = vsel %vm33_vm0, %v7210_v34, 0.0 }
 0x375   :  { %v7216_v30 = vpop.eup %6066  ;;  %1099 = vadd.xlane.f32.xlu1 %v1098_v7  ;;  %v7218_v0 = vpop.xlane.xlu1 %937 }
 0x376   :  { %8704 = vst [vmem:[#allocation31_spill] sm:$0xff] %v7216_v30  ;;  %v1095_v51 = vsel %vm33_vm0, %v7216_v30, 0.0 }
 0x377   :  { %v7222_v44 = vpop.eup %6068  ;;  %1096 = vadd.xlane.f32.xlu0 %v1095_v51  ;;  %v7224_v60 = vpop.xlane.xlu0 %934 }
 0x378   :  { %8705 = vst [vmem:[#allocation32_spill] sm:$0xff] %v7222_v44  ;;  %v1104_v33 = vsel %vm33_vm0, %v7222_v44, 0.0 }
 0x379   :  { %v7228_v55 = vpop.eup %6070  ;;  %1105 = vadd.xlane.f32.xlu1 %v1104_v33  ;;  %v7230_v50 = vpop.xlane.xlu1 %943 }
 0x37a   :  { %8706 = vst [vmem:[#allocation33_spill] sm:$0xff] %v7228_v55  ;;  %v1101_v46 = vsel %vm33_vm0, %v7228_v55, 0.0 }
 0x37b   :  { %v7234_v61 = vpop.eup %6072  ;;  %1102 = vadd.xlane.f32.xlu0 %v1101_v46  ;;  %v7236_v18 = vpop.xlane.xlu0 %940 }
 0x37c   :  { %8707 = vst [vmem:[#allocation34_spill] sm:$0xff] %v7234_v61  ;;  %v1110_v7 = vsel %vm33_vm0, %v7234_v61, 0.0 }
 0x37d   :  { %v7240_v51 = vpop.eup %6074  ;;  %1111 = vadd.xlane.f32.xlu1 %v1110_v7  ;;  %v7242_v44 = vpop.xlane.xlu1 %949 }
 0x37e   :  { %8708 = vst [vmem:[#allocation35_spill] sm:$0xff] %v7240_v51  ;;  %v1107_v33 = vsel %vm33_vm0, %v7240_v51, 0.0 }
 0x37f   :  { %v7246_v34 = vpop.eup %6076  ;;  %1108 = vadd.xlane.f32.xlu0 %v1107_v33  ;;  %v7248_v55 = vpop.xlane.xlu0 %946 }
 0x380   :  { %8709 = vst [vmem:[#allocation36_spill] sm:$0xff] %v7246_v34  ;;  %v1116_v46 = vsel %vm33_vm0, %v7246_v34, 0.0 }
 0x381   :  { %v7252_v20 = vpop.eup %6078  ;;  %1117 = vadd.xlane.f32.xlu1 %v1116_v46  ;;  %v7254_v61 = vpop.xlane.xlu1 %955 }
 0x382   :  { %8710 = vst [vmem:[#allocation37_spill] sm:$0xff] %v7252_v20  ;;  %v1113_v7 = vsel %vm33_vm0, %v7252_v20, 0.0 }
 0x383   :  { %1114 = vadd.xlane.f32.xlu0 %v1113_v7  ;;  %v7258_v30 = vpop.xlane.xlu0 %952 }
 0x385   :  { %v7260_v51 = vpop.xlane.xlu1 %961 }
 0x387   :  { %v7262_v31 = vpop.xlane.xlu0 %958 }
 0x389   :  { %v7264_v33 = vpop.xlane.xlu1 %967 }
 0x38a   :  { %8711 = vst [vmem:[#allocation38_spill] sm:$0xff] %v7264_v33 }
 0x38b   :  { %v7266_v6 = vpop.xlane.xlu0 %964 }
 0x38c   :  { %8712 = vst [vmem:[#allocation39_spill] sm:$0xff] %v7266_v6 }
 0x38d   :  { %v7268_v34 = vpop.xlane.xlu1 %973 }
 0x38e   :  { %8713 = vst [vmem:[#allocation40_spill] sm:$0xff] %v7268_v34 }
 0x38f   :  { %v7270_v58 = vpop.xlane.xlu0 %970 }
 0x390   :  { %8714 = vst [vmem:[#allocation41_spill] sm:$0xff] %v7270_v58 }
 0x391   :  { %v1645_v46 = vpop.xlane.xlu1 %1644 }
 0x392   :  { %v1737_v59 = vsub.f32 %v6813_v27, %v1645_v46 }
 0x393   :  { %v1642_v45 = vpop.xlane.xlu0 %1641 }
 0x394   :  { %v1770_v20 = vmul.f32 1.442695, %v1737_v59  ;;  %v1736_v7 = vsub.f32 %v6820_v62, %v1642_v45 }
 0x395   :  { %v1651_v23 = vpop.xlane.xlu1 %1650 }
 0x396   :  { %6080 = vpow2.f32 %v1770_v20  ;;  %v1768_v17 = vmul.f32 1.442695, %v1736_v7  ;;  %v1739_v40 = vsub.f32 %v6832_v21, %v1651_v23 }
 0x397   :  { %v1648_v10 = vpop.xlane.xlu0 %1647 }
 0x398   :  { %6082 = vpow2.f32 %v1768_v17  ;;  %v1774_v33 = vmul.f32 1.442695, %v1739_v40  ;;  %v1738_v6 = vsub.f32 %v6839_v38, %v1648_v10 }
 0x399   :  { %v1657_v34 = vpop.xlane.xlu1 %1656 }
 0x39a   :  { %6084 = vpow2.f32 %v1774_v33  ;;  %v1772_v58 = vmul.f32 1.442695, %v1738_v6  ;;  %v1741_v29 = vsub.f32 %v6842_v8, %v1657_v34 }
 0x39b   :  { %v1654_v27 = vpop.xlane.xlu0 %1653 }
 0x39c   :  { %6086 = vpow2.f32 %v1772_v58  ;;  %v1778_v59 = vmul.f32 1.442695, %v1741_v29  ;;  %v1740_v62 = vsub.f32 %v6849_v22, %v1654_v27 }
 0x39d   :  { %v1663_v45 = vpop.xlane.xlu1 %1662 }
 0x39e   :  { %6088 = vpow2.f32 %v1778_v59  ;;  %v1776_v20 = vmul.f32 1.442695, %v1740_v62  ;;  %v1743_v21 = vsub.f32 %v6861_v41, %v1663_v45 }
 0x39f   :  { %v1660_v23 = vpop.xlane.xlu0 %1659 }
 0x3a0   :  { %6090 = vpow2.f32 %v1776_v20  ;;  %v1782_v40 = vmul.f32 1.442695, %v1743_v21  ;;  %v1742_v38 = vsub.f32 %v6869_v42, %v1660_v23 }
 0x3a1   :  { %v1669_v10 = vpop.xlane.xlu1 %1668 }
 0x3a2   :  { %6092 = vpow2.f32 %v1782_v40  ;;  %v1780_v17 = vmul.f32 1.442695, %v1742_v38  ;;  %v1745_v8 = vsub.f32 %v6872_v43, %v1669_v10 }
 0x3a3   :  { %v7281_v6 = vpop.eup %6080  ;;  %v1666_v29 = vpop.xlane.xlu0 %1665 }
 0x3a4   :  { %6094 = vpow2.f32 %v1780_v17  ;;  %v1786_v22 = vmul.f32 1.442695, %v1745_v8  ;;  %v1744_v58 = vsub.f32 %v6879_v11, %v1666_v29  ;;  %v1835_v41 = vsel %vm33_vm0, %v7281_v6, 0.0 }
 0x3a5   :  { %v7286_v34 = vpop.eup %6082  ;;  %1836 = vadd.xlane.f32.xlu1 %v1835_v41  ;;  %v1675_v33 = vpop.xlane.xlu1 %1674 }
 0x3a6   :  { %6096 = vpow2.f32 %v1786_v22  ;;  %v1784_v42 = vmul.f32 1.442695, %v1744_v58  ;;  %v1747_v46 = vsub.f32 %v6891_v39, %v1675_v33  ;;  %v1832_v43 = vsel %vm33_vm0, %v7286_v34, 0.0 }
 0x3a7   :  { %v7291_v7 = vpop.eup %6084  ;;  %1833 = vadd.xlane.f32.xlu0 %v1832_v43  ;;  %v1672_v27 = vpop.xlane.xlu0 %1671 }
 0x3a8   :  { %6098 = vpow2.f32 %v1784_v42  ;;  %v1790_v11 = vmul.f32 1.442695, %v1747_v46  ;;  %v1746_v59 = vsub.f32 %v6898_v57, %v1672_v27  ;;  %v1841_v62 = vsel %vm33_vm0, %v7291_v7, 0.0 }
 0x3a9   :  { %v7296_v45 = vpop.eup %6086  ;;  %1842 = vadd.xlane.f32.xlu1 %v1841_v62  ;;  %v1681_v20 = vpop.xlane.xlu1 %1680 }
 0x3aa   :  { %6100 = vpow2.f32 %v1790_v11  ;;  %v1788_v39 = vmul.f32 1.442695, %v1746_v59  ;;  %v1749_v21 = vsub.f32 %v6901_v47, %v1681_v20  ;;  %v1838_v23 = vsel %vm33_vm0, %v7296_v45, 0.0 }
 0x3ab   :  { %v7301_v40 = vpop.eup %6088  ;;  %1839 = vadd.xlane.f32.xlu0 %v1838_v23  ;;  %v1678_v38 = vpop.xlane.xlu0 %1677 }
 0x3ac   :  { %6102 = vpow2.f32 %v1788_v39  ;;  %v1794_v57 = vmul.f32 1.442695, %v1749_v21  ;;  %v1748_v10 = vsub.f32 %v6908_v54, %v1678_v38  ;;  %v1847_v17 = vsel %vm33_vm0, %v7301_v40, 0.0 }
 0x3ad   :  { %v7306_v8 = vpop.eup %6090  ;;  %1848 = vadd.xlane.f32.xlu1 %v1847_v17  ;;  %v1687_v29 = vpop.xlane.xlu1 %1686 }
 0x3ae   :  { %6104 = vpow2.f32 %v1794_v57  ;;  %v1792_v47 = vmul.f32 1.442695, %v1748_v10  ;;  %v1751_v22 = vsub.f32 %v6919_v37, %v1687_v29  ;;  %v1844_v58 = vsel %vm33_vm0, %v7306_v8, 0.0 }
 0x3af   :  { %v7311_v41 = vpop.eup %6092  ;;  %1845 = vadd.xlane.f32.xlu0 %v1844_v58  ;;  %v1684_v33 = vpop.xlane.xlu0 %1683 }
 0x3b0   :  { %6106 = vpow2.f32 %v1792_v47  ;;  %v1798_v54 = vmul.f32 1.442695, %v1751_v22  ;;  %v1750_v42 = vsub.f32 %v6927_v5, %v1684_v33  ;;  %v1853_v46 = vsel %vm33_vm0, %v7311_v41, 0.0 }
 0x3b1   :  { %v7316_v43 = vpop.eup %6094  ;;  %1854 = vadd.xlane.f32.xlu1 %v1853_v46  ;;  %v1693_v27 = vpop.xlane.xlu1 %1692 }
 0x3b2   :  { %6108 = vpow2.f32 %v1798_v54  ;;  %v1796_v37 = vmul.f32 1.442695, %v1750_v42  ;;  %v1753_v11 = vsub.f32 %v6930_v2, %v1693_v27  ;;  %v1850_v59 = vsel %vm33_vm0, %v7316_v43, 0.0 }
 0x3b3   :  { %v7321_v62 = vpop.eup %6096  ;;  %1851 = vadd.xlane.f32.xlu0 %v1850_v59  ;;  %v1690_v20 = vpop.xlane.xlu0 %1689 }
 0x3b4   :  { %6110 = vpow2.f32 %v1796_v37  ;;  %v1802_v5 = vmul.f32 1.442695, %v1753_v11  ;;  %v1752_v39 = vsub.f32 %v6937_v48, %v1690_v20  ;;  %v1859_v21 = vsel %vm33_vm0, %v7321_v62, 0.0 }
 0x3b5   :  { %v7326_v23 = vpop.eup %6098  ;;  %1860 = vadd.xlane.f32.xlu1 %v1859_v21  ;;  %v1699_v38 = vpop.xlane.xlu1 %1698 }
 0x3b6   :  { %6112 = vpow2.f32 %v1802_v5  ;;  %v1800_v2 = vmul.f32 1.442695, %v1752_v39  ;;  %v1755_v57 = vsub.f32 %v6949_v13, %v1699_v38  ;;  %v1856_v10 = vsel %vm33_vm0, %v7326_v23, 0.0 }
 0x3b7   :  { %v7331_v17 = vpop.eup %6100  ;;  %1857 = vadd.xlane.f32.xlu0 %v1856_v10  ;;  %v1696_v29 = vpop.xlane.xlu0 %1695 }
 0x3b8   :  { %6114 = vpow2.f32 %v1800_v2  ;;  %v1806_v48 = vmul.f32 1.442695, %v1755_v57  ;;  %v1754_v47 = vsub.f32 %v6957_v36, %v1696_v29  ;;  %v1865_v22 = vsel %vm33_vm0, %v7331_v17, 0.0 }
 0x3b9   :  { %v7336_v58 = vpop.eup %6102  ;;  %1866 = vadd.xlane.f32.xlu1 %v1865_v22  ;;  %v1705_v33 = vpop.xlane.xlu1 %1704 }
 0x3ba   :  { %6116 = vpow2.f32 %v1806_v48  ;;  %v1804_v13 = vmul.f32 1.442695, %v1754_v47  ;;  %v1757_v54 = vsub.f32 %v6960_v49, %v1705_v33  ;;  %v1862_v42 = vsel %vm33_vm0, %v7336_v58, 0.0 }
 0x3bb   :  { %v7341_v46 = vpop.eup %6104  ;;  %1863 = vadd.xlane.f32.xlu0 %v1862_v42  ;;  %v1702_v27 = vpop.xlane.xlu0 %1701 }
 0x3bc   :  { %6118 = vpow2.f32 %v1804_v13  ;;  %v1810_v36 = vmul.f32 1.442695, %v1757_v54  ;;  %v1756_v37 = vsub.f32 %v6967_v53, %v1702_v27  ;;  %v1871_v11 = vsel %vm33_vm0, %v7341_v46, 0.0 }
 0x3bd   :  { %v7346_v59 = vpop.eup %6106  ;;  %1872 = vadd.xlane.f32.xlu1 %v1871_v11  ;;  %v1711_v20 = vpop.xlane.xlu1 %1710 }
 0x3be   :  { %6120 = vpow2.f32 %v1810_v36  ;;  %v1808_v49 = vmul.f32 1.442695, %v1756_v37  ;;  %v1759_v5 = vsub.f32 %v6979_v3, %v1711_v20  ;;  %v1868_v39 = vsel %vm33_vm0, %v7346_v59, 0.0 }
 0x3bf   :  { %v7351_v21 = vpop.eup %6108  ;;  %1869 = vadd.xlane.f32.xlu0 %v1868_v39  ;;  %v1708_v38 = vpop.xlane.xlu0 %1707 }
 0x3c0   :  { %6122 = vpow2.f32 %v1808_v49  ;;  %v1814_v53 = vmul.f32 1.442695, %v1759_v5  ;;  %v1758_v2 = vsub.f32 %v6986_v52, %v1708_v38  ;;  %v1877_v57 = vsel %vm33_vm0, %v7351_v21, 0.0 }
 0x3c1   :  { %v7356_v10 = vpop.eup %6110  ;;  %1878 = vadd.xlane.f32.xlu1 %v1877_v57  ;;  %v1717_v29 = vpop.xlane.xlu1 %1716 }
 0x3c2   :  { %6124 = vpow2.f32 %v1814_v53  ;;  %v1812_v3 = vmul.f32 1.442695, %v1758_v2  ;;  %v1761_v48 = vsub.f32 %v6989_v9, %v1717_v29  ;;  %v1874_v47 = vsel %vm33_vm0, %v7356_v10, 0.0  ;;  %v8715_v29 = vld [vmem:[#allocation19_spill] sm:$0xff] }
 0x3c3   :  { %v7361_v22 = vpop.eup %6112  ;;  %1875 = vadd.xlane.f32.xlu0 %v1874_v47  ;;  %v1714_v33 = vpop.xlane.xlu0 %1713 }
 0x3c4   :  { %6126 = vpow2.f32 %v1812_v3  ;;  %v1818_v52 = vmul.f32 1.442695, %v1761_v48  ;;  %v1760_v13 = vsub.f32 %v6996_v26, %v1714_v33  ;;  %v1883_v54 = vsel %vm33_vm0, %v7361_v22, 0.0 }
 0x3c5   :  { %v7366_v42 = vpop.eup %6114  ;;  %1884 = vadd.xlane.f32.xlu1 %v1883_v54  ;;  %v1723_v27 = vpop.xlane.xlu1 %1722  ;;  %v992_v3 = vsub.f32 %v8715_v29, %v7206_v32 }
 0x3c6   :  { %6128 = vpow2.f32 %v1818_v52  ;;  %v1816_v9 = vmul.f32 1.442695, %v1760_v13  ;;  %v1763_v36 = vsub.f32 %v7007_v14, %v1723_v27  ;;  %v1880_v37 = vsel %vm33_vm0, %v7366_v42, 0.0 }
 0x3c7   :  { %v7371_v11 = vpop.eup %6116  ;;  %1881 = vadd.xlane.f32.xlu0 %v1880_v37  ;;  %v1720_v20 = vpop.xlane.xlu0 %1719  ;;  %v8717_v37 = vld [vmem:[#allocation21_spill] sm:$0xff] }
 0x3c8   :  { %6130 = vpow2.f32 %v1816_v9  ;;  %v1822_v26 = vmul.f32 1.442695, %v1763_v36  ;;  %v1762_v49 = vsub.f32 %v7015_v1, %v1720_v20  ;;  %v1889_v5 = vsel %vm33_vm0, %v7371_v11, 0.0 }
 0x3c9   :  { %v7376_v39 = vpop.eup %6118  ;;  %1890 = vadd.xlane.f32.xlu1 %v1889_v5  ;;  %v1729_v38 = vpop.xlane.xlu1 %1728  ;;  %v994_v20 = vsub.f32 %v8717_v37, %v7218_v0 }
 0x3ca   :  { %6132 = vpow2.f32 %v1822_v26  ;;  %v1820_v14 = vmul.f32 1.442695, %v1762_v49  ;;  %v1765_v53 = vsub.f32 %v7018_v16, %v1729_v38  ;;  %v1886_v2 = vsel %vm33_vm0, %v7376_v39, 0.0  ;;  %v8716_v16 = vld [vmem:[#allocation20_spill] sm:$0xff] }
 0x3cb   :  { %v7381_v57 = vpop.eup %6120  ;;  %1887 = vadd.xlane.f32.xlu0 %v1886_v2  ;;  %v1726_v1 = vpop.xlane.xlu0 %1725  ;;  %v991_v13 = vsub.f32 %v8716_v16, %v7212_v35 }
 0x3cc   :  { %6134 = vpow2.f32 %v1820_v14  ;;  %v1826_v48 = vmul.f32 1.442695, %v1765_v53  ;;  %v1764_v47 = vsub.f32 %v7023_v19, %v1726_v1  ;;  %v1895_v33 = vsel %vm33_vm0, %v7381_v57, 0.0  ;;  %v8718_v14 = vld [vmem:[#allocation22_spill] sm:$0xff] }
 0x3cd   :  { %v7388_v52 = vpop.eup %6122  ;;  %1896 = vadd.xlane.f32.xlu1 %v1895_v33  ;;  %v1735_v54 = vpop.xlane.xlu1 %1734  ;;  %v1041_v19 = vmul.f32 1.442695, %v992_v3  ;;  %v993_v53 = vsub.f32 %v8718_v14, %v7224_v60  ;;  %v8719_v3 = vld [vmem:[#allocation23_spill] sm:$0xff]  ;;  %v995_v33 = vsub.f32 %v6976_v15, %v7236_v18  ;;  %v997_v15 = vsub.f32 %v7030_v28, %v7248_v55 }
 0x3ce   :  { %6136 = vpow2.f32 %v1826_v48  ;;  %v1824_v27 = vmul.f32 1.442695, %v1764_v47  ;;  %v1767_v32 = vsub.f32 %v7035_v12, %v1735_v54  ;;  %v1892_v9 = vsel %vm33_vm0, %v7388_v52, 0.0 }
 0x3cf   :  { %v7395_v36 = vpop.eup %6124  ;;  %1893 = vadd.xlane.f32.xlu0 %v1892_v9  ;;  %v1732_v26 = vpop.xlane.xlu0 %1731  ;;  %v1039_v12 = vmul.f32 1.442695, %v991_v13  ;;  %v996_v1 = vsub.f32 %v8719_v3, %v7230_v50  ;;  %v1043_v60 = vmul.f32 1.442695, %v993_v53  ;;  %v998_v54 = vsub.f32 %v7012_v4, %v7242_v44 }
 0x3d0   :  { %6138 = vpow2.f32 %v1824_v27  ;;  %v1830_v49 = vmul.f32 1.442695, %v1767_v32  ;;  %v1766_v35 = vsub.f32 %v7038_v63, %v1732_v26  ;;  %v1901_v5 = vsel %vm33_vm0, %v7395_v36, 0.0 }
 0x3d1   :  { %v7402_v38 = vpop.eup %6126  ;;  %1902 = vadd.xlane.f32.xlu1 %v1901_v5  ;;  %v1045_v63 = vmul.f32 1.442695, %v994_v20  ;;  %v1049_v50 = vmul.f32 1.442695, %v996_v1  ;;  %v1047_v9 = vmul.f32 1.442695, %v995_v33  ;;  %v1000_v4 = vsub.f32 %v7043_v56, %v7254_v61 }
 0x3d2   :  { %6140 = vpow2.f32 %v1830_v49  ;;  %v1828_v2 = vmul.f32 1.442695, %v1766_v35  ;;  %v1898_v0 = vsel %vm33_vm0, %v7402_v38, 0.0  ;;  %v1053_v37 = vmul.f32 1.442695, %v998_v54 }
 0x3d3   :  { %v7408_v29 = vpop.eup %6128  ;;  %6142 = vpow2.f32 %v1041_v19  ;;  %1899 = vadd.xlane.f32.xlu0 %v1898_v0  ;;  %v1051_v26 = vmul.f32 1.442695, %v997_v15  ;;  %v999_v28 = vsub.f32 %v7050_v25, %v7258_v30  ;;  %v1057_v56 = vmul.f32 1.442695, %v1000_v4  ;;  %v8721_v30 = vld [vmem:[#allocation24_spill] sm:$0xff] }
 0x3d4   :  { %6144 = vpow2.f32 %v1828_v2  ;;  %v1907_v48 = vsel %vm33_vm0, %v7408_v29, 0.0  ;;  %v1002_v61 = vsub.f32 %v7057_v24, %v7260_v51  ;;  %v1001_v14 = vsub.f32 %v8721_v30, %v7262_v31  ;;  %v8723_v24 = vld [vmem:[#allocation38_spill] sm:$0xff]  ;;  %v8724_v51 = vld [vmem:[#allocation25_spill] sm:$0xff]  ;;  %v8726_v31 = vld [vmem:[#allocation39_spill] sm:$0xff] }
 0x3d5   :  { %v7414_v47 = vpop.eup %6130  ;;  %1908 = vadd.xlane.f32.xlu1 %v1907_v48  ;;  %6146 = vpow2.f32 %v1039_v12  ;;  %v1055_v25 = vmul.f32 1.442695, %v999_v28 }
 0x3d6   :  { %v1904_v16 = vsel %vm33_vm0, %v7414_v47, 0.0  ;;  %6148 = vpow2.f32 %v1045_v63  ;;  %v1061_v0 = vmul.f32 1.442695, %v1002_v61  ;;  %v1004_v63 = vsub.f32 %v8724_v51, %v8723_v24 }
 0x3d7   :  { %v7420_v13 = vpop.eup %6132  ;;  %1905 = vadd.xlane.f32.xlu0 %v1904_v16  ;;  %6150 = vpow2.f32 %v1043_v60  ;;  %v1059_v48 = vmul.f32 1.442695, %v1001_v14  ;;  %v8727_v60 = vld [vmem:[#allocation26_spill] sm:$0xff] }
 0x3d8   :  { %v1913_v27 = vsel %vm33_vm0, %v7420_v13, 0.0  ;;  %6152 = vpow2.f32 %v1049_v50  ;;  %v1003_v33 = vsub.f32 %v8727_v60, %v8726_v31  ;;  %v1065_v54 = vmul.f32 1.442695, %v1004_v63 }
 0x3d9   :  { %v7426_v32 = vpop.eup %6134  ;;  %1914 = vadd.xlane.f32.xlu1 %v1913_v27  ;;  %6154 = vpow2.f32 %v1047_v9  ;;  %v8729_v27 = vld [vmem:[#allocation40_spill] sm:$0xff]  ;;  %v8730_v9 = vld [vmem:[#allocation27_spill] sm:$0xff] }
 0x3da   :  { %v1910_v18 = vsel %vm33_vm0, %v7426_v32, 0.0  ;;  %6156 = vpow2.f32 %v1053_v37  ;;  %v1006_v15 = vsub.f32 %v8730_v9, %v8729_v27  ;;  %v1063_v4 = vmul.f32 1.442695, %v1003_v33 }
 0x3db   :  { %v7432_v19 = vpop.eup %6136  ;;  %1911 = vadd.xlane.f32.xlu0 %v1910_v18  ;;  %6158 = vpow2.f32 %v1051_v26  ;;  %v8733_v26 = vld [vmem:[#allocation28_spill] sm:$0xff] }
 0x3dc   :  { %v1919_v44 = vsel %vm33_vm0, %v7432_v19, 0.0  ;;  %6160 = vpow2.f32 %v1057_v56  ;;  %v1069_v61 = vmul.f32 1.442695, %v1006_v15 }
 0x3dd   :  { %v7438_v20 = vpop.eup %6138  ;;  %1920 = vadd.xlane.f32.xlu1 %v1919_v44  ;;  %6162 = vpow2.f32 %v1055_v25  ;;  %v8732_v44 = vld [vmem:[#allocation41_spill] sm:$0xff] }
 0x3de   :  { %v1916_v55 = vsel %vm33_vm0, %v7438_v20, 0.0  ;;  %6164 = vpow2.f32 %v1061_v0  ;;  %v1005_v28 = vsub.f32 %v8733_v26, %v8732_v44 }
 0x3df   :  { %v7444_v49 = vpop.eup %6140  ;;  %1917 = vadd.xlane.f32.xlu0 %v1916_v55  ;;  %6166 = vpow2.f32 %v1059_v48 }
 0x3e0   :  { %v7446_v35 = vpop.eup %6142  ;;  %v1925_v5 = vsel %vm33_vm0, %v7444_v49, 0.0  ;;  %6168 = vpow2.f32 %v1065_v54  ;;  %v1067_v30 = vmul.f32 1.442695, %v1005_v28 }
 0x3e1   :  { %8720 = vst [vmem:[#allocation19_spill] sm:$0xff] %v7446_v35  ;;  %v7452_v12 = vpop.eup %6144  ;;  %1926 = vadd.xlane.f32.xlu1 %v1925_v5  ;;  %v1122_v3 = vsel %vm33_vm0, %v7446_v35, 0.0  ;;  %6170 = vpow2.f32 %v1063_v4 }
 0x3e2   :  { %v1922_v53 = vsel %vm33_vm0, %v7452_v12, 0.0  ;;  %v7458_v2 = vpop.eup %6146  ;;  %6172 = vpow2.f32 %v1069_v61 }
 0x3e3   :  { %8722 = vst [vmem:[#allocation20_spill] sm:$0xff] %v7458_v2  ;;  %1923 = vadd.xlane.f32.xlu0 %v1922_v53  ;;  %v7464_v1 = vpop.eup %6148  ;;  %v1119_v16 = vsel %vm33_vm0, %v7458_v2, 0.0  ;;  %6174 = vpow2.f32 %v1067_v30 }
 0x3e4   :  { %8725 = vst [vmem:[#allocation21_spill] sm:$0xff] %v7464_v1  ;;  %v7470_v50 = vpop.eup %6150  ;;  %v1128_v18 = vsel %vm33_vm0, %v7464_v1, 0.0 }
 0x3e5   :  { %1123 = vadd.xlane.f32.xlu1 %v1122_v3  ;;  %8728 = vst [vmem:[#allocation22_spill] sm:$0xff] %v7470_v50  ;;  %v7476_v37 = vpop.eup %6152  ;;  %v1125_v55 = vsel %vm33_vm0, %v7470_v50, 0.0 }
 0x3e6   :  { %8731 = vst [vmem:[#allocation23_spill] sm:$0xff] %v7476_v37  ;;  %v7482_v56 = vpop.eup %6154  ;;  %v1134_v5 = vsel %vm33_vm0, %v7476_v37, 0.0 }
 0x3e7   :  { %1120 = vadd.xlane.f32.xlu0 %v1119_v16  ;;  %8734 = vst [vmem:[#allocation24_spill] sm:$0xff] %v7482_v56  ;;  %v7486_v25 = vpop.eup %6156  ;;  %v1131_v14 = vsel %vm33_vm0, %v7482_v56, 0.0 }
 0x3e8   :  { %8735 = vst [vmem:[#allocation38_spill] sm:$0xff] %v7486_v25  ;;  %v7490_v53 = vpop.eup %6158  ;;  %v1140_v0 = vsel %vm33_vm0, %v7486_v25, 0.0 }
 0x3e9   :  { %1129 = vadd.xlane.f32.xlu1 %v1128_v18  ;;  %8736 = vst [vmem:[#allocation25_spill] sm:$0xff] %v7490_v53  ;;  %v7494_v24 = vpop.eup %6160  ;;  %v1137_v51 = vsel %vm33_vm0, %v7490_v53, 0.0 }
 0x3ea   :  { %8737 = vst [vmem:[#allocation39_spill] sm:$0xff] %v7494_v24  ;;  %v7498_v63 = vpop.eup %6162  ;;  %v1146_v3 = vsel %vm33_vm0, %v7494_v24, 0.0  ;;  %v8749_v24 = vld [vmem:[#allocation6_spill] sm:$0xff] }
 0x3eb   :  { %1126 = vadd.xlane.f32.xlu0 %v1125_v55  ;;  %8738 = vst [vmem:[#allocation26_spill] sm:$0xff] %v7498_v63  ;;  %v7502_v48 = vpop.eup %6164  ;;  %v1143_v31 = vsel %vm33_vm0, %v7498_v63, 0.0  ;;  %v5084_v25 = vsub.s32 1, %v8749_v24 }
 0x3ec   :  { %8739 = vst [vmem:[#allocation40_spill] sm:$0xff] %v7502_v48  ;;  %v7506_v60 = vpop.eup %6166  ;;  %v1152_v33 = vsel %vm33_vm0, %v7502_v48, 0.0  ;;  %v8747_v48 = vld [vmem:[#allocation9_spill] sm:$0xff] }
 0x3ed   :  { %1135 = vadd.xlane.f32.xlu1 %v1134_v5  ;;  %8740 = vst [vmem:[#allocation27_spill] sm:$0xff] %v7506_v60  ;;  %v7510_v16 = vpop.eup %6168  ;;  %v1149_v54 = vsel %vm33_vm0, %v7506_v60, 0.0  ;;  %v7524_v44 = vpop.xlane.xlu1 %1075 }
 0x3ee   :  { %8741 = vst [vmem:[#allocation41_spill] sm:$0xff] %v7510_v16  ;;  %v7514_v27 = vpop.eup %6170  ;;  %v1158_v9 = vsel %vm33_vm0, %v7510_v16, 0.0 }
 0x3ef   :  { %1132 = vadd.xlane.f32.xlu0 %v1131_v14  ;;  %8742 = vst [vmem:[#allocation28_spill] sm:$0xff] %v7514_v27  ;;  %v7518_v15 = vpop.eup %6172  ;;  %v1155_v18 = vsel %vm33_vm0, %v7514_v27, 0.0  ;;  %v8748_v27 = vld [vmem:[#allocation8_spill] sm:$0xff] }
 0x3f0   :  { %8743 = vst [vmem:[#allocation42_spill] sm:$0xff] %v7518_v15  ;;  %v7522_v4 = vpop.eup %6174  ;;  %v1164_v26 = vsel %vm33_vm0, %v7518_v15, 0.0  ;;  %v7528_v28 = vpop.xlane.xlu0 %1072  ;;  %v8746_v15 = vld [vmem:[#allocation7_spill] sm:$0xff]  ;;  %v5162_v2 = vrot.slane %v8747_v48, %v8748_v27 }
 0x3f1   :  { %1141 = vadd.xlane.f32.xlu1 %v1140_v0  ;;  %8744 = vst [vmem:[#allocation43_spill] sm:$0xff] %v7522_v4  ;;  %v1161_v55 = vsel %vm33_vm0, %v7522_v4, 0.0  ;;  %v5423_v16 = vsel %vm33_vm0, %v8746_v15, 0.0  ;;  %v5424_v4 = vsel %vm33_vm0, %v8747_v48, 0.0  ;;  %v5074_v60 = vrot.slane %v8746_v15, %v8748_v27 }
 0x3f2   :  { %v7532_v61 = vpop.xlane.xlu1 %1081  ;;  %v5425_v63 = vadd.f32 %v5424_v4, %v5423_v16  ;;  %v5085_v37 = vrot.slane %v8746_v15, %v5084_v25 }
 0x3f3   :  { %1138 = vadd.xlane.f32.xlu0 %v1137_v51 }
 0x3f4   :  { %v7534_v5 = vpop.xlane.xlu0 %1078 }
 0x3f5   :  { %1147 = vadd.xlane.f32.xlu1 %v1146_v3 }
 0x3f6   :  { %v7536_v30 = vpop.xlane.xlu1 %1087 }
 0x3f7   :  { %1144 = vadd.xlane.f32.xlu0 %v1143_v31 }
 0x3f8   :  { %v7538_v14 = vpop.xlane.xlu0 %1084 }
 0x3f9   :  { %1153 = vadd.xlane.f32.xlu1 %v1152_v33 }
 0x3fa   :  { %v7540_v0 = vpop.xlane.xlu1 %1093 }
 0x3fb   :  { %1150 = vadd.xlane.f32.xlu0 %v1149_v54 }
 0x3fc   :  { %v7542_v51 = vpop.xlane.xlu0 %1090 }
 0x3fd   :  { %1159 = vadd.xlane.f32.xlu1 %v1158_v9 }
 0x3fe   :  { %v7544_v3 = vpop.xlane.xlu1 %1099 }
 0x3ff   :  { %1156 = vadd.xlane.f32.xlu0 %v1155_v18 }
 0x400   :  { %v7546_v31 = vpop.xlane.xlu0 %1096 }
 0x401   :  { %1165 = vadd.xlane.f32.xlu1 %v1164_v26 }
 0x402   :  { %v7548_v33 = vpop.xlane.xlu1 %1105 }
 0x403   :  { %1162 = vadd.xlane.f32.xlu0 %v1161_v55 }
 0x404   :  { %v7550_v54 = vpop.xlane.xlu0 %1102 }
 0x406   :  { %v7552_v9 = vpop.xlane.xlu1 %1111 }
 0x407   :  { %5426 = vadd.xlane.f32.xlu0 %v5425_v63  ;;  %v7571_v63 = vrot.slane %v8747_v48, %v5084_v25 }
 0x408   :  { %v7554_v18 = vpop.xlane.xlu0 %1108 }
 0x40a   :  { %v7556_v26 = vpop.xlane.xlu1 %1117 }
 0x40b   :  { %8745 = vst [vmem:[#allocation44_spill] sm:$0xff] %v7556_v26 }
 0x40c   :  { %v7558_v55 = vpop.xlane.xlu0 %1114 }
 0x412   :  { %5076 = vbcast.lane.b32.xlu1 %v5074_v60, 256 }
 0x416   :  { %5087 = vbcast.lane.b32.xlu1 %v5085_v37, 256 }
 0x41a   :  { %5091 = vbcast.lane.b32.xlu1 %v5085_v37, 264 }
 0x41d   :  { %5080 = vbcast.lane.b32.xlu0 %v5074_v60, 264 }
 0x41e   :  { %5164 = vbcast.lane.b32.xlu1 %v5162_v2, 256 }
 0x421   :  { %5168 = vbcast.lane.b32.xlu0 %v5162_v2, 264 }
 0x422   :  { %5175 = vbcast.lane.b32.xlu1 %v7571_v63, 256 }
 0x425   :  { %5179 = vbcast.lane.b32.xlu0 %v7571_v63, 264 }
 0x42e   :  { %v1837_v53 = vpop.xlane.xlu1 %1836 }
 0x42f   :  { %6176 = vrcp.f32 %v1837_v53 }
 0x430   :  { %v1834_v1 = vpop.xlane.xlu0 %1833 }
 0x431   :  { %6178 = vrcp.f32 %v1834_v1  ;;  %v5095_v1 = vsub.s32 2, %v8749_v24 }
 0x432   :  { %v1843_v56 = vpop.xlane.xlu1 %1842 }
 0x433   :  { %6180 = vrcp.f32 %v1843_v56  ;;  %v7576_v37 = vrot.slane %v8746_v15, %v5095_v1 }
 0x434   :  { %v1840_v50 = vpop.xlane.xlu0 %1839 }
 0x435   :  { %6182 = vrcp.f32 %v1840_v50  ;;  %5098 = vbcast.lane.b32.xlu1 %v7576_v37, 256  ;;  %5102 = vbcast.lane.b32.xlu0 %v7576_v37, 264 }
 0x436   :  { %v1849_v35 = vpop.xlane.xlu1 %1848 }
 0x437   :  { %6184 = vrcp.f32 %v1849_v35 }
 0x438   :  { %v1846_v16 = vpop.xlane.xlu0 %1845 }
 0x439   :  { %6186 = vrcp.f32 %v1846_v16 }
 0x43a   :  { %v1855_v4 = vpop.xlane.xlu1 %1854 }
 0x43b   :  { %6188 = vrcp.f32 %v1855_v4 }
 0x43c   :  { %v1852_v53 = vpop.xlane.xlu0 %1851  ;;  %v6177_v56 = vpop.eup %6176 }
 0x43d   :  { %6190 = vrcp.f32 %v1852_v53  ;;  %v1931_v25 = vmul.f32 %v6177_v56, %v7281_v6  ;;  %v8750_v53 = vld [vmem:[#allocation10_spill] sm:$0xff]  ;;  %v7588_v56 = vrot.slane %v8747_v48, %v5095_v1 }
 0x43e   :  { %v6179_v50 = vpop.eup %6178  ;;  %v1861_v26 = vpop.xlane.xlu1 %1860 }
 0x43f   :  { %v1929_v35 = vmul.f32 %v6179_v50, %v7286_v34  ;;  %6192 = vrcp.f32 %v1861_v26  ;;  %v8751_v34 = vld [vmem:[#allocation11_spill] sm:$0xff]  ;;  %5186 = vbcast.lane.b32.xlu1 %v7588_v56, 256  ;;  %5190 = vbcast.lane.b32.xlu0 %v7588_v56, 264 }
 0x440   :  { %v1858_v27 = vpop.xlane.xlu0 %1857  ;;  %v6181_v16 = vpop.eup %6180 }
 0x441   :  { %6194 = vrcp.f32 %v1858_v27  ;;  %5819 = vmatprep.mubr.msk.f32.mxu1 %vm33_vm0, %v1929_v35  ;;  %v1935_v6 = vmul.f32 %v6181_v16, %v7291_v7 }
 0x442   :  { %v6183_v4 = vpop.eup %6182  ;;  %v1867_v24 = vpop.xlane.xlu1 %1866  ;;  %5820 = vmatmul.mubr.msk.f32.vlgmr.msra.gmra.mxu1 %vm33_vm0, %v1931_v25 }
 0x443   :  { %5823 = vmatpush3.msra.mxu1 %v8750_v53  ;;  %v1933_v15 = vmul.f32 %v6183_v4, %v7296_v45  ;;  %6196 = vrcp.f32 %v1867_v24 }
 0x444   :  { %5824 = vmatprep.subr.mxu1 %v8751_v34  ;;  %v1864_v26 = vpop.xlane.xlu0 %1863  ;;  %v6185_v50 = vpop.eup %6184 }
 0x445   :  { %5825 = vmatpush3.msra.mxu1 %v8751_v34  ;;  %6198 = vrcp.f32 %v1864_v26  ;;  %5826 = vmatprep.mubr.msk.f32.mxu1 %vm33_vm0, %v1933_v15  ;;  %v1939_v24 = vmul.f32 %v6185_v50, %v7301_v40 }
 0x446   :  { %v6187_v35 = vpop.eup %6186  ;;  %5836 = vmatprep.subr.mxu1 %v8750_v53  ;;  %v1873_v27 = vpop.xlane.xlu1 %1872  ;;  %5827 = vmatmul.mubr.msk.f32.vlgmr.msra.gmra.mxu1 %vm33_vm0, %v1935_v6 }
 0x447   :  { %5837 = vmatpush3.msra.mxu1 %v8750_v53  ;;  %v1937_v45 = vmul.f32 %v6187_v35, %v7306_v8  ;;  %6200 = vrcp.f32 %v1873_v27 }
 0x448   :  { %5838 = vmatprep.subr.mxu1 %v8751_v34  ;;  %v1870_v7 = vpop.xlane.xlu0 %1869  ;;  %v6189_v15 = vpop.eup %6188 }
 0x449   :  { %5839 = vmatpush3.msra.mxu1 %v8751_v34  ;;  %6202 = vrcp.f32 %v1870_v7  ;;  %5833 = vmatprep.mubr.msk.f32.mxu0 %vm33_vm0, %v1937_v45  ;;  %v1943_v60 = vmul.f32 %v6189_v15, %v7311_v41 }
 0x44a   :  { %v6191_v1 = vpop.eup %6190  ;;  %5850 = vmatprep.subr.mxu1 %v8750_v53  ;;  %v1879_v25 = vpop.xlane.xlu1 %1878  ;;  %5834 = vmatmul.mubr.msk.f32.vlgmr.msra.gmra.mxu0 %vm33_vm0, %v1939_v24 }
 0x44b   :  { %5844 = vmatpush3.msra.mxu0 %v8750_v53  ;;  %v1941_v8 = vmul.f32 %v6191_v1, %v7316_v43  ;;  %6204 = vrcp.f32 %v1879_v25 }
 0x44c   :  { %5845 = vmatprep.subr.mxu0 %v8751_v34  ;;  %v1876_v40 = vpop.xlane.xlu0 %1875  ;;  %v6193_v16 = vpop.eup %6192 }
 0x44d   :  { %5846 = vmatpush3.msra.mxu0 %v8751_v34  ;;  %6206 = vrcp.f32 %v1876_v40  ;;  %5840 = vmatprep.mubr.msk.f32.mxu1 %vm33_vm0, %v1941_v8  ;;  %v1947_v2 = vmul.f32 %v6193_v16, %v7321_v62 }
 0x44e   :  { %v6195_v4 = vpop.eup %6194  ;;  %5857 = vmatprep.subr.mxu0 %v8750_v53  ;;  %v1885_v26 = vpop.xlane.xlu1 %1884  ;;  %5841 = vmatmul.mubr.msk.f32.vlgmr.msra.gmra.mxu1 %vm33_vm0, %v1943_v60 }
 0x44f   :  { %5851 = vmatpush3.msra.mxu1 %v8750_v53  ;;  %v1945_v43 = vmul.f32 %v6195_v4, %v7326_v23  ;;  %6208 = vrcp.f32 %v1885_v26 }
 0x450   :  { %5852 = vmatprep.subr.mxu1 %v8751_v34  ;;  %v1882_v41 = vpop.xlane.xlu0 %1881  ;;  %v6197_v6 = vpop.eup %6196 }
 0x451   :  { %5853 = vmatpush3.msra.mxu1 %v8751_v34  ;;  %6210 = vrcp.f32 %v1882_v41  ;;  %5847 = vmatprep.mubr.msk.f32.mxu0 %vm33_vm0, %v1945_v43  ;;  %v1951_v63 = vmul.f32 %v6197_v6, %v7331_v17 }
 0x452   :  { %v6199_v50 = vpop.eup %6198  ;;  %5864 = vmatprep.subr.mxu1 %v8750_v53  ;;  %v1891_v35 = vpop.xlane.xlu1 %1890  ;;  %5848 = vmatmul.mubr.msk.f32.vlgmr.msra.gmra.mxu0 %vm33_vm0, %v1947_v2 }
 0x453   :  { %5858 = vmatpush3.msra.mxu0 %v8750_v53  ;;  %v1949_v23 = vmul.f32 %v6199_v50, %v7336_v58  ;;  %6212 = vrcp.f32 %v1891_v35 }
 0x454   :  { %5859 = vmatprep.subr.mxu0 %v8751_v34  ;;  %v1888_v62 = vpop.xlane.xlu0 %1887  ;;  %v6201_v27 = vpop.eup %6200 }
 0x455   :  { %5860 = vmatpush3.msra.mxu0 %v8751_v34  ;;  %6214 = vrcp.f32 %v1888_v62  ;;  %5854 = vmatprep.mubr.msk.f32.mxu1 %vm33_vm0, %v1949_v23  ;;  %v1955_v37 = vmul.f32 %v6201_v27, %v7341_v46 }
 0x456   :  { %v6203_v45 = vpop.eup %6202  ;;  %5871 = vmatprep.subr.mxu0 %v8750_v53  ;;  %v1897_v7 = vpop.xlane.xlu1 %1896  ;;  %5855 = vmatmul.mubr.msk.f32.vlgmr.msra.gmra.mxu1 %vm33_vm0, %v1951_v63 }
 0x457   :  { %5865 = vmatpush3.msra.mxu1 %v8750_v53  ;;  %v1953_v58 = vmul.f32 %v6203_v45, %v7346_v59  ;;  %6216 = vrcp.f32 %v1897_v7 }
 0x458   :  { %5866 = vmatprep.subr.mxu1 %v8751_v34  ;;  %v1894_v17 = vpop.xlane.xlu0 %1893  ;;  %v6205_v24 = vpop.eup %6204 }
 0x459   :  { %5867 = vmatpush3.msra.mxu1 %v8751_v34  ;;  %6218 = vrcp.f32 %v1894_v17  ;;  %5861 = vmatprep.mubr.msk.f32.mxu0 %vm33_vm0, %v1953_v58  ;;  %v1959_v56 = vmul.f32 %v6205_v24, %v7351_v21  ;;  %v5505_v58 = vld [vmem:[%s8587_s6] ss:$0 sm:$0xff]  ;;  %v8752_v17 = vld [vmem:[#allocation4_spill] sm:$0xff] }
 0x45a   :  { %v6207_v15 = vpop.eup %6206  ;;  %5878 = vmatprep.subr.mxu1 %v8750_v53  ;;  %v1903_v1 = vpop.xlane.xlu1 %1902  ;;  %5862 = vmatmul.mubr.msk.f32.vlgmr.msra.gmra.mxu0 %vm33_vm0, %v1955_v37  ;;  %v7704_v37 = vadd.f32 %v8752_v17, %v5505_v58 }
 0x45b   :  { %5872 = vmatpush3.msra.mxu0 %v8750_v53  ;;  %v1957_v59 = vmul.f32 %v6207_v15, %v7356_v10  ;;  %6220 = vrcp.f32 %v1903_v1 }
 0x45c   :  { %5873 = vmatprep.subr.mxu0 %v8751_v34  ;;  %v1900_v46 = vpop.xlane.xlu0 %1899  ;;  %v6209_v25 = vpop.eup %6208 }
 0x45d   :  { %5874 = vmatpush3.msra.mxu0 %v8751_v34  ;;  %6222 = vrcp.f32 %v1900_v46  ;;  %5868 = vmatprep.mubr.msk.f32.mxu1 %vm33_vm0, %v1957_v59  ;;  %v1963_v60 = vmul.f32 %v6209_v25, %v7361_v22 }
 0x45e   :  { %v6211_v8 = vpop.eup %6210  ;;  %5885 = vmatprep.subr.mxu0 %v8750_v53  ;;  %v1909_v40 = vpop.xlane.xlu1 %1908  ;;  %5869 = vmatmul.mubr.msk.f32.vlgmr.msra.gmra.mxu1 %vm33_vm0, %v1959_v56  ;;  %v8754_v56 = vld [vmem:[#allocation5_spill] sm:$0xff] }
 0x45f   :  { %5879 = vmatpush3.msra.mxu1 %v8750_v53  ;;  %v1961_v10 = vmul.f32 %v6211_v8, %v7366_v42  ;;  %6224 = vrcp.f32 %v1909_v40 }
 0x460   :  { %5880 = vmatprep.subr.mxu1 %v8751_v34  ;;  %v1906_v21 = vpop.xlane.xlu0 %1905  ;;  %v6213_v16 = vpop.eup %6212 }
 0x461   :  { %5881 = vmatpush3.msra.mxu1 %v8751_v34  ;;  %6226 = vrcp.f32 %v1906_v21  ;;  %5875 = vmatprep.mubr.msk.f32.mxu0 %vm33_vm0, %v1961_v10  ;;  %v1967_v43 = vmul.f32 %v6213_v16, %v7371_v11 }
 0x462   :  { %v6215_v4 = vpop.eup %6214  ;;  %5892 = vmatprep.subr.mxu1 %v8750_v53  ;;  %v1915_v26 = vpop.xlane.xlu1 %1914  ;;  %5876 = vmatmul.mubr.msk.f32.vlgmr.msra.gmra.mxu0 %vm33_vm0, %v1963_v60 }
 0x463   :  { %5886 = vmatpush3.msra.mxu0 %v8750_v53  ;;  %v1965_v42 = vmul.f32 %v6215_v4, %v7376_v39  ;;  %6228 = vrcp.f32 %v1915_v26  ;;  %v8758_v4 = vld [vmem:[#allocation13_spill] sm:$0xff] }
 0x464   :  { %5887 = vmatprep.subr.mxu0 %v8751_v34  ;;  %v1912_v22 = vpop.xlane.xlu0 %1911  ;;  %v6217_v41 = vpop.eup %6216 }
 0x465   :  { %5888 = vmatpush3.msra.mxu0 %v8751_v34  ;;  %6230 = vrcp.f32 %v1912_v22  ;;  %5882 = vmatprep.mubr.msk.f32.mxu1 %vm33_vm0, %v1965_v42  ;;  %v1971_v50 = vmul.f32 %v6217_v41, %v7381_v57  ;;  %v8759_v22 = vld [vmem:[#allocation14_spill] sm:$0xff] }
 0x466   :  { %v6219_v2 = vpop.eup %6218  ;;  %5899 = vmatprep.subr.mxu0 %v8750_v53  ;;  %v1921_v6 = vpop.xlane.xlu1 %1920  ;;  %5883 = vmatmul.mubr.msk.f32.vlgmr.msra.gmra.mxu1 %vm33_vm0, %v1967_v43  ;;  %6232 = vrcp.f32 %v7528_v28  ;;  %v8760_v43 = vld [vmem:[#allocation44_spill] sm:$0xff] }
 0x467   :  { %5893 = vmatpush3.msra.mxu1 %v8750_v53  ;;  %v1969_v39 = vmul.f32 %v6219_v2, %v7388_v52  ;;  %6234 = vrcp.f32 %v1921_v6  ;;  %v8761_v6 = vld [vmem:[#allocation18_spill] sm:$0xff] }
 0x468   :  { %5894 = vmatprep.subr.mxu1 %v8751_v34  ;;  %v1918_v11 = vpop.xlane.xlu0 %1917  ;;  %v6221_v35 = vpop.eup %6220 }
 0x469   :  { %5895 = vmatpush3.msra.mxu1 %v8751_v34  ;;  %6236 = vrcp.f32 %v1918_v11  ;;  %5889 = vmatprep.mubr.msk.f32.mxu0 %vm33_vm0, %v1969_v39  ;;  %v1975_v62 = vmul.f32 %v6221_v35, %v7395_v36 }
 0x46a   :  { %v6223_v23 = vpop.eup %6222  ;;  %5906 = vmatprep.subr.mxu1 %v8750_v53  ;;  %v1927_v28 = vpop.xlane.xlu1 %1926  ;;  %5890 = vmatmul.mubr.msk.f32.vlgmr.msra.gmra.mxu0 %vm33_vm0, %v1971_v50  ;;  %6238 = vrcp.f32 %v7524_v44  ;;  %v8762_v50 = vld [vmem:[#allocation31_spill] sm:$0xff] }
 0x46b   :  { %5900 = vmatpush3.msra.mxu0 %v8750_v53  ;;  %v1973_v52 = vmul.f32 %v6223_v23, %v7402_v38  ;;  %6240 = vrcp.f32 %v1927_v28 }
 0x46c   :  { %5901 = vmatprep.subr.mxu0 %v8751_v34  ;;  %v1924_v57 = vpop.xlane.xlu0 %1923  ;;  %v6225_v63 = vpop.eup %6224 }
 0x46d   :  { %5902 = vmatpush3.msra.mxu0 %v8751_v34  ;;  %6242 = vrcp.f32 %v1924_v57  ;;  %5896 = vmatprep.mubr.msk.f32.mxu1 %vm33_vm0, %v1973_v52  ;;  %v1979_v45 = vmul.f32 %v6225_v63, %v7408_v29  ;;  %v8763_v52 = vld [vmem:[#allocation16_spill] sm:$0xff]  ;;  %v8764_v63 = vld [vmem:[#allocation30_spill] sm:$0xff] }
 0x46e   :  { %v6227_v27 = vpop.eup %6226  ;;  %5913 = vmatprep.subr.mxu0 %v8750_v53  ;;  %v7679_v44 = vpop.xlane.xlu1 %1123  ;;  %5897 = vmatmul.mubr.msk.f32.vlgmr.msra.gmra.mxu1 %vm33_vm0, %v1975_v62  ;;  %6244 = vrcp.f32 %v7534_v5 }
 0x46f   :  { %5907 = vmatpush3.msra.mxu1 %v8750_v53  ;;  %v1977_v38 = vmul.f32 %v6227_v27, %v7414_v47  ;;  %6246 = vrcp.f32 %v7538_v14 }
 0x470   :  { %5908 = vmatprep.subr.mxu1 %v8751_v34  ;;  %v7687_v36 = vpop.xlane.xlu0 %1120  ;;  %v6229_v7 = vpop.eup %6228  ;;  %6248 = vrcp.f32 %v7532_v61 }
 0x471   :  { %5909 = vmatpush3.msra.mxu1 %v8751_v34  ;;  %5903 = vmatprep.mubr.msk.f32.mxu0 %vm33_vm0, %v1977_v38  ;;  %6250 = vrcp.f32 %v7536_v30  ;;  %v1983_v61 = vmul.f32 %v6229_v7, %v7420_v13 }
 0x472   :  { %v6231_v5 = vpop.eup %6230  ;;  %5920 = vmatprep.subr.mxu1 %v8750_v53  ;;  %5904 = vmatmul.mubr.msk.f32.vlgmr.msra.gmra.mxu0 %vm33_vm0, %v1979_v45  ;;  %v7699_v47 = vpop.xlane.xlu1 %1129  ;;  %6252 = vrcp.f32 %v7542_v51 }
 0x473   :  { %5914 = vmatpush3.msra.mxu0 %v8750_v53  ;;  %v1981_v29 = vmul.f32 %v6231_v5, %v7426_v32  ;;  %v6233_v14 = vpop.eup %6232  ;;  %6254 = vrcp.f32 %v7546_v31 }
 0x474   :  { %5915 = vmatprep.subr.mxu0 %v8751_v34  ;;  %v7707_v24 = vpop.xlane.xlu0 %1126  ;;  %v6235_v15 = vpop.eup %6234  ;;  %6256 = vrcp.f32 %v7540_v0  ;;  %v7730_v0 = vadd.f32 %v5505_v58, %v8754_v56  ;;  %v8766_v58 = vld [vmem:[#allocation35_spill] sm:$0xff] }
 0x475   :  { %5916 = vmatpush3.msra.mxu0 %v8751_v34  ;;  %5910 = vmatprep.mubr.msk.f32.mxu1 %vm33_vm0, %v1981_v29  ;;  %v1987_v51 = vmul.f32 %v6235_v15, %v7432_v19  ;;  %6258 = vrcp.f32 %v7544_v3 }
 0x476   :  { %v6237_v30 = vpop.eup %6236  ;;  %5927 = vmatprep.subr.mxu0 %v7704_v37  ;;  %5911 = vmatmul.mubr.msk.f32.vlgmr.msra.gmra.mxu1 %vm33_vm0, %v1983_v61  ;;  %v7724_v31 = vpop.xlane.xlu1 %1135  ;;  %6260 = vrcp.f32 %v7550_v54  ;;  %v8755_v54 = vld [vmem:[#allocation29_spill] sm:$0xff]  ;;  %v8768_v61 = vld [vmem:[#allocation34_spill] sm:$0xff] }
 0x477   :  { %5921 = vmatpush3.msra.mxu1 %v8750_v53  ;;  %v1985_v32 = vmul.f32 %v6237_v30, %v7438_v20  ;;  %v6239_v1 = vpop.eup %6238  ;;  %v8753_v53 = vld [vmem:[#allocation12_spill] sm:$0xff]  ;;  %6262 = vrcp.f32 %v7554_v18 }
 0x478   :  { %5922 = vmatprep.subr.mxu1 %v8751_v34  ;;  %v7720_v13 = vpop.xlane.xlu0 %1132  ;;  %v6241_v59 = vpop.eup %6240  ;;  %v1168_v20 = vmul.f32 %v6233_v14, %v8753_v53  ;;  %v1170_v40 = vmul.f32 %v6239_v1, %v8755_v54  ;;  %6264 = vrcp.f32 %v7548_v33  ;;  %v8757_v33 = vld [vmem:[#allocation17_spill] sm:$0xff]  ;;  %v8767_v14 = vld [vmem:[#allocation32_spill] sm:$0xff]  ;;  %v8773_v54 = vld [vmem:[#allocation22_spill] sm:$0xff] }
 0x479   :  { %5923 = vmatpush3.msra.mxu1 %v8751_v34  ;;  %5917 = vmatprep.mubr.msk.f32.mxu0 %vm33_vm0, %v1985_v32  ;;  %v1991_v25 = vmul.f32 %v6241_v59, %v7444_v49  ;;  %6266 = vrcp.f32 %v7552_v9  ;;  %v8756_v49 = vld [vmem:[#allocation15_spill] sm:$0xff]  ;;  %v8769_v1 = vld [vmem:[#allocation37_spill] sm:$0xff]  ;;  %v8770_v59 = vld [vmem:[#allocation20_spill] sm:$0xff] }
 0x47a   :  { %v6243_v46 = vpop.eup %6242  ;;  %5934 = vmatprep.subr.mxu1 %v7704_v37  ;;  %5918 = vmatmul.mubr.msk.f32.vlgmr.msra.gmra.mxu0 %vm33_vm0, %v1987_v51  ;;  %v7750_v18 = vpop.xlane.xlu1 %1141  ;;  %6268 = vrcp.f32 %v7558_v55 }
 0x47b   :  { %5928 = vmatpush3.msra.mxu0 %v7704_v37  ;;  %5931 = vmatprep.mubr.msk.f32.mxu0 %vm33_vm0, %v1168_v20  ;;  %v1989_v19 = vmul.f32 %v6243_v46, %v7452_v12  ;;  %v6245_v3 = vpop.eup %6244  ;;  %6270 = vrcp.f32 %v7687_v36  ;;  %v8765_v36 = vld [vmem:[#allocation33_spill] sm:$0xff]  ;;  %v8771_v46 = vld [vmem:[#allocation36_spill] sm:$0xff] }
 0x47c   :  { %5929 = vmatprep.subr.mxu0 %v7730_v0  ;;  %v7740_v34 = vpop.xlane.xlu0 %1138  ;;  %v6247_v8 = vpop.eup %6246  ;;  %v1172_v10 = vmul.f32 %v6245_v3, %v8756_v49  ;;  %6272 = vrcp.f32 %v8760_v43  ;;  %v8772_v3 = vld [vmem:[#allocation19_spill] sm:$0xff] }
 0x47d   :  { %5930 = vmatpush3.msra.mxu0 %v7730_v0  ;;  %5924 = vmatprep.mubr.msk.f32.mxu1 %vm33_vm0, %v1989_v19  ;;  %v6249_v12 = vpop.eup %6248  ;;  %v1176_v60 = vmul.f32 %v6247_v8, %v8757_v33  ;;  %6274 = vrcp.f32 %v7679_v44 }
 0x47e   :  { %5941 = vmatprep.subr.mxu0 %v7704_v37  ;;  %5925 = vmatmul.mubr.msk.f32.vlgmr.msra.gmra.mxu1 %vm33_vm0, %v1991_v25  ;;  %v6251_v21 = vpop.eup %6250  ;;  %v1174_v26 = vmul.f32 %v6249_v12, %v8758_v4  ;;  %v1148_v2 = vpop.xlane.xlu1 %1147  ;;  %6276 = vrcp.f32 %v7707_v24 }
 0x47f   :  { %5932 = vmatmul.mubr.msk.f32.vlgmr.msra.gmra.mxu0 %vm33_vm0, %v1170_v40  ;;  %5935 = vmatpush3.msra.mxu1 %v7704_v37  ;;  %v6253_v9 = vpop.eup %6252  ;;  %v1178_v55 = vmul.f32 %v6251_v21, %v8759_v22  ;;  %6278 = vrcp.f32 %v7720_v13  ;;  %v8775_v21 = vld [vmem:[#allocation21_spill] sm:$0xff] }
 0x480   :  { %5942 = vmatpush3.msra.mxu0 %v7704_v37  ;;  %5936 = vmatprep.subr.mxu1 %v7730_v0  ;;  %v1145_v16 = vpop.xlane.xlu0 %1144  ;;  %v6255_v42 = vpop.eup %6254  ;;  %v1180_v39 = vmul.f32 %v6253_v9, %v8761_v6  ;;  %6280 = vrcp.f32 %v7699_v47  ;;  %v8779_v6 = vld [vmem:[#allocation38_spill] sm:$0xff] }
 0x481   :  { %5938 = vmatprep.mubr.msk.f32.mxu1 %vm33_vm0, %v1172_v10  ;;  %5943 = vmatprep.subr.mxu0 %v7730_v0  ;;  %v6257_v41 = vpop.eup %6256  ;;  %v1184_v35 = vmul.f32 %v6255_v42, %v8762_v50  ;;  %6282 = vrcp.f32 %v7724_v31  ;;  %v8780_v50 = vld [vmem:[#allocation39_spill] sm:$0xff] }
 0x482   :  { %5945 = vmatprep.mubr.msk.f32.mxu0 %vm33_vm0, %v1176_v60  ;;  %5937 = vmatpush3.msra.mxu1 %v7730_v0  ;;  %v6259_v11 = vpop.eup %6258  ;;  %v1182_v57 = vmul.f32 %v6257_v41, %v8763_v52  ;;  %v1154_v38 = vpop.xlane.xlu1 %1153  ;;  %6284 = vrcp.f32 %v7740_v34 }
 0x483   :  { %5944 = vmatpush3.msra.mxu0 %v7730_v0  ;;  %5948 = vmatprep.subr.mxu1 %v7704_v37  ;;  %v6261_v28 = vpop.eup %6260  ;;  %v1186_v27 = vmul.f32 %v6259_v11, %v8764_v63  ;;  %6286 = vrcp.f32 %v1145_v16  ;;  %v8776_v16 = vld [vmem:[#allocation23_spill] sm:$0xff] }
 0x484   :  { %5955 = vmatprep.subr.mxu0 %v7704_v37  ;;  %5939 = vmatmul.mubr.msk.f32.vlgmr.msra.gmra.mxu1 %vm33_vm0, %v1174_v26  ;;  %v1151_v23 = vpop.xlane.xlu0 %1150  ;;  %v6263_v62 = vpop.eup %6262  ;;  %v1188_v45 = vmul.f32 %v6261_v28, %v8765_v36  ;;  %6288 = vrcp.f32 %v7750_v18  ;;  %v8774_v18 = vld [vmem:[#allocation24_spill] sm:$0xff]  ;;  %v8777_v26 = vld [vmem:[#allocation25_spill] sm:$0xff]  ;;  %v8781_v28 = vld [vmem:[#allocation6_spill] sm:$0xff] }
 0x485   :  { %5946 = vmatmul.mubr.msk.f32.vlgmr.msra.gmra.mxu0 %vm33_vm0, %v1178_v55  ;;  %5949 = vmatpush3.msra.mxu1 %v7704_v37  ;;  %v6265_v44 = vpop.eup %6264  ;;  %v1192_v5 = vmul.f32 %v6263_v62, %v8766_v58  ;;  %6290 = vrcp.f32 %v1148_v2  ;;  %v8778_v55 = vld [vmem:[#allocation26_spill] sm:$0xff]  ;;  %v5106_v52 = vsub.s32 3, %v8781_v28  ;;  %v8782_v62 = vld [vmem:[#allocation27_spill] sm:$0xff]  ;;  %v8786_v58 = vld [vmem:[#allocation41_spill] sm:$0xff] }
 0x486   :  { %5956 = vmatpush3.msra.mxu0 %v7704_v37  ;;  %5950 = vmatprep.subr.mxu1 %v7730_v0  ;;  %v6267_v7 = vpop.eup %6266  ;;  %v1190_v17 = vmul.f32 %v6265_v44, %v8767_v14  ;;  %v1160_v32 = vpop.xlane.xlu1 %1159  ;;  %6292 = vrcp.f32 %v1151_v23 }
 0x487   :  { %5952 = vmatprep.mubr.msk.f32.mxu1 %vm33_vm0, %v1180_v39  ;;  %5957 = vmatprep.subr.mxu0 %v7730_v0  ;;  %v6269_v29 = vpop.eup %6268  ;;  %v1194_v15 = vmul.f32 %v6267_v7, %v8768_v61  ;;  %v5195_v61 = vrot.slane %v8747_v48, %v5106_v52 }
 0x488   :  { %5959 = vmatprep.mubr.msk.f32.mxu0 %vm33_vm0, %v1184_v35  ;;  %5951 = vmatpush3.msra.mxu1 %v7730_v0  ;;  %v1157_v47 = vpop.xlane.xlu0 %1156  ;;  %v6271_v24 = vpop.eup %6270  ;;  %v1196_v13 = vmul.f32 %v6269_v29, %v8769_v1 }
 0x489   :  { %5958 = vmatpush3.msra.mxu0 %v7730_v0  ;;  %5962 = vmatprep.subr.mxu1 %v7704_v37  ;;  %v6273_v30 = vpop.eup %6272  ;;  %v1200_v31 = vmul.f32 %v6271_v24, %v8770_v59  ;;  %6294 = vrcp.f32 %v1157_v47  ;;  %v8787_v47 = vld [vmem:[#allocation7_spill] sm:$0xff] }
 0x48a   :  { %5969 = vmatprep.subr.mxu0 %v7704_v37  ;;  %5953 = vmatmul.mubr.msk.f32.vlgmr.msra.gmra.mxu1 %vm33_vm0, %v1182_v57  ;;  %v6275_v51 = vpop.eup %6274  ;;  %6296 = vrcp.f32 %v1154_v38  ;;  %v1198_v56 = vmul.f32 %v6273_v30, %v8771_v46  ;;  %v1166_v8 = vpop.xlane.xlu1 %1165  ;;  %v8784_v38 = vld [vmem:[#allocation43_spill] sm:$0xff]  ;;  %v5107_v29 = vrot.slane %v8787_v47, %v5106_v52 }
 0x48b   :  { %5960 = vmatmul.mubr.msk.f32.vlgmr.msra.gmra.mxu0 %vm33_vm0, %v1186_v27  ;;  %5963 = vmatpush3.msra.mxu1 %v7704_v37  ;;  %v6277_v20 = vpop.eup %6276  ;;  %v1202_v34 = vmul.f32 %v6275_v51, %v8772_v3  ;;  %v8783_v27 = vld [vmem:[#allocation28_spill] sm:$0xff] }
 0x48c   :  { %5970 = vmatpush3.msra.mxu0 %v7704_v37  ;;  %5964 = vmatprep.subr.mxu1 %v7730_v0  ;;  %v1163_v53 = vpop.xlane.xlu0 %1162  ;;  %v6279_v19 = vpop.eup %6278  ;;  %v1204_v40 = vmul.f32 %v6277_v20, %v8773_v54 }
 0x48d   :  { %5966 = vmatprep.mubr.msk.f32.mxu1 %vm33_vm0, %v1188_v45  ;;  %5971 = vmatprep.subr.mxu0 %v7730_v0  ;;  %6298 = vrcp.f32 %v1163_v53  ;;  %v6281_v25 = vpop.eup %6280  ;;  %v1208_v49 = vmul.f32 %v6279_v19, %v8774_v18  ;;  %v8785_v45 = vld [vmem:[#allocation40_spill] sm:$0xff] }
 0x48e   :  { %5973 = vmatprep.mubr.msk.f32.mxu0 %vm33_vm0, %v1192_v5  ;;  %5965 = vmatpush3.msra.mxu1 %v7730_v0  ;;  %6300 = vrcp.f32 %v1160_v32  ;;  %v6283_v12 = vpop.eup %6282  ;;  %v1206_v33 = vmul.f32 %v6281_v25, %v8775_v21  ;;  %v5128_v32 = vsub.s32 5, %v8781_v28 }
 0x48f   :  { %5972 = vmatpush3.msra.mxu0 %v7730_v0  ;;  %5976 = vmatprep.subr.mxu1 %v7704_v37  ;;  %v6285_v10 = vpop.eup %6284  ;;  %6302 = vrcp.f32 %v1166_v8  ;;  %v1210_v9 = vmul.f32 %v6283_v12, %v8776_v16 }
 0x490   :  { %5983 = vmatprep.subr.mxu0 %v7704_v37  ;;  %5967 = vmatmul.mubr.msk.f32.vlgmr.msra.gmra.mxu1 %vm33_vm0, %v1190_v17  ;;  %v6287_v60 = vpop.eup %6286  ;;  %v1212_v42 = vmul.f32 %v6285_v10, %v8777_v26  ;;  %v8788_v17 = vld [vmem:[#allocation42_spill] sm:$0xff]  ;;  %v5129_v1 = vrot.slane %v8787_v47, %v5128_v32 }
 0x491   :  { %5974 = vmatmul.mubr.msk.f32.vlgmr.msra.gmra.mxu0 %vm33_vm0, %v1194_v15  ;;  %5977 = vmatpush3.msra.mxu1 %v7704_v37  ;;  %v6289_v4 = vpop.eup %6288  ;;  %v1216_v43 = vmul.f32 %v6287_v60, %v8778_v55  ;;  %v5117_v15 = vsub.s32 4, %v8781_v28 }
 0x492   :  { %5984 = vmatpush3.msra.mxu0 %v7704_v37  ;;  %5978 = vmatprep.subr.mxu1 %v7730_v0  ;;  %v6291_v22 = vpop.eup %6290  ;;  %v1214_v39 = vmul.f32 %v6289_v4, %v8779_v6 }
 0x493   :  { %5980 = vmatprep.mubr.msk.f32.mxu1 %vm33_vm0, %v1196_v13  ;;  %5985 = vmatprep.subr.mxu0 %v7730_v0  ;;  %v6293_v41 = vpop.eup %6292  ;;  %v1218_v35 = vmul.f32 %v6291_v22, %v8780_v50  ;;  %v5118_v30 = vrot.slane %v8787_v47, %v5117_v15  ;;  %v5139_v13 = vsub.s32 6, %v8781_v28 }
 0x494   :  { %5987 = vmatprep.mubr.msk.f32.mxu0 %vm33_vm0, %v1200_v31  ;;  %5979 = vmatpush3.msra.mxu1 %v7730_v0  ;;  %v1220_v63 = vmul.f32 %v6293_v41, %v8782_v62  ;;  %v5427_v31 = vpop.xlane.xlu0 %5426 }
 0x495   :  { %5986 = vmatpush3.msra.mxu0 %v7730_v0  ;;  %5990 = vmatprep.subr.mxu1 %v7704_v37  ;;  %v5140_v51 = vrot.slane %v8787_v47, %v5139_v13  ;;  %v7893_v59 = vrot.slane %v8747_v48, %v5139_v13  ;;  %v5428_v53 = vrot.slane %v5427_v31, 4 }
 0x496   :  { %5997 = vmatprep.subr.mxu0 %v7704_v37  ;;  %5981 = vmatmul.mubr.msk.f32.vlgmr.msra.gmra.mxu1 %vm33_vm0, %v1198_v56  ;;  %v6295_v2 = vpop.eup %6294 }
 0x497   :  { %5988 = vmatmul.mubr.msk.f32.vlgmr.msra.gmra.mxu0 %vm33_vm0, %v1202_v34  ;;  %5991 = vmatpush3.msra.mxu1 %v7704_v37  ;;  %v6297_v11 = vpop.eup %6296  ;;  %v1224_v44 = vmul.f32 %v6295_v2, %v8783_v27  ;;  %v5429_v20 = vadd.f32 %v5428_v53, %v5427_v31  ;;  %v7943_v27 = vld [vmem:[%s8588_s7] ss:$0 sm:$0xff] }
 0x498   :  { %5998 = vmatpush3.msra.mxu0 %v7704_v37  ;;  %5992 = vmatprep.subr.mxu1 %v7730_v0  ;;  %v1222_v7 = vmul.f32 %v6297_v11, %v8785_v45 }
 0x499   :  { %5994 = vmatprep.mubr.msk.f32.mxu1 %vm33_vm0, %v1204_v40  ;;  %5999 = vmatprep.subr.mxu0 %v7730_v0  ;;  %v5430_v46 = vrot.slane %v5429_v20, 2 }
 0x49a   :  { %6001 = vmatprep.mubr.msk.f32.mxu0 %vm33_vm0, %v1208_v49  ;;  %5993 = vmatpush3.msra.mxu1 %v7730_v0  ;;  %v6299_v23 = vpop.eup %6298 }
 0x49b   :  { %6000 = vmatpush3.msra.mxu0 %v7730_v0  ;;  %6004 = vmatprep.subr.mxu1 %v7704_v37  ;;  %v6301_v57 = vpop.eup %6300  ;;  %v1228_v36 = vmul.f32 %v6299_v23, %v8784_v38  ;;  %v5431_v56 = vadd.f32 %v5430_v46, %v5429_v20 }
 0x49c   :  { %6011 = vmatprep.subr.mxu0 %v7704_v37  ;;  %5995 = vmatmul.mubr.msk.f32.vlgmr.msra.gmra.mxu1 %vm33_vm0, %v1206_v33  ;;  %v1226_v5 = vmul.f32 %v6301_v57, %v8786_v58  ;;  %v6303_v14 = vpop.eup %6302 }
 0x49d   :  { %6002 = vmatmul.mubr.msk.f32.vlgmr.msra.gmra.mxu0 %vm33_vm0, %v1210_v9  ;;  %6005 = vmatpush3.msra.mxu1 %v7704_v37  ;;  %v1230_v24 = vmul.f32 %v6303_v14, %v8788_v17  ;;  %v5432_v19 = vrot.slane %v5431_v56, 1 }
 0x49e   :  { %6012 = vmatpush3.msra.mxu0 %v7704_v37  ;;  %6006 = vmatprep.subr.mxu1 %v7730_v0 }
 0x49f   :  { %6008 = vmatprep.mubr.msk.f32.mxu1 %vm33_vm0, %v1212_v42  ;;  %6013 = vmatprep.subr.mxu0 %v7730_v0  ;;  %v5433_v3 = vadd.f32 %v5432_v19, %v5431_v56 }
 0x4a0   :  { %6015 = vmatprep.mubr.msk.f32.mxu0 %vm33_vm0, %v1216_v43  ;;  %6007 = vmatpush3.msra.mxu1 %v7730_v0 }
 0x4a1   :  { %6014 = vmatpush3.msra.mxu0 %v7730_v0  ;;  %6018 = vmatprep.subr.mxu1 %v7704_v37  ;;  %6039 = vpush %v5433_v3 }
 0x4a2   :  { %6025 = vmatprep.subr.mxu0 %v7704_v37  ;;  %6009 = vmatmul.mubr.msk.f32.vlgmr.msra.gmra.mxu1 %vm33_vm0, %v1214_v39 }
 0x4a3   :  { %6016 = vmatmul.mubr.msk.f32.vlgmr.msra.gmra.mxu0 %vm33_vm0, %v1218_v35  ;;  %6019 = vmatpush3.msra.mxu1 %v7704_v37 }
 0x4a4   :  { %6026 = vmatpush3.msra.mxu0 %v7704_v37  ;;  %6020 = vmatprep.subr.mxu1 %v7730_v0 }
 0x4a5   :  { %6022 = vmatprep.mubr.msk.f32.mxu1 %vm33_vm0, %v1220_v63  ;;  %6027 = vmatprep.subr.mxu0 %v7730_v0 }
 0x4a6   :  { %6021 = vmatpush3.msra.mxu1 %v7730_v0  ;;  %6028 = vmatpush3.msra.mxu0 %v7730_v0 }
 0x4a7   :  { %6029 = vmatprep.mubr.msk.f32.mxu0 %vm33_vm0, %v1224_v44  ;;  %6032 = vmatprep.subr.mxu1 %v7704_v37 }
 0x4a8   :  { %6023 = vmatmul.mubr.msk.f32.vlgmr.msra.gmra.mxu1 %vm33_vm0, %v1222_v7  ;;  %6030 = vmatmul.mubr.msk.f32.vlgmr.msra.gmra.mxu0 %vm33_vm0, %v1226_v5 }
 0x4a9   :  { %6033 = vmatpush3.msra.mxu1 %v7704_v37  ;;  %6036 = vmatprep.mubr.msk.f32.mxu1 %vm33_vm0, %v1228_v36  ;;  %v5206_v37 = vrot.slane %v8747_v48, %v5117_v15 }
 0x4aa   :  { %6034 = vmatprep.subr.mxu1 %v7730_v0  ;;  %5109 = vbcast.lane.b32.xlu1 %v5107_v29, 256 }
 0x4ab   :  { %6035 = vmatpush3.msra.mxu1 %v7730_v0  ;;  %5113 = vbcast.lane.b32.xlu0 %v5107_v29, 264  ;;  %v5217_v0 = vrot.slane %v8747_v48, %v5128_v32  ;;  %v8789_v29 = vld [vmem:[#allocation3_spill] sm:$0xff] }
 0x4ac   :  { %6037 = vmatmul.mubr.msk.f32.vlgmr.msra.gmra.mxu1 %vm33_vm0, %v1230_v24 }
 0x4ae   :  { %5197 = vbcast.lane.b32.xlu1 %v5195_v61, 256 }
 0x4af   :  { %5201 = vbcast.lane.b32.xlu0 %v5195_v61, 264 }
 0x4b2   :  { %5120 = vbcast.lane.b32.xlu1 %v5118_v30, 256 }
 0x4b3   :  { %5124 = vbcast.lane.b32.xlu0 %v5118_v30, 264 }
 0x4b6   :  { %5208 = vbcast.lane.b32.xlu1 %v5206_v37, 256 }
 0x4b7   :  { %5212 = vbcast.lane.b32.xlu0 %v5206_v37, 264  ;;  %v8790_v37 = vld [vmem:[#allocation2_spill] sm:$0xff] }
 0x4ba   :  { %5131 = vbcast.lane.b32.xlu1 %v5129_v1, 256 }
 0x4bb   :  { %5135 = vbcast.lane.b32.xlu0 %v5129_v1, 264 }
 0x4be   :  { %5219 = vbcast.lane.b32.xlu1 %v5217_v0, 256 }
 0x4bf   :  { %5223 = vbcast.lane.b32.xlu0 %v5217_v0, 264 }
 0x4c2   :  { %5142 = vbcast.lane.b32.xlu1 %v5140_v51, 256 }
 0x4c3   :  { %5146 = vbcast.lane.b32.xlu0 %v5140_v51, 264 }
 0x4c6   :  { %5230 = vbcast.lane.b32.xlu1 %v7893_v59, 256 }
 0x4d2   :  { %s6040_s7 = spop %6039 }
 0x502   :  { %v5821_v34 = vpop.f32.mrf.mxu1 }
 0x504   :  { %v2064_v25 = vpop.f32.mrf.mxu1 }
 0x506   :  { %v5828_v8 = vpop.f32.mrf.mxu1 }
 0x508   :  { %v2145_v40 = vpop.f32.mrf.mxu1 }
 0x50a   :  { %v5835_v54 = vpop.f32.mrf.mxu0 }
 0x50c   :  { %v2226_v12 = vpop.f32.mrf.mxu0 }
 0x50e   :  { %v5842_v18 = vpop.f32.mrf.mxu1 }
 0x510   :  { %v7896_v10 = vpop.f32.mrf.mxu1 }
 0x512   :  { %v5849_v49 = vpop.f32.mrf.mxu0 }
 0x514   :  { %v2388_v21 = vpop.f32.mrf.mxu0 }
 0x516   :  { %v7898_v33 = vpop.f32.mrf.mxu1 }
 0x518   :  { %v7902_v16 = vpop.f32.mrf.mxu1 }
 0x51a   :  { %v7900_v60 = vpop.f32.mrf.mxu0 }
 0x51c   :  { %v7904_v9 = vpop.f32.mrf.mxu0 }
 0x51e   :  { %v7906_v4 = vpop.f32.mrf.mxu1 }
 0x520   :  { %v7910_v42 = vpop.f32.mrf.mxu1 }
 0x522   :  { %v7908_v26 = vpop.f32.mrf.mxu0 }
 0x524   :  { %v7912_v22 = vpop.f32.mrf.mxu0 }
 0x526   :  { %v7914_v55 = vpop.f32.mrf.mxu1 }
 0x528   :  { %v7918_v41 = vpop.f32.mrf.mxu1 }
 0x52a   :  { %v7916_v43 = vpop.f32.mrf.mxu0 }
 0x52c   :  { %v7920_v2 = vpop.f32.mrf.mxu0 }
 0x52e   :  { %v7922_v6 = vpop.f32.mrf.mxu1 }
 0x530   :  { %v7926_v11 = vpop.f32.mrf.mxu1 }
 0x532   :  { %v7924_v39 = vpop.f32.mrf.mxu0 }
 0x534   :  { %v7928_v50 = vpop.f32.mrf.mxu0 }
 0x536   :  { %v7930_v35 = vpop.f32.mrf.mxu1 }
 0x538   :  { %v7934_v52 = vpop.f32.mrf.mxu1 }
 0x53a   :  { %v7932_v23 = vpop.f32.mrf.mxu0 }
 0x53c   :  { %v7936_v57 = vpop.f32.mrf.mxu0 }
 0x53e   :  { %v7938_v62 = vpop.f32.mrf.mxu1 }
 0x53f   :  { %v5933_v63 = vpop.f32.mrf.mxu0 }
 0x540   :  { %v3366_v44 = vadd.f32 %v5933_v63, %v5821_v34  ;;  %v7945_v38 = vpop.f32.mrf.mxu1 }
 0x541   :  { %v3360_v36 = vpop.f32.mrf.mxu0 }
 0x542   :  { %v4592_v45 = vadd.f32 %v7943_v27, %v3366_v44  ;;  %v3361_v7 = vadd.f32 %v3360_v36, %v2064_v25 }
 0x544   :  { %v4591_v58 = vadd.f32 %v7943_v27, %v3361_v7  ;;  %v5940_v5 = vpop.f32.mrf.mxu1  ;;  %v7950_v14 = vadd.f32 %v4592_v45, %v8789_v29 }
 0x545   :  { %v3447_v17 = vadd.f32 %v5940_v5, %v5828_v8  ;;  %v5947_v24 = vpop.f32.mrf.mxu0 }
 0x546   :  { %v3528_v61 = vadd.f32 %v5947_v24, %v5835_v54  ;;  %v3441_v15 = vpop.f32.mrf.mxu1  ;;  %v4658_v30 = vsel %vm33_vm0, %v7950_v14, 0.0  ;;  %v7955_v32 = vadd.f32 %v4591_v58, %v8790_v37 }
 0x547   :  { %v3442_v1 = vadd.f32 %v3441_v15, %v2145_v40  ;;  %v3522_v0 = vpop.f32.mrf.mxu0  ;;  %4659 = vadd.xlane.f32.xlu1 %v4658_v30  ;;  %v4594_v13 = vadd.f32 %v7943_v27, %v3447_v17 }
 0x548   :  { %v4596_v51 = vadd.f32 %v7943_v27, %v3528_v61  ;;  %v3523_v31 = vadd.f32 %v3522_v0, %v2226_v12  ;;  %v4655_v53 = vsel %vm33_vm0, %v7955_v32, 0.0 }
 0x549   :  { %v4593_v20 = vadd.f32 %v7943_v27, %v3442_v1  ;;  %4656 = vadd.xlane.f32.xlu0 %v4655_v53  ;;  %v7972_v12 = vadd.f32 %v4594_v13, %v8789_v29 }
 0x54a   :  { %v4595_v46 = vadd.f32 %v7943_v27, %v3523_v31  ;;  %v5954_v56 = vpop.f32.mrf.mxu1  ;;  %v7964_v19 = vadd.f32 %v4596_v51, %v8789_v29 }
 0x54b   :  { %v3609_v3 = vadd.f32 %v5954_v56, %v5842_v18  ;;  %v5961_v34 = vpop.f32.mrf.mxu0  ;;  %v7975_v44 = vadd.f32 %v4593_v20, %v8790_v37  ;;  %v4664_v17 = vsel %vm33_vm0, %v7972_v12, 0.0 }
 0x54c   :  { %v3690_v25 = vadd.f32 %v5961_v34, %v5849_v49  ;;  %v3603_v8 = vpop.f32.mrf.mxu1  ;;  %v4670_v54 = vsel %vm33_vm0, %v7964_v19, 0.0  ;;  %v7969_v40 = vadd.f32 %v4595_v46, %v8790_v37 }
 0x54d   :  { %v3684_v63 = vpop.f32.mrf.mxu0  ;;  %4671 = vadd.xlane.f32.xlu1 %v4670_v54  ;;  %v3604_v49 = vadd.f32 %v3603_v8, %v7896_v10  ;;  %v4598_v7 = vadd.f32 %v7943_v27, %v3609_v3  ;;  %v4661_v30 = vsel %vm33_vm0, %v7975_v44, 0.0 }
 0x54e   :  { %v4600_v36 = vadd.f32 %v7943_v27, %v3690_v25  ;;  %v3685_v18 = vadd.f32 %v3684_v63, %v2388_v21  ;;  %v4667_v45 = vsel %vm33_vm0, %v7969_v40, 0.0 }
 0x54f   :  { %4668 = vadd.xlane.f32.xlu0 %v4667_v45  ;;  %v4597_v21 = vadd.f32 %v7943_v27, %v3604_v49  ;;  %v7996_v13 = vadd.f32 %v4598_v7, %v8789_v29 }
 0x550   :  { %v4599_v58 = vadd.f32 %v7943_v27, %v3685_v18  ;;  %v5968_v5 = vpop.f32.mrf.mxu1  ;;  %v7986_v24 = vadd.f32 %v4600_v36, %v8789_v29 }
 0x551   :  { %v5975_v61 = vpop.f32.mrf.mxu0  ;;  %4665 = vadd.xlane.f32.xlu1 %v4664_v17  ;;  %v3771_v51 = vadd.f32 %v5968_v5, %v7898_v33  ;;  %v8008_v34 = vadd.f32 %v4597_v21, %v8790_v37  ;;  %v4676_v54 = vsel %vm33_vm0, %v7996_v13, 0.0 }
 0x552   :  { %v3852_v10 = vadd.f32 %v5975_v61, %v7900_v60  ;;  %v3765_v15 = vpop.f32.mrf.mxu1  ;;  %v7993_v1 = vadd.f32 %v4599_v58, %v8790_v37  ;;  %v4682_v60 = vsel %vm33_vm0, %v7986_v24, 0.0 }
 0x553   :  { %v3846_v0 = vpop.f32.mrf.mxu0  ;;  %4662 = vadd.xlane.f32.xlu0 %v4661_v30  ;;  %v3766_v46 = vadd.f32 %v3765_v15, %v7902_v16  ;;  %v4602_v25 = vadd.f32 %v7943_v27, %v3771_v51  ;;  %v4673_v49 = vsel %vm33_vm0, %v8008_v34, 0.0 }
 0x554   :  { %v4604_v31 = vadd.f32 %v7943_v27, %v3852_v10  ;;  %v3847_v53 = vadd.f32 %v3846_v0, %v7904_v9  ;;  %v4679_v3 = vsel %vm33_vm0, %v7993_v1, 0.0 }
 0x555   :  { %4683 = vadd.xlane.f32.xlu1 %v4682_v60  ;;  %v4601_v36 = vadd.f32 %v7943_v27, %v3766_v46  ;;  %v8028_v5 = vadd.f32 %v4602_v25, %v8789_v29 }
 0x556   :  { %v4603_v20 = vadd.f32 %v7943_v27, %v3847_v53  ;;  %v5982_v56 = vpop.f32.mrf.mxu1  ;;  %v8015_v63 = vadd.f32 %v4604_v31, %v8789_v29 }
 0x557   :  { %v5989_v33 = vpop.f32.mrf.mxu0  ;;  %4680 = vadd.xlane.f32.xlu0 %v4679_v3  ;;  %v8035_v10 = vadd.f32 %v4601_v36, %v8790_v37  ;;  %v3933_v15 = vadd.f32 %v5982_v56, %v7906_v4  ;;  %v4688_v53 = vsel %vm33_vm0, %v8028_v5, 0.0 }
 0x558   :  { %v4014_v9 = vadd.f32 %v5989_v33, %v7908_v26  ;;  %v3927_v8 = vpop.f32.mrf.mxu1  ;;  %v8022_v45 = vadd.f32 %v4603_v20, %v8790_v37  ;;  %v4694_v58 = vsel %vm33_vm0, %v8015_v63, 0.0 }
 0x559   :  { %v4008_v16 = vpop.f32.mrf.mxu0  ;;  %4677 = vadd.xlane.f32.xlu1 %v4676_v54  ;;  %v3928_v60 = vadd.f32 %v3927_v8, %v7910_v42  ;;  %v4685_v4 = vsel %vm33_vm0, %v8035_v10, 0.0 }
 0x55a   :  { %v4009_v18 = vadd.f32 %v4008_v16, %v7912_v22  ;;  %v4608_v26 = vadd.f32 %v7943_v27, %v4014_v9  ;;  %v4691_v21 = vsel %vm33_vm0, %v8022_v45, 0.0 }
 0x55b   :  { %4674 = vadd.xlane.f32.xlu0 %v4673_v49  ;;  %v4605_v9 = vadd.f32 %v7943_v27, %v3928_v60 }
 0x55c   :  { %v5996_v7 = vpop.f32.mrf.mxu1  ;;  %v4607_v22 = vadd.f32 %v7943_v27, %v4009_v18 }
 0x55d   :  { %v6003_v17 = vpop.f32.mrf.mxu0  ;;  %4695 = vadd.xlane.f32.xlu1 %v4694_v58  ;;  %v4095_v33 = vadd.f32 %v5996_v7, %v7914_v55 }
 0x55e   :  { %v4176_v61 = vadd.f32 %v6003_v17, %v7916_v43  ;;  %v4089_v30 = vpop.f32.mrf.mxu1  ;;  %v8043_v43 = vadd.f32 %v4608_v26, %v8789_v29  ;;  %v8050_v46 = vadd.f32 %v4607_v22, %v8790_v37  ;;  %v8078_v22 = vadd.f32 %v4605_v9, %v8790_v37 }
 0x55f   :  { %v4170_v0 = vpop.f32.mrf.mxu0  ;;  %4692 = vadd.xlane.f32.xlu0 %v4691_v21  ;;  %v4090_v8 = vadd.f32 %v4089_v30, %v7918_v41  ;;  %v4610_v55 = vadd.f32 %v7943_v27, %v4095_v33 }
 0x560   :  { %v4612_v51 = vadd.f32 %v7943_v27, %v4176_v61  ;;  %v4171_v31 = vadd.f32 %v4170_v0, %v7920_v2  ;;  %v4606_v2 = vadd.f32 %v7943_v27, %v3933_v15  ;;  %v4706_v25 = vsel %vm33_vm0, %v8043_v43, 0.0 }
 0x561   :  { %4689 = vadd.xlane.f32.xlu1 %v4688_v53  ;;  %v4703_v54 = vsel %vm33_vm0, %v8050_v46, 0.0  ;;  %v4609_v41 = vadd.f32 %v7943_v27, %v4090_v8  ;;  %v8085_v0 = vadd.f32 %v4610_v55, %v8789_v29 }
 0x562   :  { %v4611_v20 = vadd.f32 %v7943_v27, %v4171_v31  ;;  %v6010_v56 = vpop.f32.mrf.mxu1  ;;  %v8057_v42 = vadd.f32 %v4612_v51, %v8789_v29  ;;  %v8071_v7 = vadd.f32 %v4606_v2, %v8789_v29  ;;  %v4697_v31 = vsel %vm33_vm0, %v8078_v22, 0.0 }
 0x563   :  { %v6017_v3 = vpop.f32.mrf.mxu0  ;;  %4686 = vadd.xlane.f32.xlu0 %v4685_v4  ;;  %v8092_v53 = vadd.f32 %v4609_v41, %v8790_v37  ;;  %v8123_v41 = vpop.permute.xlu1 %5076 }
 0x564   :  { %v8064_v16 = vadd.f32 %v4611_v20, %v8790_v37  ;;  %v4251_v36 = vpop.f32.mrf.mxu1  ;;  %v4338_v49 = vadd.f32 %v6017_v3, %v7924_v39  ;;  %v4718_v26 = vsel %vm33_vm0, %v8057_v42, 0.0  ;;  %v4257_v39 = vadd.f32 %v6010_v56, %v7922_v6 }
 0x565   :  { %4707 = vadd.xlane.f32.xlu1 %v4706_v25  ;;  %v4332_v18 = vpop.f32.mrf.mxu0  ;;  %v4700_v30 = vsel %vm33_vm0, %v8071_v7, 0.0  ;;  %v4712_v56 = vsel %vm33_vm0, %v8085_v0, 0.0  ;;  %v4709_v33 = vsel %vm33_vm0, %v8092_v53, 0.0 }
 0x566   :  { %v4333_v58 = vadd.f32 %v4332_v18, %v7928_v50  ;;  %v4715_v17 = vsel %vm33_vm0, %v8064_v16, 0.0  ;;  %v4616_v15 = vadd.f32 %v7943_v27, %v4338_v49  ;;  %v4252_v50 = vadd.f32 %v4251_v36, %v7926_v11 }
 0x567   :  { %4704 = vadd.xlane.f32.xlu0 %v4703_v54  ;;  %v4614_v20 = vadd.f32 %v7943_v27, %v4257_v39 }
 0x568   :  { %v6024_v61 = vpop.f32.mrf.mxu1  ;;  %v6031_v21 = vpop.f32.mrf.mxu0  ;;  %v4615_v51 = vadd.f32 %v7943_v27, %v4333_v58  ;;  %v8099_v11 = vadd.f32 %v4616_v15, %v8789_v29  ;;  %v4613_v3 = vadd.f32 %v7943_v27, %v4252_v50 }
 0x569   :  { %4719 = vadd.xlane.f32.xlu1 %v4718_v26  ;;  %v4500_v4 = vadd.f32 %v6031_v21, %v7932_v23  ;;  %v4419_v23 = vadd.f32 %v6024_v61, %v7930_v35  ;;  %v8113_v36 = vadd.f32 %v4614_v20, %v8789_v29 }
 0x56a   :  { %v4413_v6 = vpop.f32.mrf.mxu1  ;;  %v4494_v60 = vpop.f32.mrf.mxu0  ;;  %v8106_v25 = vadd.f32 %v4615_v51, %v8790_v37  ;;  %v4730_v54 = vsel %vm33_vm0, %v8099_v11, 0.0  ;;  %v8120_v49 = vadd.f32 %v4613_v3, %v8790_v37 }
 0x56b   :  { %4716 = vadd.xlane.f32.xlu0 %v4715_v17  ;;  %v4495_v2 = vadd.f32 %v4494_v60, %v7936_v57  ;;  %v4620_v8 = vadd.f32 %v7943_v27, %v4500_v4  ;;  %v4414_v57 = vadd.f32 %v4413_v6, %v7934_v52  ;;  %v4618_v26 = vadd.f32 %v7943_v27, %v4419_v23 }
 0x56c   :  { %v6038_v9 = vpop.f32.mrf.mxu1  ;;  %v4727_v55 = vsel %vm33_vm0, %v8106_v25, 0.0  ;;  %v4724_v17 = vsel %vm33_vm0, %v8113_v36, 0.0  ;;  %v4721_v39 = vsel %vm33_vm0, %v8120_v49, 0.0 }
 0x56d   :  { %4701 = vadd.xlane.f32.xlu1 %v4700_v30  ;;  %v4619_v18 = vadd.f32 %v7943_v27, %v4495_v2  ;;  %v4581_v58 = vadd.f32 %v6038_v9, %v7938_v62  ;;  %v8129_v52 = vadd.f32 %v4620_v8, %v8789_v29  ;;  %v4617_v61 = vadd.f32 %v7943_v27, %v4414_v57 }
 0x56e   :  { %v4575_v35 = vpop.f32.mrf.mxu1  ;;  %v8142_v50 = vadd.f32 %v4618_v26, %v8789_v29  ;;  %v8657_v9 = vsub.s32 7, %v8781_v28 }
 0x56f   :  { %4698 = vadd.xlane.f32.xlu0 %v4697_v31  ;;  %v4576_v21 = vadd.f32 %v4575_v35, %v7945_v38  ;;  %v8136_v15 = vadd.f32 %v4619_v18, %v8790_v37  ;;  %v4622_v62 = vadd.f32 %v7943_v27, %v4581_v58  ;;  %v4742_v30 = vsel %vm33_vm0, %v8129_v52, 0.0  ;;  %v8145_v31 = vpop.permute.xlu1 %5087 }
 0x570   :  { %v8150_v6 = vadd.f32 %v4617_v61, %v8790_v37  ;;  %v4736_v60 = vsel %vm33_vm0, %v8142_v50, 0.0  ;;  %v8180_v8 = vrot.slane %v8787_v47, %v8657_v9 }
 0x571   :  { %4713 = vadd.xlane.f32.xlu1 %v4712_v56  ;;  %v4621_v51 = vadd.f32 %v7943_v27, %v4576_v21  ;;  %v4739_v38 = vsel %vm33_vm0, %v8136_v15, 0.0  ;;  %v8155_v20 = vadd.f32 %v4622_v62, %v8789_v29 }
 0x572   :  { %v4733_v4 = vsel %vm33_vm0, %v8150_v6, 0.0 }
 0x573   :  { %4710 = vadd.xlane.f32.xlu0 %v4709_v33  ;;  %v8160_v27 = vadd.f32 %v4621_v51, %v8790_v37  ;;  %v8162_v56 = vpop.permute.xlu1 %5091  ;;  %v4748_v3 = vsel %vm33_vm0, %v8155_v20, 0.0  ;;  %v8170_v33 = vpop.permute.xlu0 %5080 }
 0x575   :  { %4731 = vadd.xlane.f32.xlu1 %v4730_v54  ;;  %v4745_v2 = vsel %vm33_vm0, %v8160_v27, 0.0 }
 0x577   :  { %4728 = vadd.xlane.f32.xlu0 %v4727_v55  ;;  %v8168_v29 = vpop.permute.xlu1 %5164  ;;  %v8175_v37 = vpop.permute.xlu0 %5168 }
 0x578   :  { %8791 = vst [vmem:[#allocation9_spill] sm:$0xff] %v8168_v29 }
 0x579   :  { %4725 = vadd.xlane.f32.xlu1 %v4724_v17 }
 0x57b   :  { %4722 = vadd.xlane.f32.xlu0 %v4721_v39  ;;  %v8173_v23 = vpop.permute.xlu1 %5175  ;;  %v8185_v57 = vpop.permute.xlu0 %5179 }
 0x57c   :  { %8792 = vst [vmem:[#allocation8_spill] sm:$0xff] %v8173_v23  ;;  %8793 = vst [vmem:[#allocation10_spill] sm:$0xff] %v8185_v57 }
 0x57d   :  { %4743 = vadd.xlane.f32.xlu1 %v4742_v30 }
 0x57f   :  { %4740 = vadd.xlane.f32.xlu0 %v4739_v38  ;;  %v8182_v54 = vpop.permute.xlu1 %5098  ;;  %v8190_v55 = vpop.permute.xlu0 %5102 }
 0x581   :  { %4737 = vadd.xlane.f32.xlu1 %v4736_v60 }
 0x583   :  { %4734 = vadd.xlane.f32.xlu0 %v4733_v4  ;;  %v8187_v18 = vpop.permute.xlu1 %5186  ;;  %v8194_v26 = vpop.permute.xlu0 %5190 }
 0x584   :  { %8794 = vst [vmem:[#allocation11_spill] sm:$0xff] %v8187_v18  ;;  %8795 = vst [vmem:[#allocation4_spill] sm:$0xff] %v8194_v26 }
 0x585   :  { %4749 = vadd.xlane.f32.xlu1 %v4748_v3 }
 0x587   :  { %4746 = vadd.xlane.f32.xlu0 %v4745_v2  ;;  %v8192_v35 = vpop.permute.xlu1 %5109  ;;  %v8198_v47 = vpop.permute.xlu0 %5113 }
 0x58b   :  { %v8196_v58 = vpop.permute.xlu1 %5197  ;;  %v8202_v61 = vpop.permute.xlu0 %5201 }
 0x58c   :  { %8796 = vst [vmem:[#allocation12_spill] sm:$0xff] %v8196_v58  ;;  %8797 = vst [vmem:[#allocation5_spill] sm:$0xff] %v8202_v61 }
 0x58f   :  { %v8200_v17 = vpop.permute.xlu1 %5120  ;;  %v8206_v39 = vpop.permute.xlu0 %5124 }
 0x593   :  { %v8204_v21 = vpop.permute.xlu1 %5208 }
 0x594   :  { %8798 = vst [vmem:[#allocation29_spill] sm:$0xff] %v8204_v21 }
 0x596   :  { %5153 = vbcast.lane.b32.xlu1 %v8180_v8, 256 }
 0x597   :  { %v8208_v62 = vpop.permute.xlu1 %5131 }
 0x59b   :  { %v8212_v30 = vpop.permute.xlu1 %5219 }
 0x59c   :  { %8800 = vst [vmem:[#allocation17_spill] sm:$0xff] %v8212_v30 }
 0x59d   :  { %5234 = vbcast.lane.b32.xlu0 %v7893_v59, 264  ;;  %v8210_v59 = vpop.permute.xlu0 %5212 }
 0x59e   :  { %8799 = vst [vmem:[#allocation15_spill] sm:$0xff] %v8210_v59 }
 0x59f   :  { %v8216_v38 = vpop.permute.xlu1 %5142 }
 0x5a1   :  { %v8214_v51 = vpop.permute.xlu0 %5135 }
 0x5a3   :  { %v8220_v4 = vpop.permute.xlu1 %5230 }
 0x5a4   :  { %8802 = vst [vmem:[#allocation14_spill] sm:$0xff] %v8220_v4 }
 0x5a5   :  { %v8218_v60 = vpop.permute.xlu0 %5223 }
 0x5a6   :  { %8801 = vst [vmem:[#allocation13_spill] sm:$0xff] %v8218_v60 }
 0x5a9   :  { %v8222_v3 = vpop.permute.xlu0 %5146 }
 0x5d0   :  { %v4660_v2 = vpop.xlane.xlu1 %4659 }
 0x5d1   :  { %v4752_v9 = vmul.f32 0.0625, %v4660_v2 }
 0x5d2   :  { %v4657_v58 = vpop.xlane.xlu0 %4656 }
 0x5d3   :  { %v8225_v61 = vsub.f32 %v7950_v14, %v4752_v9  ;;  %v4751_v21 = vmul.f32 0.0625, %v4657_v58 }
 0x5d5   :  { %v8228_v59 = vsub.f32 %v7955_v32, %v4751_v21  ;;  %v4816_v30 = vmul.f32 %v8225_v61, %v8225_v61 }
 0x5d6   :  { %v4672_v23 = vpop.xlane.xlu1 %4671 }
 0x5d7   :  { %v4756_v57 = vmul.f32 0.0625, %v4672_v23  ;;  %v4850_v60 = vsel %vm33_vm0, %v4816_v30, 0.0  ;;  %v4815_v4 = vmul.f32 %v8228_v59, %v8228_v59 }
 0x5d8   :  { %v4669_v18 = vpop.xlane.xlu0 %4668  ;;  %4851 = vadd.xlane.f32.xlu0 %v4850_v60 }
 0x5d9   :  { %v8236_v2 = vsub.f32 %v7964_v19, %v4756_v57  ;;  %v4755_v14 = vmul.f32 0.0625, %v4669_v18  ;;  %v4847_v9 = vsel %vm33_vm0, %v4815_v4, 0.0 }
 0x5da   :  { %v4666_v32 = vpop.xlane.xlu1 %4665  ;;  %4848 = vadd.xlane.f32.xlu1 %v4847_v9 }
 0x5db   :  { %v8240_v58 = vsub.f32 %v7969_v40, %v4755_v14  ;;  %v4754_v21 = vmul.f32 0.0625, %v4666_v32  ;;  %v4820_v23 = vmul.f32 %v8236_v2, %v8236_v2 }
 0x5dc   :  { %v4663_v30 = vpop.xlane.xlu0 %4662 }
 0x5dd   :  { %v8245_v26 = vsub.f32 %v7972_v12, %v4754_v21  ;;  %v4753_v60 = vmul.f32 0.0625, %v4663_v30  ;;  %v4862_v19 = vsel %vm33_vm0, %v4820_v23, 0.0  ;;  %v4819_v57 = vmul.f32 %v8240_v58, %v8240_v58 }
 0x5de   :  { %v4684_v18 = vpop.xlane.xlu1 %4683  ;;  %4863 = vadd.xlane.f32.xlu0 %v4862_v19 }
 0x5df   :  { %v8251_v4 = vsub.f32 %v7975_v44, %v4753_v60  ;;  %v4760_v40 = vmul.f32 0.0625, %v4684_v18  ;;  %v4859_v14 = vsel %vm33_vm0, %v4819_v57, 0.0  ;;  %v4818_v9 = vmul.f32 %v8245_v26, %v8245_v26 }
 0x5e0   :  { %4860 = vadd.xlane.f32.xlu1 %v4859_v14  ;;  %v4681_v12 = vpop.xlane.xlu0 %4680 }
 0x5e1   :  { %v8257_v32 = vsub.f32 %v7986_v24, %v4760_v40  ;;  %v4759_v21 = vmul.f32 0.0625, %v4681_v12  ;;  %v4856_v23 = vsel %vm33_vm0, %v4818_v9, 0.0  ;;  %v4817_v30 = vmul.f32 %v8251_v4, %v8251_v4 }
 0x5e2   :  { %v4678_v19 = vpop.xlane.xlu1 %4677  ;;  %4857 = vadd.xlane.f32.xlu0 %v4856_v23 }
 0x5e3   :  { %v8263_v44 = vsub.f32 %v7993_v1, %v4759_v21  ;;  %v4758_v60 = vmul.f32 0.0625, %v4678_v19  ;;  %v4853_v57 = vsel %vm33_vm0, %v4817_v30, 0.0  ;;  %v4824_v18 = vmul.f32 %v8257_v32, %v8257_v32 }
 0x5e4   :  { %4854 = vadd.xlane.f32.xlu1 %v4853_v57  ;;  %v4675_v24 = vpop.xlane.xlu0 %4674 }
 0x5e5   :  { %v8269_v40 = vsub.f32 %v7996_v13, %v4758_v60  ;;  %v4757_v14 = vmul.f32 0.0625, %v4675_v24  ;;  %v4874_v9 = vsel %vm33_vm0, %v4824_v18, 0.0  ;;  %v4823_v12 = vmul.f32 %v8263_v44, %v8263_v44 }
 0x5e6   :  { %v4696_v23 = vpop.xlane.xlu1 %4695  ;;  %4875 = vadd.xlane.f32.xlu0 %v4874_v9 }
 0x5e7   :  { %v8275_v1 = vsub.f32 %v8008_v34, %v4757_v14  ;;  %v4764_v21 = vmul.f32 0.0625, %v4696_v23  ;;  %v4871_v30 = vsel %vm33_vm0, %v4823_v12, 0.0  ;;  %v4822_v19 = vmul.f32 %v8269_v40, %v8269_v40 }
 0x5e8   :  { %4872 = vadd.xlane.f32.xlu1 %v4871_v30  ;;  %v4693_v13 = vpop.xlane.xlu0 %4692 }
 0x5e9   :  { %v8281_v60 = vsub.f32 %v8015_v63, %v4764_v21  ;;  %v4763_v57 = vmul.f32 0.0625, %v4693_v13  ;;  %v4868_v18 = vsel %vm33_vm0, %v4822_v19, 0.0  ;;  %v4821_v24 = vmul.f32 %v8275_v1, %v8275_v1 }
 0x5ea   :  { %v4690_v9 = vpop.xlane.xlu1 %4689  ;;  %4869 = vadd.xlane.f32.xlu0 %v4868_v18 }
 0x5eb   :  { %v8287_v34 = vsub.f32 %v8022_v45, %v4763_v57  ;;  %v4762_v14 = vmul.f32 0.0625, %v4690_v9  ;;  %v4865_v12 = vsel %vm33_vm0, %v4821_v24, 0.0  ;;  %v4828_v23 = vmul.f32 %v8281_v60, %v8281_v60 }
 0x5ec   :  { %4866 = vadd.xlane.f32.xlu1 %v4865_v12  ;;  %v4687_v63 = vpop.xlane.xlu0 %4686 }
 0x5ed   :  { %v8293_v21 = vsub.f32 %v8028_v5, %v4762_v14  ;;  %v4761_v30 = vmul.f32 0.0625, %v4687_v63  ;;  %v4886_v19 = vsel %vm33_vm0, %v4828_v23, 0.0  ;;  %v4827_v13 = vmul.f32 %v8287_v34, %v8287_v34 }
 0x5ee   :  { %v4708_v18 = vpop.xlane.xlu1 %4707  ;;  %4887 = vadd.xlane.f32.xlu0 %v4886_v19 }
 0x5ef   :  { %v8299_v45 = vsub.f32 %v8035_v10, %v4761_v30  ;;  %v4768_v57 = vmul.f32 0.0625, %v4708_v18  ;;  %v4883_v24 = vsel %vm33_vm0, %v4827_v13, 0.0  ;;  %v4826_v9 = vmul.f32 %v8293_v21, %v8293_v21 }
 0x5f0   :  { %4884 = vadd.xlane.f32.xlu1 %v4883_v24  ;;  %v4705_v5 = vpop.xlane.xlu0 %4704 }
 0x5f1   :  { %v8305_v14 = vsub.f32 %v8043_v43, %v4768_v57  ;;  %v4767_v12 = vmul.f32 0.0625, %v4705_v5  ;;  %v4880_v23 = vsel %vm33_vm0, %v4826_v9, 0.0  ;;  %v4825_v63 = vmul.f32 %v8299_v45, %v8299_v45 }
 0x5f2   :  { %v4720_v19 = vpop.xlane.xlu1 %4719  ;;  %4881 = vadd.xlane.f32.xlu0 %v4880_v23 }
 0x5f3   :  { %v8311_v10 = vsub.f32 %v8050_v46, %v4767_v12  ;;  %v4877_v30 = vsel %vm33_vm0, %v4825_v63, 0.0  ;;  %v4832_v13 = vmul.f32 %v8305_v14, %v8305_v14  ;;  %v4772_v18 = vmul.f32 0.0625, %v4720_v19 }
 0x5f4   :  { %4878 = vadd.xlane.f32.xlu1 %v4877_v30  ;;  %v4717_v43 = vpop.xlane.xlu0 %4716 }
 0x5f5   :  { %8803 = vst [vmem:[#allocation44_spill] sm:$0xff] %v8311_v10  ;;  %v4898_v57 = vsel %vm33_vm0, %v4832_v13, 0.0  ;;  %v4831_v24 = vmul.f32 %v8311_v10, %v8311_v10  ;;  %v4771_v5 = vmul.f32 0.0625, %v4717_v43  ;;  %v8321_v12 = vsub.f32 %v8057_v42, %v4772_v18 }
 0x5f6   :  { %v4702_v9 = vpop.xlane.xlu1 %4701  ;;  %4899 = vadd.xlane.f32.xlu0 %v4898_v57 }
 0x5f7   :  { %v4766_v23 = vmul.f32 0.0625, %v4702_v9  ;;  %v4895_v46 = vsel %vm33_vm0, %v4831_v24, 0.0  ;;  %v8327_v13 = vsub.f32 %v8064_v16, %v4771_v5  ;;  %v4836_v42 = vmul.f32 %v8321_v12, %v8321_v12 }
 0x5f8   :  { %4896 = vadd.xlane.f32.xlu1 %v4895_v46  ;;  %v4699_v63 = vpop.xlane.xlu0 %4698 }
 0x5f9   :  { %v8324_v19 = vsub.f32 %v8071_v7, %v4766_v23  ;;  %v4765_v30 = vmul.f32 0.0625, %v4699_v63  ;;  %v4835_v46 = vmul.f32 %v8327_v13, %v8327_v13 }
 0x5fa   :  { %v4714_v29 = vpop.xlane.xlu1 %4713 }
 0x5fb   :  { %v8330_v10 = vsub.f32 %v8078_v22, %v4765_v30  ;;  %v4770_v43 = vmul.f32 0.0625, %v4714_v29  ;;  %v4830_v57 = vmul.f32 %v8324_v19, %v8324_v19 }
 0x5fc   :  { %v4711_v24 = vpop.xlane.xlu0 %4710 }
 0x5fd   :  { %v8337_v18 = vsub.f32 %v8085_v0, %v4770_v43  ;;  %v4769_v7 = vmul.f32 0.0625, %v4711_v24  ;;  %v4892_v9 = vsel %vm33_vm0, %v4830_v57, 0.0  ;;  %v4829_v16 = vmul.f32 %v8330_v10, %v8330_v10 }
 0x5fe   :  { %v4732_v5 = vpop.xlane.xlu1 %4731  ;;  %4893 = vadd.xlane.f32.xlu0 %v4892_v9  ;;  %v4910_v43 = vsel %vm33_vm0, %v4836_v42, 0.0  ;;  %v4907_v9 = vsel %vm33_vm0, %v4835_v46, 0.0 }
 0x5ff   :  { %v8343_v22 = vsub.f32 %v8092_v53, %v4769_v7  ;;  %v4776_v29 = vmul.f32 0.0625, %v4732_v5  ;;  %v4889_v23 = vsel %vm33_vm0, %v4829_v16, 0.0  ;;  %v4834_v57 = vmul.f32 %v8337_v18, %v8337_v18 }
 0x600   :  { %4890 = vadd.xlane.f32.xlu1 %v4889_v23  ;;  %v4729_v0 = vpop.xlane.xlu0 %4728 }
 0x601   :  { %v8349_v63 = vsub.f32 %v8099_v11, %v4776_v29  ;;  %v4775_v30 = vmul.f32 0.0625, %v4729_v0  ;;  %v4833_v16 = vmul.f32 %v8343_v22, %v8343_v22  ;;  %v4904_v29 = vsel %vm33_vm0, %v4834_v57, 0.0 }
 0x602   :  { %v4726_v24 = vpop.xlane.xlu1 %4725  ;;  %4911 = vadd.xlane.f32.xlu0 %v4910_v43 }
 0x603   :  { %v8355_v53 = vsub.f32 %v8106_v25, %v4775_v30  ;;  %v4774_v7 = vmul.f32 0.0625, %v4726_v24  ;;  %v4840_v23 = vmul.f32 %v8349_v63, %v8349_v63  ;;  %v4901_v30 = vsel %vm33_vm0, %v4833_v16, 0.0 }
 0x604   :  { %4908 = vadd.xlane.f32.xlu1 %v4907_v9  ;;  %v4723_v11 = vpop.xlane.xlu0 %4722 }
 0x605   :  { %v8361_v5 = vsub.f32 %v8113_v36, %v4774_v7  ;;  %v4773_v42 = vmul.f32 0.0625, %v4723_v11  ;;  %v4839_v43 = vmul.f32 %v8355_v53, %v8355_v53  ;;  %v4922_v7 = vsel %vm33_vm0, %v4840_v23, 0.0 }
 0x606   :  { %v4744_v0 = vpop.xlane.xlu1 %4743  ;;  %4905 = vadd.xlane.f32.xlu0 %v4904_v29 }
 0x607   :  { %v8367_v25 = vsub.f32 %v8120_v49, %v4773_v42  ;;  %v4780_v46 = vmul.f32 0.0625, %v4744_v0  ;;  %v4838_v9 = vmul.f32 %v8361_v5, %v8361_v5  ;;  %v4919_v42 = vsel %vm33_vm0, %v4839_v43, 0.0 }
 0x608   :  { %4902 = vadd.xlane.f32.xlu1 %v4901_v30  ;;  %v4741_v36 = vpop.xlane.xlu0 %4740 }
 0x609   :  { %v8373_v24 = vsub.f32 %v8129_v52, %v4780_v46  ;;  %v4779_v57 = vmul.f32 0.0625, %v4741_v36  ;;  %v4837_v29 = vmul.f32 %v8367_v25, %v8367_v25  ;;  %v4916_v46 = vsel %vm33_vm0, %v4838_v9, 0.0 }
 0x60a   :  { %v4738_v11 = vpop.xlane.xlu1 %4737  ;;  %4923 = vadd.xlane.f32.xlu0 %v4922_v7 }
 0x60b   :  { %v8379_v49 = vsub.f32 %v8136_v15, %v4779_v57  ;;  %v4778_v16 = vmul.f32 0.0625, %v4738_v11  ;;  %v4844_v30 = vmul.f32 %v8373_v24, %v8373_v24  ;;  %v4913_v57 = vsel %vm33_vm0, %v4837_v29, 0.0 }
 0x60c   :  { %4920 = vadd.xlane.f32.xlu1 %v4919_v42  ;;  %v4735_v52 = vpop.xlane.xlu0 %4734 }
 0x60d   :  { %v8385_v0 = vsub.f32 %v8142_v50, %v4778_v16  ;;  %v4777_v23 = vmul.f32 0.0625, %v4735_v52  ;;  %v4843_v7 = vmul.f32 %v8379_v49, %v8379_v49  ;;  %v4934_v16 = vsel %vm33_vm0, %v4844_v30, 0.0 }
 0x60e   :  { %v4750_v36 = vpop.xlane.xlu1 %4749  ;;  %4917 = vadd.xlane.f32.xlu0 %v4916_v46 }
 0x60f   :  { %v8391_v15 = vsub.f32 %v8150_v6, %v4777_v23  ;;  %v4782_v43 = vmul.f32 0.0625, %v4750_v36  ;;  %v4842_v42 = vmul.f32 %v8385_v0, %v8385_v0  ;;  %v4931_v29 = vsel %vm33_vm0, %v4843_v7, 0.0 }
 0x610   :  { %4914 = vadd.xlane.f32.xlu1 %v4913_v57  ;;  %v4747_v50 = vpop.xlane.xlu0 %4746 }
 0x611   :  { %v8397_v11 = vsub.f32 %v8155_v20, %v4782_v43  ;;  %v4781_v9 = vmul.f32 0.0625, %v4747_v50  ;;  %v4841_v52 = vmul.f32 %v8391_v15, %v8391_v15  ;;  %v4928_v23 = vsel %vm33_vm0, %v4842_v42, 0.0 }
 0x612   :  { %4935 = vadd.xlane.f32.xlu0 %v4934_v16  ;;  %v8806_v43 = vsub.s32 7, %v8781_v28  ;;  %v8422_v50 = vpop.permute.xlu1 %5153 }
 0x613   :  { %8804 = vst [vmem:[#allocation18_spill] sm:$0xff] %v8397_v11  ;;  %v8403_v6 = vsub.f32 %v8160_v27, %v4781_v9  ;;  %v4846_v20 = vmul.f32 %v8397_v11, %v8397_v11  ;;  %v4925_v46 = vsel %vm33_vm0, %v4841_v52, 0.0 }
 0x614   :  { %4932 = vadd.xlane.f32.xlu1 %v4931_v29  ;;  %v5239_v57 = vrot.slane %v8747_v48, %v8806_v43  ;;  %v8420_v7 = vpop.permute.xlu0 %5234 }
 0x615   :  { %8805 = vst [vmem:[#allocation31_spill] sm:$0xff] %v8403_v6  ;;  %v4845_v30 = vmul.f32 %v8403_v6, %v8403_v6  ;;  %v4940_v27 = vsel %vm33_vm0, %v4846_v20, 0.0 }
 0x616   :  { %4929 = vadd.xlane.f32.xlu0 %v4928_v23 }
 0x617   :  { %v4937_v36 = vsel %vm33_vm0, %v4845_v30, 0.0 }
 0x618   :  { %4926 = vadd.xlane.f32.xlu1 %v4925_v46 }
 0x61a   :  { %4941 = vadd.xlane.f32.xlu0 %v4940_v27 }
 0x61c   :  { %4938 = vadd.xlane.f32.xlu1 %v4937_v36 }
 0x62d   :  { %5241 = vbcast.lane.b32.xlu1 %v5239_v57, 256 }
 0x630   :  { %5157 = vbcast.lane.b32.xlu0 %v8180_v8, 264 }
 0x634   :  { %5245 = vbcast.lane.b32.xlu0 %v5239_v57, 264 }
 0x661   :  { %v4852_v9 = vpop.xlane.xlu0 %4851 }
 0x662   :  { %v4944_v16 = vmul.f32 0.0625, %v4852_v9 }
 0x663   :  { %v4849_v42 = vpop.xlane.xlu1 %4848 }
 0x664   :  { %v4976_v29 = vadd.f32 1e-05, %v4944_v16  ;;  %v4943_v52 = vmul.f32 0.0625, %v4849_v42 }
 0x666   :  { %6304 = vrsqrt.f32 %v4976_v29  ;;  %v4975_v23 = vadd.f32 1e-05, %v4943_v52 }
 0x667   :  { %v4864_v20 = vpop.xlane.xlu0 %4863 }
 0x668   :  { %6306 = vrsqrt.f32 %v4975_v23  ;;  %v4948_v28 = vmul.f32 0.0625, %v4864_v20 }
 0x669   :  { %v4861_v46 = vpop.xlane.xlu1 %4860 }
 0x66a   :  { %v4980_v48 = vadd.f32 1e-05, %v4948_v28  ;;  %v4947_v30 = vmul.f32 0.0625, %v4861_v46 }
 0x66b   :  { %v4858_v27 = vpop.xlane.xlu0 %4857 }
 0x66c   :  { %6308 = vrsqrt.f32 %v4980_v48  ;;  %v4979_v8 = vadd.f32 1e-05, %v4947_v30  ;;  %v4946_v36 = vmul.f32 0.0625, %v4858_v27 }
 0x66d   :  { %v4855_v43 = vpop.xlane.xlu1 %4854 }
 0x66e   :  { %6310 = vrsqrt.f32 %v4979_v8  ;;  %v4978_v57 = vadd.f32 1e-05, %v4946_v36  ;;  %v4945_v6 = vmul.f32 0.0625, %v4855_v43 }
 0x66f   :  { %v4876_v9 = vpop.xlane.xlu0 %4875 }
 0x670   :  { %6312 = vrsqrt.f32 %v4978_v57  ;;  %v4977_v16 = vadd.f32 1e-05, %v4945_v6  ;;  %v4952_v42 = vmul.f32 0.0625, %v4876_v9 }
 0x671   :  { %v4873_v29 = vpop.xlane.xlu1 %4872 }
 0x672   :  { %6314 = vrsqrt.f32 %v4977_v16  ;;  %v4984_v52 = vadd.f32 1e-05, %v4952_v42  ;;  %v4951_v23 = vmul.f32 0.0625, %v4873_v29 }
 0x673   :  { %v6305_v20 = vpop.eup %6304  ;;  %v4870_v11 = vpop.xlane.xlu0 %4869 }
 0x674   :  { %v5040_v28 = vmul.f32 %v6305_v20, %v8225_v61  ;;  %6316 = vrsqrt.f32 %v4984_v52  ;;  %v4983_v46 = vadd.f32 1e-05, %v4951_v23  ;;  %v4950_v48 = vmul.f32 0.0625, %v4870_v11 }
 0x675   :  { %v6307_v30 = vpop.eup %6306  ;;  %v4867_v27 = vpop.xlane.xlu1 %4866 }
 0x676   :  { %v5248_v8 = vmul.f32 %v8170_v33, %v5040_v28  ;;  %v5039_v36 = vmul.f32 %v6307_v30, %v8228_v59  ;;  %6318 = vrsqrt.f32 %v4983_v46  ;;  %v4982_v6 = vadd.f32 1e-05, %v4950_v48 }
 0x677   :  { %v4949_v43 = vmul.f32 0.0625, %v4867_v27  ;;  %v4888_v57 = vpop.xlane.xlu0 %4887 }
 0x678   :  { %v5247_v9 = vmul.f32 %v8123_v41, %v5039_v36  ;;  %6320 = vrsqrt.f32 %v4982_v6  ;;  %v4956_v16 = vmul.f32 0.0625, %v4888_v57  ;;  %v5280_v61 = vsel %vm33_vm0, %v5248_v8, 0.0 }
 0x679   :  { %v6309_v42 = vpop.eup %6308  ;;  %v4981_v29 = vadd.f32 1e-05, %v4949_v43  ;;  %v4885_v52 = vpop.xlane.xlu1 %4884  ;;  %v5435_v43 = vstv %s6040_s7 }
 0x67a   :  { %v5279_v11 = vsel %vm33_vm0, %v5247_v9, 0.0  ;;  %v5044_v23 = vmul.f32 %v6309_v42, %v8236_v2  ;;  %v4988_v33 = vadd.f32 1e-05, %v4956_v16  ;;  %v4955_v20 = vmul.f32 0.0625, %v4885_v52 }
 0x67b   :  { %v6311_v59 = vpop.eup %6310  ;;  %v5281_v28 = vadd.f32 %v5280_v61, %v5279_v11  ;;  %6322 = vrsqrt.f32 %v4981_v29  ;;  %v4882_v46 = vpop.xlane.xlu0 %4881 }
 0x67c   :  { %v5252_v41 = vmul.f32 %v8190_v55, %v5044_v23  ;;  %v5043_v48 = vmul.f32 %v6311_v59, %v8240_v58  ;;  %6324 = vrsqrt.f32 %v4988_v33  ;;  %v4987_v30 = vadd.f32 1e-05, %v4955_v20 }
 0x67d   :  { %v6313_v27 = vpop.eup %6312  ;;  %v5282_v8 = vrot.slane %v5281_v28, 4  ;;  %v4954_v36 = vmul.f32 0.0625, %v4882_v46  ;;  %v4879_v6 = vpop.xlane.xlu1 %4878  ;;  %v5436_v20 = vadd.f32 1e-07, %v5435_v43 }
 0x67e   :  { %v5251_v2 = vmul.f32 %v8182_v54, %v5043_v48  ;;  %v5042_v57 = vmul.f32 %v6313_v27, %v8245_v26  ;;  %6326 = vrsqrt.f32 %v4987_v30  ;;  %v5298_v42 = vsel %vm33_vm0, %v5252_v41, 0.0 }
 0x67f   :  { %v6315_v9 = vpop.eup %6314  ;;  %v5283_v16 = vadd.f32 %v5282_v8, %v5281_v28  ;;  %v4986_v61 = vadd.f32 1e-05, %v4954_v36  ;;  %v4953_v55 = vmul.f32 0.0625, %v4879_v6  ;;  %v4900_v29 = vpop.xlane.xlu0 %4899 }
 0x680   :  { %v5297_v58 = vsel %vm33_vm0, %v5251_v2, 0.0  ;;  %v5250_v52 = vmul.f32 %v8162_v56, %v5042_v57  ;;  %v5041_v11 = vmul.f32 %v6315_v9, %v8251_v4  ;;  %v4960_v23 = vmul.f32 0.0625, %v4900_v29 }
 0x681   :  { %v6317_v33 = vpop.eup %6316  ;;  %v5299_v54 = vadd.f32 %v5298_v42, %v5297_v58  ;;  %6328 = vrsqrt.f32 %v4986_v61  ;;  %v4985_v26 = vadd.f32 1e-05, %v4953_v55  ;;  %v4897_v59 = vpop.xlane.xlu1 %4896  ;;  %v5284_v46 = vrot.slane %v5283_v16, 2 }
 0x682   :  { %v5249_v28 = vmul.f32 %v8145_v31, %v5041_v11  ;;  %v5048_v41 = vmul.f32 %v6317_v33, %v8257_v32  ;;  %v4992_v48 = vadd.f32 1e-05, %v4960_v23  ;;  %v5289_v8 = vsel %vm33_vm0, %v5250_v52, 0.0 }
 0x683   :  { %v6319_v30 = vpop.eup %6318  ;;  %v5300_v27 = vrot.slane %v5299_v54, 4  ;;  %6330 = vrsqrt.f32 %v4985_v26  ;;  %v4959_v56 = vmul.f32 0.0625, %v4897_v59  ;;  %v5285_v42 = vadd.f32 %v5284_v46, %v5283_v16 }
 0x684   :  { %v5288_v4 = vsel %vm33_vm0, %v5249_v28, 0.0  ;;  %v5256_v36 = vmul.f32 %v8206_v39, %v5048_v41  ;;  %v5047_v6 = vmul.f32 %v6319_v30, %v8263_v44  ;;  %6332 = vrsqrt.f32 %v4992_v48 }
 0x685   :  { %v6321_v43 = vpop.eup %6320  ;;  %6334 = vrcp.f32 %v5436_v20  ;;  %v5301_v2 = vadd.f32 %v5300_v27, %v5299_v54  ;;  %v5290_v31 = vadd.f32 %v5289_v8, %v5288_v4  ;;  %v4991_v57 = vadd.f32 1e-05, %v4959_v56 }
 0x686   :  { %v5255_v32 = vmul.f32 %v8200_v17, %v5047_v6  ;;  %v5046_v9 = vmul.f32 %v6321_v43, %v8269_v40  ;;  %v5316_v39 = vsel %vm33_vm0, %v5256_v36, 0.0  ;;  %v5286_v54 = vrot.slane %v5285_v42, 1 }
 0x687   :  { %v5302_v61 = vrot.slane %v5301_v2, 2  ;;  %v5291_v55 = vrot.slane %v5290_v31, 4  ;;  %6336 = vrsqrt.f32 %v4991_v57  ;;  %v4894_v29 = vpop.xlane.xlu0 %4893 }
 0x688   :  { %v6323_v58 = vpop.eup %6322  ;;  %v5315_v44 = vsel %vm33_vm0, %v5255_v32, 0.0  ;;  %v5254_v20 = vmul.f32 %v8198_v47, %v5046_v9  ;;  %v4958_v59 = vmul.f32 0.0625, %v4894_v29  ;;  %v5287_v6 = vadd.f32 %v5286_v54, %v5285_v42 }
 0x689   :  { %v6325_v52 = vpop.eup %6324  ;;  %v5292_v11 = vadd.f32 %v5291_v55, %v5290_v31  ;;  %v5317_v23 = vadd.f32 %v5316_v39, %v5315_v44  ;;  %v4891_v33 = vpop.xlane.xlu1 %4890  ;;  %v5045_v17 = vmul.f32 %v6323_v58, %v8275_v1  ;;  %v5303_v26 = vadd.f32 %v5302_v61, %v5301_v2 }
 0x68a   :  { %v5052_v40 = vmul.f32 %v6325_v52, %v8281_v60  ;;  %v4957_v8 = vmul.f32 0.0625, %v4891_v33  ;;  %v5307_v1 = vsel %vm33_vm0, %v5254_v20, 0.0  ;;  %v4990_v31 = vadd.f32 1e-05, %v4958_v59 }
 0x68b   :  { %v6327_v16 = vpop.eup %6326  ;;  %v4912_v46 = vpop.xlane.xlu0 %4911  ;;  %v5293_v28 = vrot.slane %v5292_v11, 2  ;;  %v5253_v41 = vmul.f32 %v8192_v35, %v5045_v17  ;;  %v5318_v30 = vrot.slane %v5317_v23, 4  ;;  %v5304_v43 = vrot.slane %v5303_v26, 1 }
 0x68c   :  { %v5051_v48 = vmul.f32 %v6327_v16, %v8287_v34  ;;  %v5260_v27 = vmul.f32 %v8222_v3, %v5052_v40  ;;  %v4964_v36 = vmul.f32 0.0625, %v4912_v46  ;;  %v4989_v39 = vadd.f32 1e-05, %v4957_v8  ;;  %v8807_v46 = vld [vmem:[#allocation44_spill] sm:$0xff] }
 0x68d   :  { %v4909_v56 = vpop.xlane.xlu1 %4908  ;;  %v5306_v60 = vsel %vm33_vm0, %v5253_v41, 0.0  ;;  %v5294_v34 = vadd.f32 %v5293_v28, %v5292_v11  ;;  %v5319_v55 = vadd.f32 %v5318_v30, %v5317_v23  ;;  %v8469_v40 = vadd.f32 %v5304_v43, %v5303_v26 }
 0x68e   :  { %v6329_v47 = vpop.eup %6328  ;;  %v5259_v4 = vmul.f32 %v8216_v38, %v5051_v48  ;;  %v5308_v2 = vadd.f32 %v5307_v1, %v5306_v60  ;;  %v4996_v9 = vadd.f32 1e-05, %v4964_v36  ;;  %v5334_v58 = vsel %vm33_vm0, %v5260_v27, 0.0  ;;  %v8808_v1 = vld [vmem:[#allocation9_spill] sm:$0xff] }
 0x68f   :  { %v4906_v35 = vpop.xlane.xlu0 %4905  ;;  %v5050_v3 = vmul.f32 %v6329_v47, %v8293_v21  ;;  %v5295_v16 = vrot.slane %v5294_v34, 1  ;;  %v4963_v59 = vmul.f32 0.0625, %v4909_v56 }
 0x690   :  { %v6331_v57 = vpop.eup %6330  ;;  %v5333_v32 = vsel %vm33_vm0, %v5259_v4, 0.0  ;;  %v5309_v29 = vrot.slane %v5308_v2, 4  ;;  %6338 = vrsqrt.f32 %v4996_v9  ;;  %v4962_v27 = vmul.f32 0.0625, %v4906_v35 }
 0x691   :  { %v6333_v61 = vpop.eup %6332  ;;  %v4903_v38 = vpop.xlane.xlu1 %4902  ;;  %v5258_v42 = vmul.f32 %v8214_v51, %v5050_v3  ;;  %v5049_v52 = vmul.f32 %v6331_v57, %v8299_v45  ;;  %v5335_v20 = vadd.f32 %v5334_v58, %v5333_v32  ;;  %6340 = vrsqrt.f32 %v4990_v31 }
 0x692   :  { %v8461_v44 = vpop.eup %6334  ;;  %v5056_v11 = vmul.f32 %v6333_v61, %v8305_v14  ;;  %v5310_v21 = vadd.f32 %v5309_v29, %v5308_v2  ;;  %v5320_v51 = vrot.slane %v5319_v55, 2  ;;  %6342 = vrsqrt.f32 %v4989_v39 }
 0x693   :  { %v8467_v33 = vmul.f32 %v8461_v44, %v5287_v6  ;;  %v4924_v23 = vpop.xlane.xlu0 %4923  ;;  %v5257_v54 = vmul.f32 %v8208_v62, %v5049_v52  ;;  %v5325_v41 = vsel %vm33_vm0, %v5258_v42, 0.0  ;;  %v4995_v30 = vadd.f32 1e-05, %v4963_v59 }
 0x694   :  { %v6337_v17 = vpop.eup %6336  ;;  %v5264_v45 = vmul.f32 %v8175_v37, %v5056_v11  ;;  %v5311_v8 = vrot.slane %v5310_v21, 2  ;;  %v5336_v26 = vrot.slane %v5335_v20, 4  ;;  %v4994_v56 = vadd.f32 1e-05, %v4962_v27 }
 0x695   :  { %v5055_v14 = vmul.f32 %v6337_v17, %v8807_v46  ;;  %v4921_v28 = vpop.xlane.xlu1 %4920  ;;  %v5324_v48 = vsel %vm33_vm0, %v5257_v54, 0.0  ;;  %6344 = vrsqrt.f32 %v4995_v30  ;;  %v4961_v4 = vmul.f32 0.0625, %v4903_v38 }
 0x696   :  { %v5326_v47 = vadd.f32 %v5325_v41, %v5324_v48  ;;  %v4968_v37 = vmul.f32 0.0625, %v4924_v23  ;;  %v5296_v36 = vadd.f32 %v5295_v16, %v5294_v34  ;;  %v5352_v43 = vsel %vm33_vm0, %v5264_v45, 0.0 }
 0x697   :  { %v5263_v60 = vmul.f32 %v8808_v1, %v5055_v14  ;;  %v4918_v62 = vpop.xlane.xlu0 %4917  ;;  %6346 = vrsqrt.f32 %v4994_v56  ;;  %v4993_v35 = vadd.f32 1e-05, %v4961_v4  ;;  %v5312_v3 = vadd.f32 %v5311_v8, %v5310_v21 }
 0x698   :  { %v5327_v6 = vrot.slane %v5326_v47, 4  ;;  %v5000_v32 = vadd.f32 1e-05, %v4968_v37  ;;  %v5337_v9 = vadd.f32 %v5336_v26, %v5335_v20  ;;  %v4967_v29 = vmul.f32 0.0625, %v4921_v28 }
 0x699   :  { %v5351_v2 = vsel %vm33_vm0, %v5263_v60, 0.0  ;;  %v4915_v31 = vpop.xlane.xlu1 %4914  ;;  %6348 = vrsqrt.f32 %v4993_v35  ;;  %v4966_v38 = vmul.f32 0.0625, %v4918_v62  ;;  %v5321_v34 = vadd.f32 %v5320_v51, %v5319_v55  ;;  %v8809_v35 = vld [vmem:[#allocation4_spill] sm:$0xff] }
 0x69a   :  { %v5353_v57 = vadd.f32 %v5352_v43, %v5351_v2  ;;  %v5328_v61 = vadd.f32 %v5327_v6, %v5326_v47  ;;  %v4965_v42 = vmul.f32 0.0625, %v4915_v31  ;;  %6350 = vrsqrt.f32 %v5000_v32 }
 0x69b   :  { %v4936_v58 = vpop.xlane.xlu0 %4935  ;;  %v4999_v11 = vadd.f32 1e-05, %v4967_v29  ;;  %v4998_v16 = vadd.f32 1e-05, %v4966_v38  ;;  %v5313_v46 = vrot.slane %v5312_v3, 1  ;;  %v5338_v21 = vrot.slane %v5337_v9, 2 }
 0x69c   :  { %v5354_v39 = vrot.slane %v5353_v57, 4  ;;  %v5329_v52 = vrot.slane %v5328_v61, 2  ;;  %v4997_v54 = vadd.f32 1e-05, %v4965_v42  ;;  %v4972_v59 = vmul.f32 0.0625, %v4936_v58 }
 0x69d   :  { %v4933_v23 = vpop.xlane.xlu1 %4932  ;;  %v6339_v45 = vpop.eup %6338  ;;  %6352 = vrsqrt.f32 %v4999_v11  ;;  %v8482_v47 = vmul.f32 %v8461_v44, %v8469_v40  ;;  %v5322_v1 = vrot.slane %v5321_v34, 1  ;;  %v5314_v62 = vadd.f32 %v5313_v46, %v5312_v3 }
 0x69e   :  { %v5355_v17 = vadd.f32 %v5354_v39, %v5353_v57  ;;  %v4971_v20 = vmul.f32 0.0625, %v4933_v23  ;;  %v6341_v28 = vpop.eup %6340  ;;  %v5330_v41 = vadd.f32 %v5329_v52, %v5328_v61  ;;  %6354 = vrsqrt.f32 %v4998_v16 }
 0x69f   :  { %v4930_v14 = vpop.xlane.xlu0 %4929  ;;  %v5004_v30 = vadd.f32 1e-05, %v4972_v59  ;;  %v5060_v55 = vmul.f32 %v6339_v45, %v8321_v12  ;;  %6356 = vrsqrt.f32 %v4997_v54  ;;  %v6343_v26 = vpop.eup %6342  ;;  %v5339_v56 = vadd.f32 %v5338_v21, %v5337_v9 }
 0x6a0   :  { %v5356_v48 = vrot.slane %v5355_v17, 2  ;;  %v5003_v51 = vadd.f32 1e-05, %v4971_v20  ;;  %v4970_v27 = vmul.f32 0.0625, %v4930_v14  ;;  %v5331_v6 = vrot.slane %v5330_v41, 1 }
 0x6a1   :  { %v4927_v8 = vpop.xlane.xlu1 %4926  ;;  %6358 = vrsqrt.f32 %v5004_v30  ;;  %v5439_v57 = vmul.f32 %v8461_v44, %v5296_v36  ;;  %v5268_v40 = vmul.f32 %v8809_v35, %v5060_v55  ;;  %v5053_v61 = vmul.f32 %v6343_v26, %v8330_v10  ;;  %v8812_v30 = vld [vmem:[#allocation8_spill] sm:$0xff]  ;;  %v8813_v26 = vld [vmem:[#allocation15_spill] sm:$0xff] }
 0x6a2   :  { %v4969_v60 = vmul.f32 0.0625, %v4927_v8  ;;  %6360 = vrsqrt.f32 %v5003_v51  ;;  %v5002_v4 = vadd.f32 1e-05, %v4970_v27  ;;  %v8484_v12 = vadd.f32 %v5356_v48, %v5355_v17  ;;  %v6345_v31 = vpop.eup %6344  ;;  %v8810_v17 = vld [vmem:[#allocation11_spill] sm:$0xff] }
 0x6a3   :  { %v4942_v37 = vpop.xlane.xlu0 %4941  ;;  %v5323_v3 = vadd.f32 %v5322_v1, %v5321_v34  ;;  %v5059_v9 = vmul.f32 %v6345_v31, %v8327_v13  ;;  %v5441_v39 = vmul.f32 %v8461_v44, %v5314_v62  ;;  %v5340_v38 = vrot.slane %v5339_v56, 1  ;;  %v8814_v31 = vld [vmem:[#allocation29_spill] sm:$0xff] }
 0x6a4   :  { %v5001_v43 = vadd.f32 1e-05, %v4969_v60  ;;  %v4974_v2 = vmul.f32 0.0625, %v4942_v37  ;;  %6362 = vrsqrt.f32 %v5002_v4  ;;  %v6347_v58 = vpop.eup %6346  ;;  %v5054_v52 = vmul.f32 %v6341_v28, %v8324_v19  ;;  %v8811_v19 = vld [vmem:[#allocation10_spill] sm:$0xff] }
 0x6a5   :  { %v4939_v32 = vpop.xlane.xlu1 %4938  ;;  %v8492_v11 = vadd.f32 %v5331_v6, %v5330_v41  ;;  %v5358_v23 = vrot.slane %v8484_v12, 1  ;;  %v5267_v10 = vmul.f32 %v8810_v17, %v5059_v9  ;;  %v5058_v34 = vmul.f32 %v6347_v58, %v8337_v18 }
 0x6a6   :  { %6364 = vrsqrt.f32 %v5001_v43  ;;  %v5006_v29 = vadd.f32 1e-05, %v4974_v2  ;;  %v4973_v42 = vmul.f32 0.0625, %v4939_v32  ;;  %v6349_v16 = vpop.eup %6348  ;;  %v5370_v13 = vsel %vm33_vm0, %v5268_v40, 0.0  ;;  %v8815_v40 = vld [vmem:[#allocation5_spill] sm:$0xff] }
 0x6a7   :  { %v5158_v36 = vpop.permute.xlu0 %5157  ;;  %v5261_v59 = vmul.f32 %v8422_v50, %v5053_v61  ;;  %v6351_v46 = vpop.eup %6350  ;;  %v5369_v21 = vsel %vm33_vm0, %v5267_v10, 0.0  ;;  %v5266_v20 = vmul.f32 %v8811_v19, %v5058_v34  ;;  %v5057_v14 = vmul.f32 %v6349_v16, %v8343_v22 }
 0x6a8   :  { %v5005_v54 = vadd.f32 1e-05, %v4973_v42  ;;  %v5262_v45 = vmul.f32 %v5158_v36, %v5054_v52  ;;  %6366 = vrsqrt.f32 %v5006_v29  ;;  %v5371_v28 = vadd.f32 %v5370_v13, %v5369_v21 }
 0x6a9   :  { %v5064_v41 = vmul.f32 %v6351_v46, %v8349_v63  ;;  %v8503_v18 = vadd.f32 %v5340_v38, %v5339_v56  ;;  %v5265_v55 = vmul.f32 %v8812_v30, %v5057_v14  ;;  %v8507_v50 = vmul.f32 %v8461_v44, %v5323_v3 }
 0x6aa   :  { %6368 = vrsqrt.f32 %v5005_v54  ;;  %v6353_v48 = vpop.eup %6352  ;;  %v5471_v51 = vsel %vm5470_vm2, %v5439_v57, %v8467_v33  ;;  %v5343_v27 = vsel %vm33_vm0, %v5262_v45, 0.0  ;;  %v5372_v22 = vrot.slane %v5371_v28, 4 }
 0x6ab   :  { %v6355_v8 = vpop.eup %6354  ;;  %v5272_v1 = vmul.f32 %v8813_v26, %v5064_v41  ;;  %v5063_v63 = vmul.f32 %v6353_v48, %v8355_v53  ;;  %v5342_v60 = vsel %vm33_vm0, %v5261_v59, 0.0  ;;  %v5361_v56 = vsel %vm33_vm0, %v5266_v20, 0.0  ;;  %v8819_v48 = vld [vmem:[#allocation17_spill] sm:$0xff] }
 0x6ac   :  { %v6357_v62 = vpop.eup %6356  ;;  %v5360_v4 = vsel %vm33_vm0, %v5265_v55, 0.0  ;;  %v5062_v37 = vmul.f32 %v6355_v8, %v8361_v5  ;;  %v5344_v6 = vadd.f32 %v5343_v27, %v5342_v60  ;;  %v5373_v33 = vadd.f32 %v5372_v22, %v5371_v28  ;;  %v8818_v28 = vld [vmem:[#allocation13_spill] sm:$0xff] }
 0x6ad   :  { %v5362_v2 = vadd.f32 %v5361_v56, %v5360_v4  ;;  %v5271_v57 = vmul.f32 %v8814_v31, %v5063_v63  ;;  %v5473_v35 = vsel %vm5472_vm3, %v8482_v47, %v5471_v51  ;;  %v5061_v61 = vmul.f32 %v6357_v62, %v8367_v25  ;;  %v8816_v47 = vld [vmem:[#allocation12_spill] sm:$0xff] }
 0x6ae   :  { %v6359_v43 = vpop.eup %6358  ;;  %v5270_v32 = vmul.f32 %v8815_v40, %v5062_v37  ;;  %v5475_v9 = vsel %vm5474_vm4, %v5441_v39, %v5473_v35  ;;  %v5388_v29 = vsel %vm33_vm0, %v5272_v1, 0.0  ;;  %v5345_v10 = vrot.slane %v5344_v6, 4  ;;  %v5246_v37 = vpop.permute.xlu0 %5245 }
 0x6af   :  { %v6361_v53 = vpop.eup %6360  ;;  %v5068_v3 = vmul.f32 %v6359_v43, %v8373_v24  ;;  %v5363_v5 = vrot.slane %v5362_v2, 4  ;;  %v5387_v58 = vsel %vm33_vm0, %v5271_v57, 0.0  ;;  %v5269_v36 = vmul.f32 %v8816_v47, %v5061_v61  ;;  %v8817_v24 = vld [vmem:[#allocation14_spill] sm:$0xff]  ;;  %v5242_v57 = vpop.permute.xlu1 %5241 }
 0x6b0   :  { %v5067_v38 = vmul.f32 %v6361_v53, %v8379_v49  ;;  %v5389_v52 = vadd.f32 %v5388_v29, %v5387_v58  ;;  %v5374_v25 = vrot.slane %v5373_v33, 2  ;;  %v5379_v59 = vsel %vm33_vm0, %v5270_v32, 0.0  ;;  %v8821_v32 = vld [vmem:[#allocation31_spill] sm:$0xff] }
 0x6b1   :  { %v6363_v42 = vpop.eup %6362  ;;  %v5276_v17 = vmul.f32 %v8420_v7, %v5068_v3  ;;  %v5364_v16 = vadd.f32 %v5363_v5, %v5362_v2  ;;  %v5378_v49 = vsel %vm33_vm0, %v5269_v36, 0.0  ;;  %v5346_v8 = vadd.f32 %v5345_v10, %v5344_v6  ;;  %v8820_v2 = vld [vmem:[#allocation18_spill] sm:$0xff] }
 0x6b2   :  { %v5275_v13 = vmul.f32 %v8817_v24, %v5067_v38  ;;  %v5066_v39 = vmul.f32 %v6363_v42, %v8385_v0  ;;  %v5390_v54 = vrot.slane %v5389_v52, 4  ;;  %v5380_v21 = vadd.f32 %v5379_v59, %v5378_v49 }
 0x6b3   :  { %v6365_v34 = vpop.eup %6364  ;;  %v5365_v46 = vrot.slane %v5364_v16, 2  ;;  %v5406_v7 = vsel %vm33_vm0, %v5276_v17, 0.0  ;;  %v5375_v55 = vadd.f32 %v5374_v25, %v5373_v33  ;;  %v5443_v4 = vmul.f32 %v8461_v44, %v8492_v11 }
 0x6b4   :  { %v5065_v45 = vmul.f32 %v6365_v34, %v8391_v15  ;;  %v5405_v19 = vsel %vm33_vm0, %v5275_v13, 0.0  ;;  %v5391_v20 = vadd.f32 %v5390_v54, %v5389_v52  ;;  %v5274_v41 = vmul.f32 %v8818_v28, %v5066_v39 }
 0x6b5   :  { %v5407_v14 = vadd.f32 %v5406_v7, %v5405_v19  ;;  %v6367_v30 = vpop.eup %6366  ;;  %v5366_v51 = vadd.f32 %v5365_v46, %v5364_v16  ;;  %v5381_v27 = vrot.slane %v5380_v21, 4  ;;  %v5477_v6 = vsel %vm5476_vm5, %v8507_v50, %v5475_v9 }
 0x6b6   :  { %v5273_v0 = vmul.f32 %v8819_v48, %v5065_v45  ;;  %v5392_v26 = vrot.slane %v5391_v20, 2  ;;  %v5397_v1 = vsel %vm33_vm0, %v5274_v41, 0.0  ;;  %v5347_v33 = vrot.slane %v5346_v8, 2 }
 0x6b7   :  { %v6369_v22 = vpop.eup %6368  ;;  %v5408_v15 = vrot.slane %v5407_v14, 4  ;;  %v5367_v60 = vrot.slane %v5366_v51, 1  ;;  %v5382_v62 = vadd.f32 %v5381_v27, %v5380_v21  ;;  %v5070_v31 = vmul.f32 %v6367_v30, %v8820_v2 }
 0x6b8   :  { %v5396_v63 = vsel %vm33_vm0, %v5273_v0, 0.0  ;;  %v5376_v35 = vrot.slane %v5375_v55, 1  ;;  %v5069_v61 = vmul.f32 %v6369_v22, %v8821_v32  ;;  %v5393_v5 = vadd.f32 %v5392_v26, %v5391_v20 }
 0x6b9   :  { %v5398_v56 = vadd.f32 %v5397_v1, %v5396_v63  ;;  %v5409_v43 = vadd.f32 %v5408_v15, %v5407_v14  ;;  %v5383_v53 = vrot.slane %v5382_v62, 2  ;;  %v5368_v3 = vadd.f32 %v5367_v60, %v5366_v51 }
 0x6ba   :  { %v5348_v29 = vadd.f32 %v5347_v33, %v5346_v8  ;;  %v5278_v58 = vmul.f32 %v5246_v37, %v5070_v31  ;;  %v5277_v52 = vmul.f32 %v5242_v57, %v5069_v61  ;;  %v5359_v50 = vadd.f32 %v5358_v23, %v8484_v12 }
 0x6bb   :  { %v5399_v40 = vrot.slane %v5398_v56, 4  ;;  %v5384_v11 = vadd.f32 %v5383_v53, %v5382_v62  ;;  %v5410_v38 = vrot.slane %v5409_v43, 2  ;;  %v5444_v9 = vmul.f32 %v8461_v44, %v8503_v18 }
 0x6bc   :  { %v5479_v47 = vsel %vm5478_vm6, %v5443_v4, %v5477_v6  ;;  %v5349_v36 = vrot.slane %v5348_v29, 1  ;;  %v5415_v34 = vsel %vm33_vm0, %v5278_v58, 0.0  ;;  %v5414_v25 = vsel %vm33_vm0, %v5277_v52, 0.0 }
 0x6bd   :  { %v5400_v42 = vadd.f32 %v5399_v40, %v5398_v56  ;;  %v5385_v17 = vrot.slane %v5384_v11, 1  ;;  %v5377_v16 = vadd.f32 %v5376_v35, %v5375_v55  ;;  %v5447_v24 = vmul.f32 %v8461_v44, %v5368_v3 }
 0x6be   :  { %v5350_v13 = vadd.f32 %v5349_v36, %v5348_v29  ;;  %v5416_v39 = vadd.f32 %v5415_v34, %v5414_v25  ;;  %v5394_v54 = vrot.slane %v5393_v5, 1  ;;  %v5411_v12 = vadd.f32 %v5410_v38, %v5409_v43 }
 0x6bf   :  { %v5401_v10 = vrot.slane %v5400_v42, 2  ;;  %v5386_v59 = vadd.f32 %v5385_v17, %v5384_v11  ;;  %v5446_v18 = vmul.f32 %v8461_v44, %v5359_v50  ;;  %v5481_v21 = vsel %vm5480_vm7, %v5444_v9, %v5479_v47 }
 0x6c0   :  { %v5445_v49 = vmul.f32 %v8461_v44, %v5350_v13  ;;  %v5417_v45 = vrot.slane %v5416_v39, 4  ;;  %v5448_v28 = vmul.f32 %v8461_v44, %v5377_v16  ;;  %v5395_v41 = vadd.f32 %v5394_v54, %v5393_v5 }
 0x6c1   :  { %v5402_v23 = vadd.f32 %v5401_v10, %v5400_v42  ;;  %v5449_v7 = vmul.f32 %v8461_v44, %v5386_v59  ;;  %v5484_v14 = vsel %vm5470_vm2, %v5447_v24, %v5446_v18  ;;  %v5412_v48 = vrot.slane %v5411_v12, 1 }
 0x6c2   :  { %v5483_v19 = vsel %vm5482_vm8, %v5445_v49, %v5481_v21  ;;  %v5418_v20 = vadd.f32 %v5417_v45, %v5416_v39  ;;  %v5485_v55 = vsel %vm5472_vm3, %v5448_v28, %v5484_v14  ;;  %v5450_v26 = vmul.f32 %v8461_v44, %v5395_v41 }
 0x6c3   :  { %v5403_v46 = vrot.slane %v5402_v23, 1  ;;  %5493 = vst.msk [vmem:[%s8589_s8] sm:$0xff] %vm33_vm0, %v5483_v19  ;;  %v5486_v8 = vsel %vm5474_vm4, %v5449_v7, %v5485_v55  ;;  %v5413_v22 = vadd.f32 %v5412_v48, %v5411_v12 }
 0x6c4   :  { %v5419_v30 = vrot.slane %v5418_v20, 2  ;;  %v5487_v1 = vsel %vm5476_vm5, %v5450_v26, %v5486_v8 }
 0x6c5   :  { %v5404_v0 = vadd.f32 %v5403_v46, %v5402_v23  ;;  %v5452_v62 = vmul.f32 %v8461_v44, %v5413_v22 }
 0x6c6   :  { %v5420_v51 = vadd.f32 %v5419_v30, %v5418_v20 }
 0x6c7   :  { %v5451_v27 = vmul.f32 %v8461_v44, %v5404_v0 }
 0x6c8   :  { %v5421_v15 = vrot.slane %v5420_v51, 1 }
 0x6c9   :  { %v5488_v60 = vsel %vm5478_vm6, %v5451_v27, %v5487_v1 }
 0x6ca   :  { %v5422_v63 = vadd.f32 %v5421_v15, %v5420_v51  ;;  %v5489_v4 = vsel %vm5480_vm7, %v5452_v62, %v5488_v60 }
 0x6cc   :  { %v5453_v56 = vmul.f32 %v8461_v44, %v5422_v63 }
 0x6ce   :  { %v5490_v37 = vsel %vm5482_vm8, %v5453_v56, %v5489_v4 }
 0x6cf   :  { %5494 = vst.msk [vmem:[%s8589_s8 + $0x8] sm:$0xff] %vm33_vm0, %v5490_v37 }

</bundles_post_ra>
